<compile_context>
chip_gen: v5e
topology: v5e:2x2
jax: 0.10.0
libtpu: 0.0.40
codegen_flags: <defaults>
</compile_context>

<pallas_src>
import functools

import jax
import jax.numpy as jnp
from jax.experimental import pallas as pl
from jax.experimental.pallas import tpu as pltpu


def _conv_bn_kernel(w_ref, x_ref, gb_ref, o_ref, *, eps, inv_m, compute_dtype):
    # 1x1 conv == matmul on the MXU.  Cast activations in-register to the
    # compute dtype (bf16 fast path); accumulate in f32.
    x = x_ref[...].astype(compute_dtype)                               # (C_in, M)
    y = jnp.dot(w_ref[...], x, preferred_element_type=jnp.float32)     # (cb, M) f32

    # BatchNorm2d training mode, per-channel (= per-row) stats over M = N*H*W,
    # biased variance.  Single-pass: E[y^2] - E[y]^2 (f32 accumulation, safe
    # at post-matmul magnitudes).  Fold gamma / rsqrt / mean / beta into one
    # scale + shift (2 VPU ops on the tile).
    mean = jnp.sum(y, axis=1, keepdims=True) * inv_m                   # (cb, 1)
    mean_sq = jnp.sum(y * y, axis=1, keepdims=True) * inv_m            # (cb, 1)
    var = mean_sq - mean * mean

    gamma = gb_ref[:, 0:1]                                             # (cb, 1)
    beta = gb_ref[:, 1:2]                                              # (cb, 1)
    scale = gamma * jax.lax.rsqrt(var + eps)
    shift = beta - mean * scale
    o_ref[...] = (y * scale + shift).astype(o_ref.dtype)


def conv2d_1x1_batchnorm(x_nchw, weight, gamma, beta, eps=1e-5, cout_blocks=2):
    """x_nchw: (N, C_in, H, W) f32; weight: (C_out, C_in) (1x1 kernel squeezed),
    f32 or pre-cast bf16; gamma/beta: (C_out,) f32.  Returns (N, C_out, H, W) f32."""
    N, C_in, H, W = x_nchw.shape
    C_out = weight.shape[0]
    M = N * H * W

    if N == 1:
        # NCHW with N=1 is already (C_in, H*W) contiguous -> pure reshape.
        x2d = x_nchw.reshape(C_in, H * W)
    else:
        # General case needs one transpose to gather the batch into columns.
        x2d = jnp.transpose(x_nchw.reshape(N, C_in, H * W), (1, 0, 2)).reshape(C_in, M)

    # Pack gamma/beta into a single (C_out, 2) f32 input.
    gb = jnp.stack(
        [gamma.astype(jnp.float32), beta.astype(jnp.float32)], axis=1)  # (C_out, 2)

    compute_dtype = weight.dtype  # bf16 weight => bf16 MXU path, f32 accumulation

    # C_out split for megacore (v7x) / DMA-compute overlap (v5e/v6e).  Fall
    # back to a single block if the split would violate the sublane rule.
    if C_out % cout_blocks != 0 or (C_out // cout_blocks) % 8 != 0:
        cout_blocks = 1
    cb = C_out // cout_blocks

    w_bytes = weight.size * weight.dtype.itemsize
    x_bytes = x2d.size * x2d.dtype.itemsize
    o_bytes = C_out * M * 4
    cost = pl.CostEstimate(
        flops=2 * C_out * C_in * M,
        transcendentals=C_out,                      # rsqrt per output channel
        bytes_accessed=w_bytes + x_bytes + o_bytes + gb.size * 4,
    )

    out2d = pl.pallas_call(
        functools.partial(_conv_bn_kernel, eps=eps, inv_m=1.0 / M,
                          compute_dtype=compute_dtype),
        out_shape=jax.ShapeDtypeStruct((C_out, M), jnp.float32),
        grid=(cout_blocks,),
        in_specs=[
            pl.BlockSpec((cb, C_in), lambda i: (i, 0)),   # W block: per-grid-step C_out slice
            pl.BlockSpec((C_in, M), lambda i: (0, 0)),    # X: fetched once, stays resident
            pl.BlockSpec((cb, 2), lambda i: (i, 0)),      # packed gamma/beta block
        ],
        out_specs=pl.BlockSpec((cb, M), lambda i: (i, 0)),
        compiler_params=pltpu.CompilerParams(
            dimension_semantics=("parallel",)),           # independent C_out blocks (megacore)
        cost_estimate=cost,
    )(weight, x2d, gb)

    if N == 1:
        # (C_out, H*W) -> (1, C_out, H, W): pure reshape, no transpose.
        return out2d.reshape(1, C_out, H, W)
    return jnp.transpose(out2d.reshape(C_out, N, H, W), (1, 0, 2, 3))


def _reference(x_nchw, weight, gamma, beta, eps=1e-5):
    """Pure-JAX f32 reference matching the PyTorch module's forward."""
    N, C_in, H, W = x_nchw.shape
    C_out = weight.shape[0]
    x2d = jnp.transpose(x_nchw, (0, 2, 3, 1)).reshape(-1, C_in)
    y = x2d @ weight.T
    mean = jnp.mean(y, axis=0, keepdims=True)
    var = jnp.mean((y - mean) ** 2, axis=0, keepdims=True)
    y = (y - mean) / jnp.sqrt(var + eps) * gamma[None, :] + beta[None, :]
    return jnp.transpose(y.reshape(N, H, W, C_out), (0, 3, 1, 2))


if __name__ == "__main__":
    key = jax.random.PRNGKey(0)
    k_x, k_w, k_g, k_b = jax.random.split(key, 4)

    # Shapes implied by the module: x438 (1, 1824, 7, 7), Conv2d(1824 -> 304, 1x1).
    N, C_in, H, W = 1, 1824, 7, 7
    C_out = 304

    x438 = jax.random.normal(k_x, (N, C_in, H, W), dtype=jnp.float32)
    conv_w = jax.random.normal(k_w, (C_out, C_in), dtype=jnp.float32) * 0.02
    bn_gamma = 1.0 + 0.1 * jax.random.normal(k_g, (C_out,), dtype=jnp.float32)
    bn_beta = 0.1 * jax.random.normal(k_b, (C_out,), dtype=jnp.float32)

    ref = _reference(x438, conv_w, bn_gamma, bn_beta)

    # Default (performance) path: weight pre-cast to bf16 ONCE, stored-parameter
    # style; activations cast in-kernel; f32 accumulation + f32 BN math.
    conv_w_bf16 = conv_w.astype(jnp.bfloat16)
    out = jax.block_until_ready(
        conv2d_1x1_batchnorm(x438, conv_w_bf16, bn_gamma, bn_beta))
    assert out.shape == (N, C_out, H, W), out.shape
    assert jnp.allclose(out, ref, rtol=2e-2, atol=2e-2), "bf16 mismatch vs reference"

    # Exact-semantics f32 path (same kernel, f32 weight) to 1e-3 vs the f32
    # PyTorch-equivalent reference.
    out_f32 = jax.block_until_ready(
        conv2d_1x1_batchnorm(x438, conv_w, bn_gamma, bn_beta))
    assert out_f32.shape == (N, C_out, H, W), out_f32.shape
    assert jnp.allclose(out_f32, ref, rtol=1e-3, atol=1e-3), "f32 mismatch vs reference"

    # Single-block fallback path (grid=(1,)) also exercised for coverage.
    out_1blk = jax.block_until_ready(
        conv2d_1x1_batchnorm(x438, conv_w_bf16, bn_gamma, bn_beta, cout_blocks=1))
    assert jnp.allclose(out_1blk, ref, rtol=2e-2, atol=2e-2), "1-block mismatch"

    print("KERNEL_OK")
</pallas_src>

<mosaic_0001>
module attributes {stable_mosaic.version = 11 : i64} {
  func.func @_conv_bn_kernel(%arg0: i32, %arg1: memref<152x1824xbf16, #tpu.memory_space<vmem>>, %arg2: memref<1824x49xf32, #tpu.memory_space<vmem>>, %arg3: memref<152x2xf32, #tpu.memory_space<vmem>>, %arg4: memref<152x49xf32, #tpu.memory_space<vmem>>) attributes {dimension_semantics = [#tpu.dimension_semantics<parallel>], iteration_bounds = array<i64: 2>, scalar_prefetch = 0 : i64, scratch_operands = 0 : i64, tpu.core_type = #tpu.core_type<tc>, window_params = [{transform_indices = @transform_0, window_bounds = array<i64: 152, 1824>}, {pipeline_mode = #tpu.pipeline_mode<synchronous>, transform_indices = @transform_1, window_bounds = array<i64: 1824, 49>}, {transform_indices = @transform_2, window_bounds = array<i64: 152, 2>}, {transform_indices = @transform_3, window_bounds = array<i64: 152, 49>}]} {
    %c0 = arith.constant 0 : index
    %c0_0 = arith.constant 0 : index
    %0 = vector.load %arg2[%c0, %c0_0] : memref<1824x49xf32, #tpu.memory_space<vmem>>, vector<1824x49xf32>
    %1 = arith.truncf %0 : vector<1824x49xf32> to vector<1824x49xbf16>
    %c0_1 = arith.constant 0 : index
    %c0_2 = arith.constant 0 : index
    %2 = vector.load %arg1[%c0_1, %c0_2] : memref<152x1824xbf16, #tpu.memory_space<vmem>>, vector<152x1824xbf16>
    %cst = arith.constant dense<0.000000e+00> : vector<152x49xf32>
    %3 = tpu.matmul %2, %1, %cst {dimension_numbers = #tpu.dot_dimension_numbers<[1], [0], [0], [1], [0, 0, 1, 1], [], []>} : vector<152x1824xbf16>, vector<1824x49xbf16>, vector<152x49xf32> -> vector<152x49xf32>
    %cst_3 = arith.constant dense<0.000000e+00> : vector<152xf32>
    %4 = vector.multi_reduction <add>, %3, %cst_3 [1] : vector<152x49xf32> to vector<152xf32>
    %5 = vector.shape_cast %4 : vector<152xf32> to vector<152x1xf32>
    %cst_4 = arith.constant 0.0204081628 : f32
    %6 = vector.broadcast %cst_4 : f32 to vector<152x1xf32>
    %7 = arith.mulf %5, %6 : vector<152x1xf32>
    %8 = arith.mulf %3, %3 : vector<152x49xf32>
    %cst_5 = arith.constant dense<0.000000e+00> : vector<152xf32>
    %9 = vector.multi_reduction <add>, %8, %cst_5 [1] : vector<152x49xf32> to vector<152xf32>
    %10 = vector.shape_cast %9 : vector<152xf32> to vector<152x1xf32>
    %cst_6 = arith.constant 0.0204081628 : f32
    %11 = vector.broadcast %cst_6 : f32 to vector<152x1xf32>
    %12 = arith.mulf %10, %11 : vector<152x1xf32>
    %13 = arith.mulf %7, %7 : vector<152x1xf32>
    %14 = arith.subf %12, %13 : vector<152x1xf32>
    %c0_7 = arith.constant 0 : index
    %c0_8 = arith.constant 0 : index
    %15 = vector.load %arg3[%c0_7, %c0_8] : memref<152x2xf32, #tpu.memory_space<vmem>>, vector<152x1xf32>
    %c0_9 = arith.constant 0 : index
    %c1 = arith.constant 1 : index
    %16 = vector.load %arg3[%c0_9, %c1] : memref<152x2xf32, #tpu.memory_space<vmem>>, vector<152x1xf32>
    %cst_10 = arith.constant 9.99999974E-6 : f32
    %17 = vector.broadcast %cst_10 : f32 to vector<152x1xf32>
    %18 = arith.addf %14, %17 : vector<152x1xf32>
    %19 = math.rsqrt %18 : vector<152x1xf32>
    %20 = arith.mulf %15, %19 : vector<152x1xf32>
    %21 = arith.mulf %7, %20 : vector<152x1xf32>
    %22 = arith.subf %16, %21 : vector<152x1xf32>
    %23 = vector.broadcast %20 : vector<152x1xf32> to vector<152x49xf32>
    %24 = arith.mulf %3, %23 : vector<152x49xf32>
    %25 = vector.broadcast %22 : vector<152x1xf32> to vector<152x49xf32>
    %26 = arith.addf %24, %25 : vector<152x49xf32>
    %c0_11 = arith.constant 0 : index
    %c0_12 = arith.constant 0 : index
    %27 = vector.load %arg4[%c0_11, %c0_12] : memref<152x49xf32, #tpu.memory_space<vmem>>, vector<152x49xf32>
    tpu.vector_store %arg4[%c0_11, %c0_12], %26 {strides = array<i32>} : memref<152x49xf32, #tpu.memory_space<vmem>>, vector<152x49xf32>,
    return
  }
  func.func @transform_0(%arg0: i32) -> (i32, i32) {
    %c0_i32 = arith.constant 0 : i32
    %c0_i32_0 = arith.constant 0 : i32
    return %arg0, %c0_i32 : i32, i32
  }
  func.func @transform_1(%arg0: i32) -> (i32, i32) {
    %c0_i32 = arith.constant 0 : i32
    %c0_i32_0 = arith.constant 0 : i32
    %c0_i32_1 = arith.constant 0 : i32
    return %c0_i32, %c0_i32_0 : i32, i32
  }
  func.func @transform_2(%arg0: i32) -> (i32, i32) {
    %c0_i32 = arith.constant 0 : i32
    %c0_i32_0 = arith.constant 0 : i32
    return %arg0, %c0_i32 : i32, i32
  }
  func.func @transform_3(%arg0: i32) -> (i32, i32) {
    %c0_i32 = arith.constant 0 : i32
    %c0_i32_0 = arith.constant 0 : i32
    return %arg0, %c0_i32 : i32, i32
  }
}

</mosaic_0001>

<bundles_post_ra>
// kernel: tpu_custom_call.1
= control target key start
LH: loop header
LB: loop body
LE: loop exit
PB: predicated region body
PF: predicated region fallthrough
CT: control target
= control target key end

     0   :  { %s4020_s12 = smov 0   ;;  %s5960_s0 = inlined_call_operand.vmem [shape: bf16[304,1824], index: 0, kind: input, shape index: {}]   ;;  %s5961_s1 = inlined_call_operand.vmem [shape: f32[1824,49], index: 1, kind: input, shape index: {}]   ;;  %s5962_s2 = inlined_call_operand.vmem [shape: f32[304,2], index: 2, kind: input, shape index: {}]   ;;  %s5963_s3 = inlined_call_operand.vmem [shape: f32[304,49], index: 3, kind: output, shape index: {}]  }
   0x1 LB: > { %s3208_s13 = sadd.s32 4294967295, %s3995_s12   ;;  %p3212_p0 = scmp.ge.s32.totalorder %s3995_s12, 1  ;;  %s3995_s12 = sphi %s4020_s12, %s13_s12  }
   0x2   : > { %p150_p1 = scmp.lt.s32.totalorder %s3995_s12, 3 }
   0x4   : > { %p151_p2 = pnand %p3212_p0, %p150_p1 }
   0x5   : > { %s180_s25 = smul.u32 (!%p151_p2), 19, %s3208_s13  ;;  %s3998_s17 = smov (!%p151_p2), 1  }
   0x6   : > { %154 = sbr.rel (%p151_p2) target bundleno = 1162 (0x48a), region = 32 }
   0x7   : > { %p181_p3 = scmp.lt.s32.totalorder (!%p151_p2), %s180_s25, 37 }
   0xb   : > { %v214_v0 = vld [vmem:[%s5961_s1 + $0x70] sm:$0xff]  ;;  %v215_v1 = vld [vmem:[%s5961_s1 + $0x78] sm:$0xff]  ;;  %v212_v9 = vld [vmem:[%s5961_s1 + $0x60] sm:$0xff]  ;;  %s5967_s25 = smov (!%p181_p3, %s180_s25), 37  ;;  %vm1421_vm0 = vcmask 261120   ;;  %vm2322_vm1 = vcmask 400384  }
   0xc   : > { %v246_v2 = vld [vmem:[%s5961_s1 + $0x170] sm:$0xff]  ;;  %v435_v3 = vpack.c.bf16 %v215_v1, %v214_v0  ;;  %v247_v4 = vld [vmem:[%s5961_s1 + $0x178] sm:$0xff]  ;;  %v213_v10 = vld [vmem:[%s5961_s1 + $0x68] sm:$0xff]  ;;  %s3927_s9 = smul.u32 60, %s5967_s25 }
   0xd   : > { %v230_v5 = vld [vmem:[%s5961_s1 + $0xf0] sm:$0xff]  ;;  %v231_v6 = vld [vmem:[%s5961_s1 + $0xf8] sm:$0xff]  ;;  %v4046_v7 = vpack.c.bf16 %v247_v4, %v246_v2  ;;  %v244_v11 = vld [vmem:[%s5961_s1 + $0x160] sm:$0xff]  ;;  %v434_v12 = vpack.c.bf16 %v213_v10, %v212_v9 }
   0xe   : > { %v4048_v8 = vpack.c.bf16 %v231_v6, %v230_v5  ;;  %1452 = vmatpush.bf16.msra.mxu0 %v435_v3  ;;  %3903 = vmatpush.bf16.msra.mxu3 %v435_v3  ;;  %v245_v13 = vld [vmem:[%s5961_s1 + $0x168] sm:$0xff]  ;;  %v228_v14 = vld [vmem:[%s5961_s1 + $0xe0] sm:$0xff]  ;;  %v210_v18 = vld [vmem:[%s5961_s1 + $0x50] sm:$0xff]  ;;  %s4197_s27 = scalar_lea.vmem %s5960_s0, %s3927_s9 }
   0xf   : > { %v229_v15 = vld [vmem:[%s5961_s1 + $0xe8] sm:$0xff]  ;;  %3919 = vmatpush.bf16.msra.mxu2 %v4046_v7  ;;  %v4070_v16 = vpack.c.bf16 %v245_v13, %v244_v11  ;;  %v211_v19 = vld [vmem:[%s5961_s1 + $0x58] sm:$0xff]  ;;  %v242_v20 = vld [vmem:[%s5961_s1 + $0x150] sm:$0xff] }
  0x10   : > { %3911 = vmatpush.bf16.msra.mxu1 %v4048_v8  ;;  %v4072_v17 = vpack.c.bf16 %v229_v15, %v228_v14  ;;  %v243_v21 = vld [vmem:[%s5961_s1 + $0x158] sm:$0xff]  ;;  %v226_v22 = vld [vmem:[%s5961_s1 + $0xd0] sm:$0xff]  ;;  %v433_v24 = vpack.c.bf16 %v211_v19, %v210_v18  ;;  %v208_v27 = vld [vmem:[%s5961_s1 + $0x40] sm:$0xff] }
  0x11   : > { %v227_v23 = vld [vmem:[%s5961_s1 + $0xd8] sm:$0xff]  ;;  %v4096_v25 = vpack.c.bf16 %v243_v21, %v242_v20  ;;  %v209_v28 = vld [vmem:[%s5961_s1 + $0x48] sm:$0xff]  ;;  %v240_v29 = vld [vmem:[%s5961_s1 + $0x140] sm:$0xff] }
  0x12   : > { %1453 = vmatpush.bf16.msra.mxu0 %v434_v12  ;;  %3904 = vmatpush.bf16.msra.mxu3 %v434_v12  ;;  %v4098_v26 = vpack.c.bf16 %v227_v23, %v226_v22  ;;  %v241_v30 = vld [vmem:[%s5961_s1 + $0x148] sm:$0xff]  ;;  %v224_v31 = vld [vmem:[%s5961_s1 + $0xc0] sm:$0xff]  ;;  %v432_v33 = vpack.c.bf16 %v209_v28, %v208_v27  ;;  %v206_v36 = vld [vmem:[%s5961_s1 + $0x30] sm:$0xff] }
  0x13   : > { %3920 = vmatpush.bf16.msra.mxu2 %v4070_v16  ;;  %v225_v32 = vld [vmem:[%s5961_s1 + $0xc8] sm:$0xff]  ;;  %v4120_v34 = vpack.c.bf16 %v241_v30, %v240_v29  ;;  %v207_v37 = vld [vmem:[%s5961_s1 + $0x38] sm:$0xff]  ;;  %v238_v38 = vld [vmem:[%s5961_s1 + $0x130] sm:$0xff] }
  0x14   : > { %3912 = vmatpush.bf16.msra.mxu1 %v4072_v17  ;;  %v4122_v35 = vpack.c.bf16 %v225_v32, %v224_v31  ;;  %v239_v39 = vld [vmem:[%s5961_s1 + $0x138] sm:$0xff]  ;;  %v222_v40 = vld [vmem:[%s5961_s1 + $0xb0] sm:$0xff]  ;;  %v431_v42 = vpack.c.bf16 %v207_v37, %v206_v36  ;;  %v204_v45 = vld [vmem:[%s5961_s1 + $0x20] sm:$0xff] }
  0x15   : > { %v223_v41 = vld [vmem:[%s5961_s1 + $0xb8] sm:$0xff]  ;;  %v4147_v43 = vpack.c.bf16 %v239_v39, %v238_v38  ;;  %v205_v46 = vld [vmem:[%s5961_s1 + $0x28] sm:$0xff]  ;;  %v236_v47 = vld [vmem:[%s5961_s1 + $0x120] sm:$0xff] }
  0x16   : > { %1454 = vmatpush.bf16.msra.mxu0 %v433_v24  ;;  %3905 = vmatpush.bf16.msra.mxu3 %v433_v24  ;;  %v4149_v44 = vpack.c.bf16 %v223_v41, %v222_v40  ;;  %v237_v48 = vld [vmem:[%s5961_s1 + $0x128] sm:$0xff]  ;;  %v220_v49 = vld [vmem:[%s5961_s1 + $0xa0] sm:$0xff]  ;;  %v430_v51 = vpack.c.bf16 %v205_v46, %v204_v45  ;;  %v202_v54 = vld [vmem:[%s5961_s1 + $0x10] sm:$0xff] }
  0x17   : > { %3921 = vmatpush.bf16.msra.mxu2 %v4096_v25  ;;  %v221_v50 = vld [vmem:[%s5961_s1 + $0xa8] sm:$0xff]  ;;  %v4172_v52 = vpack.c.bf16 %v237_v48, %v236_v47  ;;  %v203_v55 = vld [vmem:[%s5961_s1 + $0x18] sm:$0xff]  ;;  %v234_v56 = vld [vmem:[%s5961_s1 + $0x110] sm:$0xff] }
  0x18   : > { %3913 = vmatpush.bf16.msra.mxu1 %v4098_v26  ;;  %v4174_v53 = vpack.c.bf16 %v221_v50, %v220_v49  ;;  %v235_v57 = vld [vmem:[%s5961_s1 + $0x118] sm:$0xff]  ;;  %v218_v58 = vld [vmem:[%s5961_s1 + $0x90] sm:$0xff]  ;;  %v429_v60 = vpack.c.bf16 %v203_v55, %v202_v54  ;;  %v200_v61 = vld [vmem:[%s5961_s1] sm:$0xff] }
  0x19   : > { %v219_v59 = vld [vmem:[%s5961_s1 + $0x98] sm:$0xff]  ;;  %v201_v62 = vld [vmem:[%s5961_s1 + $0x8] sm:$0xff]  ;;  %v4207_v63 = vpack.c.bf16 %v235_v57, %v234_v56  ;;  %v232_v1 = vld [vmem:[%s5961_s1 + $0x100] sm:$0xff] }
  0x1a   : > { %1455 = vmatpush.bf16.msra.mxu0 %v432_v33  ;;  %3906 = vmatpush.bf16.msra.mxu3 %v432_v33  ;;  %v4209_v0 = vpack.c.bf16 %v219_v59, %v218_v58  ;;  %v233_v2 = vld [vmem:[%s5961_s1 + $0x108] sm:$0xff]  ;;  %v216_v3 = vld [vmem:[%s5961_s1 + $0x80] sm:$0xff]  ;;  %v3775_v6 = vld [vmem:[%s4197_s27 + $0x38] sm:$0xf0]  ;;  %v428_v12 = vpack.c.bf16 %v201_v62, %v200_v61 }
  0x1b   : > { %3922 = vmatpush.bf16.msra.mxu2 %v4120_v34  ;;  %v217_v4 = vld [vmem:[%s5961_s1 + $0x88] sm:$0xff]  ;;  %v3218_v5 = vld [vmem:[%s4197_s27] sm:$0xf]  ;;  %v3338_v9 = vld [vmem:[%s4197_s27 + $0xf0] sm:$0xf]  ;;  %v4237_v18 = vpack.c.bf16 %v233_v2, %v232_v1 }
  0x1c   : > { %3914 = vmatpush.bf16.msra.mxu1 %v4122_v35  ;;  %v262_v10 = vld [vmem:[%s5961_s1 + $0x1f0] sm:$0xff]  ;;  %v263_v11 = vld [vmem:[%s5961_s1 + $0x1f8] sm:$0xff]  ;;  %v3805_v13 = vld [vmem:[%s4197_s27 + $0x128] sm:$0xf0]  ;;  %v4239_v19 = vpack.c.bf16 %v217_v4, %v216_v3  ;;  %v3219_v29 = vor.u32 %v3775_v6, %v3218_v5 }
  0x1d   : > { %v3346_v14 = vld [vmem:[%s4197_s27 + $0xf8] sm:$0xf]  ;;  %v3806_v15 = vld [vmem:[%s4197_s27 + $0x130] sm:$0xf0]  ;;  %v3340_v21 = vld [vmem:[%s4197_s27 + $0x12c] sm:$0xf0]  ;;  %v459_v23 = vpack.c.bf16 %v263_v11, %v262_v10  ;;  %v3339_v30 = vor.u32 %v3805_v13, %v3338_v9 }
  0x1e   : > { %1456 = vmatpush.bf16.msra.mxu0 %v431_v42  ;;  %3907 = vmatpush.bf16.msra.mxu3 %v431_v42  ;;  %v3798_v20 = vld [vmem:[%s4197_s27 + $0xf4] sm:$0xf]  ;;  %v311_v24 = vld [vmem:[%s5961_s1 + $0x378] sm:$0xff]  ;;  %v260_v31 = vld [vmem:[%s5961_s1 + $0x1e0] sm:$0xff]  ;;  %v3347_v33 = vor.u32 %v3806_v15, %v3346_v14 }
  0x1f   : > { %3923 = vmatpush.bf16.msra.mxu2 %v4147_v43  ;;  %v310_v22 = vld [vmem:[%s5961_s1 + $0x370] sm:$0xff]  ;;  %v295_v28 = vld [vmem:[%s5961_s1 + $0x2f8] sm:$0xff]  ;;  %v261_v32 = vld [vmem:[%s5961_s1 + $0x1e8] sm:$0xff]  ;;  %v3343_v36 = vor.u32 %v3798_v20, %v3340_v21 }
  0x20   : > { %3915 = vmatpush.bf16.msra.mxu1 %v4149_v44  ;;  %v294_v27 = vld [vmem:[%s5961_s1 + $0x2f0] sm:$0xff]  ;;  %v483_v37 = vpack.c.bf16 %v311_v24, %v310_v22  ;;  %v308_v39 = vld [vmem:[%s5961_s1 + $0x360] sm:$0xff]  ;;  %v458_v40 = vpack.c.bf16 %v261_v32, %v260_v31  ;;  %v309_v41 = vld [vmem:[%s5961_s1 + $0x368] sm:$0xff] }
  0x21   : > { %v475_v38 = vpack.c.bf16 %v295_v28, %v294_v27  ;;  %v292_v42 = vld [vmem:[%s5961_s1 + $0x2e0] sm:$0xff]  ;;  %v293_v45 = vld [vmem:[%s5961_s1 + $0x2e8] sm:$0xff]  ;;  %v259_v46 = vld [vmem:[%s5961_s1 + $0x1d8] sm:$0xff]  ;;  %v482_v47 = vpack.c.bf16 %v309_v41, %v308_v39 }
  0x22   : > { %1457 = vmatpush.bf16.msra.mxu0 %v430_v51  ;;  %3908 = vmatpush.bf16.msra.mxu3 %v430_v51  ;;  %v474_v48 = vpack.c.bf16 %v293_v45, %v292_v42  ;;  %v306_v50 = vld [vmem:[%s5961_s1 + $0x350] sm:$0xff]  ;;  %v307_v51 = vld [vmem:[%s5961_s1 + $0x358] sm:$0xff]  ;;  %v3398_v59 = vld [vmem:[%s4197_s27 + $0x168] sm:$0xf] }
  0x23   : > { %3924 = vmatpush.bf16.msra.mxu2 %v4172_v52  ;;  %v481_v54 = vpack.c.bf16 %v307_v51, %v306_v50  ;;  %v291_v55 = vld [vmem:[%s5961_s1 + $0x2d8] sm:$0xff]  ;;  %v3790_v58 = vld [vmem:[%s4197_s27 + $0xb0] sm:$0xf0]  ;;  %v3406_v61 = vld [vmem:[%s4197_s27 + $0x170] sm:$0xf] }
  0x24   : > { %3916 = vmatpush.bf16.msra.mxu1 %v4174_v53  ;;  %v3278_v57 = vld [vmem:[%s4197_s27 + $0x78] sm:$0xf]  ;;  %v3821_v62 = vld [vmem:[%s4197_s27 + $0x1a8] sm:$0xf0]  ;;  %v3400_v2 = vld [vmem:[%s4197_s27 + $0x1a4] sm:$0xf0] }
  0x25   : > { %v3813_v1 = vld [vmem:[%s4197_s27 + $0x16c] sm:$0xf]  ;;  %v3279_v3 = vor.u32 %v3790_v58, %v3278_v57  ;;  %v3407_v5 = vor.u32 %v3821_v62, %v3406_v61  ;;  %v3458_v15 = vld [vmem:[%s4197_s27 + $0x1e0] sm:$0xf]  ;;  %v3835_v20 = vld [vmem:[%s4197_s27 + $0x218] sm:$0xf0] }
  0x26   : > { %1458 = vmatpush.bf16.msra.mxu0 %v429_v60  ;;  %3909 = vmatpush.bf16.msra.mxu3 %v429_v60  ;;  %v3820_v60 = vld [vmem:[%s4197_s27 + $0x1a0] sm:$0xf0]  ;;  %v3403_v6 = vor.u32 %v3813_v1, %v3400_v2  ;;  %v305_v10 = vld [vmem:[%s5961_s1 + $0x348] sm:$0xff]  ;;  %v3220_v22 = vld [vmem:[%s4197_s27 + $0x3c] sm:$0xf0]  ;;  %v3459_v28 = vor.u32 %v3835_v20, %v3458_v15 }
  0x27   : > { %3925 = vmatpush.bf16.msra.mxu2 %v4207_v63  ;;  %v3399_v4 = vor.u32 %v3820_v60, %v3398_v59  ;;  %v289_v13 = vld [vmem:[%s5961_s1 + $0x2c8] sm:$0xff]  ;;  %v3768_v21 = vld [vmem:[%s4197_s27 + $0x4] sm:$0xf]  ;;  %v3460_v27 = vld [vmem:[%s4197_s27 + $0x21c] sm:$0xf0] }
  0x28   : > { %3917 = vmatpush.bf16.msra.mxu1 %v4209_v0  ;;  %v3828_v24 = vld [vmem:[%s4197_s27 + $0x1e4] sm:$0xf]  ;;  %v3783_v41 = vld [vmem:[%s4197_s27 + $0x7c] sm:$0xf]  ;;  %v3280_v42 = vld [vmem:[%s4197_s27 + $0xb4] sm:$0xf0] }
  0x29   : > { %v3463_v31 = vor.u32 %v3828_v24, %v3460_v27  ;;  %v3526_v45 = vld [vmem:[%s4197_s27 + $0x260] sm:$0xf]  ;;  %v3865_v59 = vld [vmem:[%s4197_s27 + $0x308] sm:$0xf0]  ;;  %v3226_v60 = vld [vmem:[%s4197_s27 + $0x8] sm:$0xf] }
  0x2a   : > { %1459 = vmatpush.bf16.msra.mxu0 %v428_v12  ;;  %3910 = vmatpush.bf16.msra.mxu3 %v428_v12  ;;  %v288_v12 = vld [vmem:[%s5961_s1 + $0x2c0] sm:$0xff]  ;;  %v3586_v62 = vld [vmem:[%s4197_s27 + $0x2d8] sm:$0xf]  ;;  %v3866_v1 = vld [vmem:[%s4197_s27 + $0x310] sm:$0xf0] }
  0x2b   : > { %3926 = vmatpush.bf16.msra.mxu2 %v4237_v18  ;;  %v472_v14 = vpack.c.bf16 %v289_v13, %v288_v12  ;;  %v3776_v61 = vld [vmem:[%s4197_s27 + $0x40] sm:$0xf0]  ;;  %v3858_v2 = vld [vmem:[%s4197_s27 + $0x2d4] sm:$0xf]  ;;  %v277_v12 = vld [vmem:[%s5961_s1 + $0x268] sm:$0xff] }
  0x2c   : > { %3918 = vmatpush.bf16.msra.mxu1 %v4239_v19  ;;  %v298_v13 = vld [vmem:[%s5961_s1 + $0x310] sm:$0xff] }
  0x2d   : > { %1460 = vmatmul.bf16.vlgmr.msra.gmra.mxu0 %v3219_v29  ;;  %1470 = vmatmul.bf16.vlgmr.msra.gmra.mxu3 %v3339_v30  ;;  %v3223_v29 = vor.u32 %v3768_v21, %v3220_v22  ;;  %v274_v21 = vld [vmem:[%s5961_s1 + $0x250] sm:$0xff]  ;;  %v275_v22 = vld [vmem:[%s5961_s1 + $0x258] sm:$0xff] }
  0x2e   : > { %1626 = vmatpush.bf16.msrb.mxu3 %v459_v23  ;;  %1510 = vmatpush.bf16.msrb.mxu0 %v4048_v8  ;;  %v258_v8 = vld [vmem:[%s5961_s1 + $0x1d0] sm:$0xff]  ;;  %v3836_v23 = vld [vmem:[%s4197_s27 + $0x220] sm:$0xf0]  ;;  %v465_v27 = vpack.c.bf16 %v275_v22, %v274_v21  ;;  %v359_v22 = vld [vmem:[%s5961_s1 + $0x4f8] sm:$0xff] }
  0x2f   : > { %1586 = vmatmul.bf16.vlgmr.msra.gmra.mxu2 %v3347_v33  ;;  %1528 = vmatmul.bf16.vlgmr.msra.gmra.mxu1 %v3343_v36  ;;  %v457_v49 = vpack.c.bf16 %v259_v46, %v258_v8  ;;  %v303_v33 = vld [vmem:[%s5961_s1 + $0x338] sm:$0xff]  ;;  %v286_v36 = vld [vmem:[%s5961_s1 + $0x2b0] sm:$0xff] }
  0x30   : > { %1800 = vmatpush.bf16.msrb.mxu2 %v483_v37  ;;  %1742 = vmatpush.bf16.msrb.mxu1 %v475_v38  ;;  %v287_v37 = vld [vmem:[%s5961_s1 + $0x2b8] sm:$0xff]  ;;  %v358_v21 = vld [vmem:[%s5961_s1 + $0x4f0] sm:$0xff] }
  0x31   : > { %v471_v39 = vpack.c.bf16 %v287_v37, %v286_v36  ;;  %v3851_v8 = vld [vmem:[%s4197_s27 + $0x298] sm:$0xf0]  ;;  %v3640_v36 = vld [vmem:[%s4197_s27 + $0x384] sm:$0xf0] }
  0x32   : > { %1511 = vmatpush.bf16.msrb.mxu0 %v4072_v17  ;;  %1627 = vmatpush.bf16.msrb.mxu3 %v458_v40  ;;  %v290_v17 = vld [vmem:[%s5961_s1 + $0x2d0] sm:$0xff]  ;;  %v3843_v46 = vld [vmem:[%s4197_s27 + $0x25c] sm:$0xf]  ;;  %v3527_v50 = vor.u32 %v3851_v8, %v3526_v45  ;;  %v248_v8 = vld [vmem:[%s5961_s1 + $0x180] sm:$0xff] }
  0x33   : > { %v473_v56 = vpack.c.bf16 %v291_v55, %v290_v17  ;;  %v3850_v40 = vld [vmem:[%s4197_s27 + $0x290] sm:$0xf0]  ;;  %v301_v17 = vld [vmem:[%s5961_s1 + $0x328] sm:$0xff]  ;;  %v284_v55 = vld [vmem:[%s5961_s1 + $0x2a0] sm:$0xff] }
  0x34   : > { %1801 = vmatpush.bf16.msrb.mxu2 %v482_v47  ;;  %1743 = vmatpush.bf16.msrb.mxu1 %v474_v48  ;;  %v3520_v47 = vld [vmem:[%s4197_s27 + $0x294] sm:$0xf0] }
  0x35   : > { %v3523_v51 = vor.u32 %v3843_v46, %v3520_v47  ;;  %v249_v46 = vld [vmem:[%s5961_s1 + $0x188] sm:$0xff]  ;;  %v268_v47 = vld [vmem:[%s5961_s1 + $0x220] sm:$0xff] }
  0x36   : > { %1512 = vmatpush.bf16.msrb.mxu0 %v4098_v26  ;;  %1628 = vmatpush.bf16.msrb.mxu3 %v457_v49  ;;  %v256_v26 = vld [vmem:[%s5961_s1 + $0x1c0] sm:$0xff]  ;;  %v3283_v49 = vor.u32 %v3783_v41, %v3280_v42  ;;  %v270_v41 = vld [vmem:[%s5961_s1 + $0x230] sm:$0xff]  ;;  %v271_v42 = vld [vmem:[%s5961_s1 + $0x238] sm:$0xff] }
  0x37   : > { %v463_v45 = vpack.c.bf16 %v271_v42, %v270_v41  ;;  %v3242_v41 = vld [vmem:[%s4197_s27 + $0x18] sm:$0xf]  ;;  %v3778_v42 = vld [vmem:[%s4197_s27 + $0x50] sm:$0xf0] }
  0x38   : > { %1802 = vmatpush.bf16.msrb.mxu2 %v481_v54  ;;  %1744 = vmatpush.bf16.msrb.mxu1 %v473_v56  ;;  %v285_v56 = vld [vmem:[%s5961_s1 + $0x2a8] sm:$0xff] }
  0x39   : > { %v470_v58 = vpack.c.bf16 %v285_v56, %v284_v55  ;;  %v281_v55 = vld [vmem:[%s5961_s1 + $0x288] sm:$0xff] }
  0x3a   : > { %1513 = vmatpush.bf16.msrb.mxu0 %v4122_v35  ;;  %v257_v35 = vld [vmem:[%s5961_s1 + $0x1c8] sm:$0xff] }
  0x3b   : > { %v456_v9 = vpack.c.bf16 %v257_v35, %v256_v26  ;;  %v278_v35 = vld [vmem:[%s5961_s1 + $0x270] sm:$0xff] }
  0x3c   : > { %1745 = vmatpush.bf16.msrb.mxu1 %v472_v14  ;;  %v299_v14 = vld [vmem:[%s5961_s1 + $0x318] sm:$0xff] }
  0x3d   : > { %1465 = vmatmul.bf16.gmra.mxu0 %v3279_v3  ;;  %1475 = vmatmul.bf16.gmra.mxu3 %v3399_v4  ;;  %v3580_v3 = vld [vmem:[%s4197_s27 + $0x30c] sm:$0xf0]  ;;  %v477_v20 = vpack.c.bf16 %v299_v14, %v298_v13  ;;  %v375_v13 = vld [vmem:[%s5961_s1 + $0x578] sm:$0xff] }
  0x3e   : > { %1514 = vmatpush.bf16.msrb.mxu0 %v4149_v44  ;;  %v304_v44 = vld [vmem:[%s5961_s1 + $0x340] sm:$0xff]  ;;  %1629 = vmatpush.bf16.msrb.mxu3 %v456_v9  ;;  %v3583_v26 = vor.u32 %v3858_v2, %v3580_v3  ;;  %v265_v2 = vld [vmem:[%s5961_s1 + $0x208] sm:$0xff]  ;;  %v342_v14 = vld [vmem:[%s5961_s1 + $0x470] sm:$0xff] }
  0x3f   : > { %1591 = vmatmul.bf16.gmra.mxu2 %v3407_v5  ;;  %1533 = vmatmul.bf16.gmra.mxu1 %v3403_v6  ;;  %v480_v11 = vpack.c.bf16 %v305_v10, %v304_v44  ;;  %v3227_v5 = vor.u32 %v3776_v61, %v3226_v60  ;;  %v3587_v6 = vor.u32 %v3866_v1, %v3586_v62  ;;  %v251_v44 = vld [vmem:[%s5961_s1 + $0x198] sm:$0xff]  ;;  %v276_v10 = vld [vmem:[%s5961_s1 + $0x260] sm:$0xff] }
  0x40   : > { %1746 = vmatpush.bf16.msrb.mxu1 %v471_v39  ;;  %v466_v15 = vpack.c.bf16 %v277_v12, %v276_v10  ;;  %v3896_v60 = vld [vmem:[%s4197_s27 + $0x400] sm:$0xf0]  ;;  %v3700_v62 = vld [vmem:[%s4197_s27 + $0x3fc] sm:$0xf0]  ;;  %v686_v10 = vld [vmem:[%s4197_s27 + $0x438] sm:$0xff] }
  0x41   : > { %1803 = vmatpush.bf16.msrb.mxu2 %v480_v11  ;;  %v3888_v61 = vld [vmem:[%s4197_s27 + $0x3c4] sm:$0xf]  ;;  %v374_v12 = vld [vmem:[%s5961_s1 + $0x570] sm:$0xff] }
  0x42   : > { %1515 = vmatpush.bf16.msrb.mxu0 %v4174_v53  ;;  %v3466_v53 = vld [vmem:[%s4197_s27 + $0x1e8] sm:$0xf]  ;;  %v264_v1 = vld [vmem:[%s5961_s1 + $0x200] sm:$0xff] }
  0x43   : > { %v3467_v30 = vor.u32 %v3836_v23, %v3466_v53  ;;  %v282_v53 = vld [vmem:[%s5961_s1 + $0x290] sm:$0xff]  ;;  %v283_v23 = vld [vmem:[%s5961_s1 + $0x298] sm:$0xff] }
  0x44   : > { %1747 = vmatpush.bf16.msrb.mxu1 %v470_v58  ;;  %v469_v24 = vpack.c.bf16 %v283_v23, %v282_v53  ;;  %v3698_v58 = vld [vmem:[%s4197_s27 + $0x3c0] sm:$0xf]  ;;  %v1116_v53 = vunpack.c.l.b16 %v686_v10 }
  0x46   : > { %1516 = vmatpush.bf16.msrb.mxu0 %v4209_v0  ;;  %v254_v0 = vld [vmem:[%s5961_s1 + $0x1b0] sm:$0xff] }
  0x48   : > { %1748 = vmatpush.bf16.msrb.mxu1 %v469_v24  ;;  %v507_v24 = vpack.c.bf16 %v359_v22, %v358_v21  ;;  %v370_v21 = vld [vmem:[%s5961_s1 + $0x550] sm:$0xff]  ;;  %v371_v22 = vld [vmem:[%s5961_s1 + $0x558] sm:$0xff] }
  0x4a   : > { %1517 = vmatpush.bf16.msrb.mxu0 %v4239_v19  ;;  %v255_v19 = vld [vmem:[%s5961_s1 + $0x1b8] sm:$0xff] }
  0x4b   : > { %v455_v32 = vpack.c.bf16 %v255_v19, %v254_v0  ;;  %v3286_v0 = vld [vmem:[%s4197_s27 + $0x80] sm:$0xf]  ;;  %v3791_v19 = vld [vmem:[%s4197_s27 + $0xb8] sm:$0xf0] }
  0x4c   : > { %v3287_v39 = vor.u32 %v3791_v19, %v3286_v0  ;;  %v3294_v0 = vld [vmem:[%s4197_s27 + $0x88] sm:$0xf]  ;;  %v3792_v19 = vld [vmem:[%s4197_s27 + $0xc0] sm:$0xf0] }
  0x4d   : > { %1480 = vmatmul.bf16.gmra.mxu3 %v3459_v28  ;;  %1518 = vmatmul.bf16.vlgmr.msrb.gmra.mxu0 %v3223_v29  ;;  %v272_v28 = vld [vmem:[%s5961_s1 + $0x240] sm:$0xff]  ;;  %v273_v29 = vld [vmem:[%s5961_s1 + $0x248] sm:$0xff] }
  0x4e   : > { %1568 = vmatpush.bf16.msra.mxu0 %v4046_v7  ;;  %v302_v7 = vld [vmem:[%s5961_s1 + $0x330] sm:$0xff]  ;;  %1630 = vmatpush.bf16.msrb.mxu3 %v455_v32  ;;  %v3881_v32 = vld [vmem:[%s4197_s27 + $0x388] sm:$0xf0]  ;;  %v464_v37 = vpack.c.bf16 %v273_v29, %v272_v28  ;;  %v1117_v28 = vunpack.c.h.b16 %v686_v10  ;;  %v1266_v29 = vpack.c.b16 %v1116_v53, %v1116_v53  ;;  %v513_v53 = vpack.c.bf16 %v371_v22, %v370_v21  ;;  %v3815_v21 = vld [vmem:[%s4197_s27 + $0x17c] sm:$0xf] }
  0x4f   : > { %1596 = vmatmul.bf16.gmra.mxu2 %v3467_v30  ;;  %1538 = vmatmul.bf16.gmra.mxu1 %v3463_v31  ;;  %v479_v38 = vpack.c.bf16 %v303_v33, %v302_v7  ;;  %v3638_v30 = vld [vmem:[%s4197_s27 + $0x348] sm:$0xf]  ;;  %v3880_v31 = vld [vmem:[%s4197_s27 + $0x380] sm:$0xf0]  ;;  %v3646_v7 = vld [vmem:[%s4197_s27 + $0x350] sm:$0xf] }
  0x50   : > { %v3873_v33 = vld [vmem:[%s4197_s27 + $0x34c] sm:$0xf]  ;;  %v3416_v22 = vld [vmem:[%s4197_s27 + $0x1b4] sm:$0xf0] }
  0x51   : > { %1804 = vmatpush.bf16.msrb.mxu2 %v479_v38  ;;  %v3639_v38 = vor.u32 %v3880_v31, %v3638_v30  ;;  %v1267_v31 = vpack.c.b16 %v1117_v28, %v1117_v28  ;;  %v338_v28 = vld [vmem:[%s5961_s1 + $0x450] sm:$0xff] }
  0x52   : > { %1569 = vmatpush.bf16.msra.mxu0 %v4070_v16  ;;  %v3518_v16 = vld [vmem:[%s4197_s27 + $0x258] sm:$0xf] }
  0x53   : > { %v3519_v48 = vor.u32 %v3850_v40, %v3518_v16  ;;  %v3647_v16 = vor.u32 %v3881_v32, %v3646_v7  ;;  %v3643_v40 = vor.u32 %v3873_v33, %v3640_v36  ;;  %v3295_v7 = vor.u32 %v3792_v19, %v3294_v0  ;;  %v324_v32 = vld [vmem:[%s5961_s1 + $0x3e0] sm:$0xff]  ;;  %v325_v33 = vld [vmem:[%s5961_s1 + $0x3e8] sm:$0xff]  ;;  %v355_v0 = vld [vmem:[%s5961_s1 + $0x4d8] sm:$0xff] }
  0x54   : > { %v372_v36 = vld [vmem:[%s5961_s1 + $0x560] sm:$0xff] }
  0x56   : > { %1570 = vmatpush.bf16.msra.mxu0 %v4096_v25  ;;  %v252_v25 = vld [vmem:[%s5961_s1 + $0x1a0] sm:$0xff] }
  0x5a   : > { %1571 = vmatpush.bf16.msra.mxu0 %v4120_v34  ;;  %v253_v34 = vld [vmem:[%s5961_s1 + $0x1a8] sm:$0xff] }
  0x5b   : > { %v454_v54 = vpack.c.bf16 %v253_v34, %v252_v25 }
  0x5d   : > { %1485 = vmatmul.bf16.gmra.mxu3 %v3519_v48  ;;  %1523 = vmatmul.bf16.gmra.mxu0 %v3283_v49  ;;  %v452_v48 = vpack.c.bf16 %v249_v46, %v248_v8  ;;  %v269_v49 = vld [vmem:[%s5961_s1 + $0x228] sm:$0xff]  ;;  %v3236_v8 = vld [vmem:[%s4197_s27 + $0x4c] sm:$0xf0] }
  0x5e   : > { %1572 = vmatpush.bf16.msra.mxu0 %v4147_v43  ;;  %v300_v43 = vld [vmem:[%s5961_s1 + $0x320] sm:$0xff]  ;;  %1631 = vmatpush.bf16.msrb.mxu3 %v454_v54  ;;  %v462_v25 = vpack.c.bf16 %v269_v49, %v268_v47  ;;  %v267_v54 = vld [vmem:[%s5961_s1 + $0x218] sm:$0xff] }
  0x5f   : > { %1601 = vmatmul.bf16.gmra.mxu2 %v3527_v50  ;;  %1543 = vmatmul.bf16.gmra.mxu1 %v3523_v51  ;;  %v478_v57 = vpack.c.bf16 %v301_v17, %v300_v43  ;;  %v296_v50 = vld [vmem:[%s5961_s1 + $0x300] sm:$0xff]  ;;  %v297_v51 = vld [vmem:[%s5961_s1 + $0x308] sm:$0xff]  ;;  %v266_v43 = vld [vmem:[%s5961_s1 + $0x210] sm:$0xff] }
  0x60   : > { %v476_v34 = vpack.c.bf16 %v297_v51, %v296_v50  ;;  %v280_v17 = vld [vmem:[%s5961_s1 + $0x280] sm:$0xff] }
  0x61   : > { %1805 = vmatpush.bf16.msrb.mxu2 %v478_v57  ;;  %v468_v56 = vpack.c.bf16 %v281_v55, %v280_v17  ;;  %v461_v57 = vpack.c.bf16 %v267_v54, %v266_v43  ;;  %v340_v51 = vld [vmem:[%s5961_s1 + $0x460] sm:$0xff]  ;;  %v357_v54 = vld [vmem:[%s5961_s1 + $0x4e8] sm:$0xff] }
  0x62   : > { %1573 = vmatpush.bf16.msra.mxu0 %v4172_v52  ;;  %v3578_v52 = vld [vmem:[%s4197_s27 + $0x2d0] sm:$0xf]  ;;  %v3354_v55 = vld [vmem:[%s4197_s27 + $0x100] sm:$0xf] }
  0x63   : > { %v3579_v4 = vor.u32 %v3865_v59, %v3578_v52  ;;  %1749 = vmatpush.bf16.msrb.mxu1 %v468_v56  ;;  %v3895_v52 = vld [vmem:[%s4197_s27 + $0x3f8] sm:$0xf0]  ;;  %v3706_v59 = vld [vmem:[%s4197_s27 + $0x3c8] sm:$0xf] }
  0x64   : > { %v3699_v3 = vor.u32 %v3895_v52, %v3698_v58  ;;  %v3807_v56 = vld [vmem:[%s4197_s27 + $0x138] sm:$0xf0] }
  0x65   : > { %1806 = vmatpush.bf16.msrb.mxu2 %v477_v20  ;;  %v343_v20 = vld [vmem:[%s5961_s1 + $0x478] sm:$0xff] }
  0x66   : > { %1574 = vmatpush.bf16.msra.mxu0 %v4207_v63  ;;  %v279_v63 = vld [vmem:[%s5961_s1 + $0x278] sm:$0xff]  ;;  %v499_v23 = vpack.c.bf16 %v343_v20, %v342_v14 }
  0x67   : > { %v467_v9 = vpack.c.bf16 %v279_v63, %v278_v35  ;;  %v3777_v35 = vld [vmem:[%s4197_s27 + $0x48] sm:$0xf0]  ;;  %1974 = vmatpush.bf16.msra.mxu1 %v507_v24  ;;  %v3822_v24 = vld [vmem:[%s4197_s27 + $0x1b0] sm:$0xf0] }
  0x69   : > { %1807 = vmatpush.bf16.msrb.mxu2 %v476_v34  ;;  %v356_v34 = vld [vmem:[%s5961_s1 + $0x4e0] sm:$0xff] }
  0x6a   : > { %1575 = vmatpush.bf16.msra.mxu0 %v4237_v18  ;;  %v250_v18 = vld [vmem:[%s5961_s1 + $0x190] sm:$0xff]  ;;  %v506_v17 = vpack.c.bf16 %v357_v54, %v356_v34 }
  0x6b   : > { %v453_v11 = vpack.c.bf16 %v251_v44, %v250_v18  ;;  %v327_v18 = vld [vmem:[%s5961_s1 + $0x3f8] sm:$0xff] }
  0x6c   : > { %1975 = vmatpush.bf16.msra.mxu1 %v506_v17  ;;  %v320_v17 = vld [vmem:[%s5961_s1 + $0x3c0] sm:$0xff] }
  0x6d   : > { %1490 = vmatmul.bf16.gmra.mxu3 %v3579_v4  ;;  %1576 = vmatmul.bf16.vlgmr.msra.gmra.mxu0 %v3227_v5  ;;  %v460_v4 = vpack.c.bf16 %v265_v2, %v264_v1  ;;  %v3707_v5 = vor.u32 %v3896_v60, %v3706_v59  ;;  %v322_v1 = vld [vmem:[%s5961_s1 + $0x3d0] sm:$0xff]  ;;  %v323_v2 = vld [vmem:[%s5961_s1 + $0x3d8] sm:$0xff] }
  0x6e   : > { %1684 = vmatpush.bf16.msrb.mxu0 %v467_v9  ;;  %1632 = vmatpush.bf16.msrb.mxu3 %v453_v11  ;;  %v326_v9 = vld [vmem:[%s5961_s1 + $0x3f0] sm:$0xff]  ;;  %v4503_v11 = vld [vmem:[%s4197_s27 + $0x440] sm:$0xff] }
  0x6f   : > { %1606 = vmatmul.bf16.gmra.mxu2 %v3587_v6  ;;  %1548 = vmatmul.bf16.gmra.mxu1 %v3583_v26  ;;  %v3703_v6 = vor.u32 %v3888_v61, %v3700_v62  ;;  %v3234_v26 = vld [vmem:[%s4197_s27 + $0x10] sm:$0xf]  ;;  %v491_v44 = vpack.c.bf16 %v327_v18, %v326_v9 }
  0x70   : > { %v3235_v63 = vor.u32 %v3777_v35, %v3234_v26  ;;  %v3793_v26 = vld [vmem:[%s4197_s27 + $0xc8] sm:$0xf0] }
  0x71   : > { %v3785_v35 = vld [vmem:[%s4197_s27 + $0x8c] sm:$0xf] }
  0x72   : > { %1685 = vmatpush.bf16.msrb.mxu0 %v466_v15  ;;  %1633 = vmatpush.bf16.msrb.mxu3 %v452_v48  ;;  %v515_v15 = vpack.c.bf16 %v375_v13, %v374_v12  ;;  %v3243_v48 = vor.u32 %v3778_v42, %v3242_v41  ;;  %v3808_v41 = vld [vmem:[%s4197_s27 + $0x140] sm:$0xf0] }
  0x73   : > { %v3800_v42 = vld [vmem:[%s4197_s27 + $0x104] sm:$0xf] }
  0x74   : > { %2032 = vmatpush.bf16.msra.mxu2 %v515_v15 }
  0x76   : > { %1686 = vmatpush.bf16.msrb.mxu0 %v465_v27  ;;  %1858 = vmatpush.bf16.msra.mxu3 %v491_v44  ;;  %v1118_v27 = vunpack.c.l.b16 %v4503_v11 }
  0x78   : > { %v1268_v30 = vpack.c.b16 %v1118_v27, %v1118_v27 }
  0x7a   : > { %1687 = vmatpush.bf16.msrb.mxu0 %v464_v37  ;;  %v490_v37 = vpack.c.bf16 %v325_v33, %v324_v32 }
  0x7c   : > { %1859 = vmatpush.bf16.msra.mxu3 %v490_v37 }
  0x7d   : > { %1495 = vmatmul.bf16.gmra.mxu3 %v3639_v38  ;;  %1581 = vmatmul.bf16.gmra.mxu0 %v3287_v39  ;;  %v373_v38 = vld [vmem:[%s5961_s1 + $0x568] sm:$0xff] }
  0x7e   : > { %1688 = vmatpush.bf16.msrb.mxu0 %v463_v45  ;;  %v514_v39 = vpack.c.bf16 %v373_v38, %v372_v36  ;;  %v3770_v45 = vld [vmem:[%s4197_s27 + $0x14] sm:$0xf] }
  0x7f   : > { %1611 = vmatmul.bf16.gmra.mxu2 %v3647_v16  ;;  %1553 = vmatmul.bf16.gmra.mxu1 %v3643_v40  ;;  %v3769_v16 = vld [vmem:[%s4197_s27 + $0xc] sm:$0xf]  ;;  %v3228_v40 = vld [vmem:[%s4197_s27 + $0x44] sm:$0xf0]  ;;  %v3239_v49 = vor.u32 %v3770_v45, %v3236_v8  ;;  %v3356_v45 = vld [vmem:[%s4197_s27 + $0x13c] sm:$0xf0] }
  0x80   : > { %2033 = vmatpush.bf16.msra.mxu2 %v514_v39  ;;  %v3231_v46 = vor.u32 %v3769_v16, %v3228_v40  ;;  %v3799_v39 = vld [vmem:[%s4197_s27 + $0xfc] sm:$0xf]  ;;  %v3348_v16 = vld [vmem:[%s4197_s27 + $0x134] sm:$0xf0]  ;;  %v3362_v40 = vld [vmem:[%s4197_s27 + $0x108] sm:$0xf] }
  0x82   : > { %1689 = vmatpush.bf16.msrb.mxu0 %v462_v25  ;;  %v341_v25 = vld [vmem:[%s5961_s1 + $0x468] sm:$0xff] }
  0x83   : > { %v498_v43 = vpack.c.bf16 %v341_v25, %v340_v51  ;;  %v3363_v51 = vor.u32 %v3808_v41, %v3362_v40  ;;  %v3359_v25 = vor.u32 %v3800_v42, %v3356_v45 }
  0x84   : > { %2034 = vmatpush.bf16.msra.mxu2 %v513_v53 }
  0x86   : > { %1690 = vmatpush.bf16.msrb.mxu0 %v461_v57  ;;  %v3355_v57 = vor.u32 %v3807_v56, %v3354_v55  ;;  %v321_v55 = vld [vmem:[%s5961_s1 + $0x3c8] sm:$0xff] }
  0x87   : > { %v488_v56 = vpack.c.bf16 %v321_v55, %v320_v17 }
  0x8a   : > { %1691 = vmatpush.bf16.msrb.mxu0 %v460_v4  ;;  %v3784_v4 = vld [vmem:[%s4197_s27 + $0x84] sm:$0xf] }
  0x8d   : > { %1500 = vmatmul.bf16.gmra.mxu3 %v3699_v3  ;;  %1692 = vmatmul.bf16.vlgmr.msrb.gmra.mxu0 %v3235_v63  ;;  %v489_v3 = vpack.c.bf16 %v323_v2, %v322_v1  ;;  %v3296_v63 = vld [vmem:[%s4197_s27 + $0xc4] sm:$0xf0] }
  0x8e   : > { %1916 = vmatpush.bf16.msra.mxu0 %v499_v23  ;;  %v3299_v14 = vor.u32 %v3785_v35, %v3296_v63  ;;  %v3414_v23 = vld [vmem:[%s4197_s27 + $0x178] sm:$0xf]  ;;  %v336_v35 = vld [vmem:[%s5961_s1 + $0x440] sm:$0xff]  ;;  %v337_v63 = vld [vmem:[%s5961_s1 + $0x448] sm:$0xff] }
  0x8f   : > { %1616 = vmatmul.bf16.gmra.mxu2 %v3707_v5  ;;  %1558 = vmatmul.bf16.gmra.mxu1 %v3703_v6  ;;  %v3288_v5 = vld [vmem:[%s4197_s27 + $0xbc] sm:$0xf0]  ;;  %v3302_v6 = vld [vmem:[%s4197_s27 + $0x90] sm:$0xf]  ;;  %v3415_v27 = vor.u32 %v3822_v24, %v3414_v23 }
  0x90   : > { %1860 = vmatpush.bf16.msra.mxu3 %v489_v3  ;;  %v3291_v10 = vor.u32 %v3784_v4, %v3288_v5  ;;  %v3303_v13 = vor.u32 %v3793_v26, %v3302_v6 }
  0x92   : > { %1917 = vmatpush.bf16.msra.mxu0 %v498_v43 }
  0x94   : > { %1861 = vmatpush.bf16.msra.mxu3 %v488_v56  ;;  %v3829_v56 = vld [vmem:[%s4197_s27 + $0x1ec] sm:$0xf] }
  0x9d   : > { %1505 = vmatmul.bf16.gmra.mxu3 %v1266_v29  ;;  %1697 = vmatmul.bf16.gmra.mxu0 %v3295_v7  ;;  %v339_v29 = vld [vmem:[%s5961_s1 + $0x458] sm:$0xff] }
  0x9f   : > { %1621 = vmatmul.bf16.gmra.mxu2 %v1268_v30  ;;  %1563 = vmatmul.bf16.gmra.mxu1 %v1267_v31  ;;  %v497_v30 = vpack.c.bf16 %v339_v29, %v338_v28  ;;  %v354_v31 = vld [vmem:[%s5961_s1 + $0x4d0] sm:$0xff] }
  0xa0   : > { %v505_v7 = vpack.c.bf16 %v355_v0, %v354_v31 }
  0xa1   : > { %1918 = vmatpush.bf16.msra.mxu0 %v497_v30  ;;  %v3419_v30 = vor.u32 %v3815_v21, %v3416_v22 }
  0xa2   : > { %1976 = vmatpush.bf16.msra.mxu1 %v505_v7  ;;  %v3534_v7 = vld [vmem:[%s4197_s27 + $0x268] sm:$0xf] }
  0xaa   : > { %v4544_v47 = vpop.f32.mrf.mxu0 }
  0xac   : > { %v1529_v50 = vpop.f32.mrf.mxu1 }
  0xad   : > { %1634 = vmatmul.bf16.vlgmr.msrb.gmra.mxu3 %v3231_v46  ;;  %1702 = vmatmul.bf16.gmra.mxu0 %v3355_v57  ;;  %v3474_v57 = vld [vmem:[%s4197_s27 + $0x1f0] sm:$0xf] }
  0xaf   : > { %1808 = vmatmul.bf16.vlgmr.msrb.gmra.mxu2 %v3243_v48  ;;  %1750 = vmatmul.bf16.vlgmr.msrb.gmra.mxu1 %v3239_v49  ;;  %v3351_v49 = vor.u32 %v3799_v39, %v3348_v16  ;;  %v319_v39 = vld [vmem:[%s5961_s1 + $0x3b8] sm:$0xff] }
  0xb0   : > { %v1471_v58 = vpop.f32.mrf.mxu3 }
  0xb1   : > { %v1530_v52 = vadd.f32 %v1529_v50, %v1471_v58  ;;  %v3837_v58 = vld [vmem:[%s4197_s27 + $0x228] sm:$0xf0] }
  0xb2   : > { %v1587_v59 = vpop.f32.mrf.mxu2  ;;  %v4560_v60 = vpop.f32.mrf.mxu0 }
  0xb3   : > { %v4562_v61 = vadd.f32 %v1587_v59, %v1530_v52  ;;  %v3475_v52 = vor.u32 %v3837_v58, %v3474_v57  ;;  %v369_v59 = vld [vmem:[%s5961_s1 + $0x548] sm:$0xff]  ;;  %v3482_v58 = vld [vmem:[%s4197_s27 + $0x1f8] sm:$0xf] }
  0xb4   : > { %v1531_v62 = vpop.f32.mrf.mxu1  ;;  %v3468_v57 = vld [vmem:[%s4197_s27 + $0x224] sm:$0xf0] }
  0xb8   : > { %v1473_v9 = vpop.f32.mrf.mxu3 }
  0xb9   : > { %v1532_v18 = vadd.f32 %v1531_v62, %v1473_v9  ;;  %v352_v9 = vld [vmem:[%s5961_s1 + $0x4c0] sm:$0xff] }
  0xba   : > { %v1589_v44 = vpop.f32.mrf.mxu2  ;;  %v4576_v12 = vpop.f32.mrf.mxu0 }
  0xbb   : > { %v4578_v15 = vadd.f32 %v1589_v44, %v1532_v18  ;;  %v496_v18 = vpack.c.bf16 %v337_v63, %v336_v35  ;;  %v353_v44 = vld [vmem:[%s5961_s1 + $0x4c8] sm:$0xff] }
  0xbc   : > { %v1534_v20 = vpop.f32.mrf.mxu1 }
  0xbd   : > { %1639 = vmatmul.bf16.gmra.mxu3 %v3291_v10  ;;  %1707 = vmatmul.bf16.gmra.mxu0 %v3415_v27  ;;  %v3814_v10 = vld [vmem:[%s4197_s27 + $0x174] sm:$0xf] }
  0xbe   : > { %1919 = vmatpush.bf16.msra.mxu0 %v496_v18 }
  0xbf   : > { %1813 = vmatmul.bf16.gmra.mxu2 %v3303_v13  ;;  %1755 = vmatmul.bf16.gmra.mxu1 %v3299_v14  ;;  %v3408_v13 = vld [vmem:[%s4197_s27 + $0x1ac] sm:$0xf0]  ;;  %v3422_v14 = vld [vmem:[%s4197_s27 + $0x180] sm:$0xf] }
  0xc0   : > { %v1476_v19 = vpop.f32.mrf.mxu3  ;;  %v3411_v27 = vor.u32 %v3814_v10, %v3408_v13 }
  0xc1   : > { %v1535_v32 = vadd.f32 %v1534_v20, %v1476_v19  ;;  %v3823_v20 = vld [vmem:[%s4197_s27 + $0x1b8] sm:$0xf0] }
  0xc2   : > { %v1592_v33 = vpop.f32.mrf.mxu2  ;;  %v4600_v36 = vpop.f32.mrf.mxu0  ;;  %v3423_v29 = vor.u32 %v3823_v20, %v3422_v14 }
  0xc3   : > { %v4602_v37 = vadd.f32 %v1592_v33, %v1535_v32  ;;  %v3852_v32 = vld [vmem:[%s4197_s27 + $0x2a0] sm:$0xf0] }
  0xc4   : > { %v1536_v38 = vpop.f32.mrf.mxu1  ;;  %v3535_v33 = vor.u32 %v3852_v32, %v3534_v7  ;;  %v3542_v7 = vld [vmem:[%s4197_s27 + $0x270] sm:$0xf]  ;;  %v3853_v32 = vld [vmem:[%s4197_s27 + $0x2a8] sm:$0xf0] }
  0xc8   : > { %v1478_v8 = vpop.f32.mrf.mxu3 }
  0xc9   : > { %v1537_v46 = vadd.f32 %v1536_v38, %v1478_v8  ;;  %v318_v38 = vld [vmem:[%s5961_s1 + $0x3b0] sm:$0xff] }
  0xca   : > { %v1594_v48 = vpop.f32.mrf.mxu2  ;;  %v1519_v50 = vpop.f32.mrf.mxu0  ;;  %v487_v16 = vpack.c.bf16 %v319_v39, %v318_v38  ;;  %v3536_v38 = vld [vmem:[%s4197_s27 + $0x2a4] sm:$0xf0] }
  0xcb   : > { %v4610_v34 = vadd.f32 %v1594_v48, %v1537_v46  ;;  %v4613_v43 = vadd.f32 %v1519_v50, %v4544_v47  ;;  %v368_v47 = vld [vmem:[%s5961_s1 + $0x540] sm:$0xff]  ;;  %v366_v48 = vld [vmem:[%s5961_s1 + $0x530] sm:$0xff] }
  0xcc   : > { %v1539_v54 = vpop.f32.mrf.mxu1  ;;  %v512_v62 = vpack.c.bf16 %v369_v59, %v368_v47  ;;  %1862 = vmatpush.bf16.msra.mxu3 %v487_v16  ;;  %v334_v50 = vld [vmem:[%s5961_s1 + $0x430] sm:$0xff] }
  0xcd   : > { %1644 = vmatmul.bf16.gmra.mxu3 %v3351_v49  ;;  %1712 = vmatmul.bf16.gmra.mxu0 %v3475_v52  ;;  %v367_v49 = vld [vmem:[%s5961_s1 + $0x538] sm:$0xff]  ;;  %v3838_v52 = vld [vmem:[%s4197_s27 + $0x230] sm:$0xf0]  ;;  %v3476_v59 = vld [vmem:[%s4197_s27 + $0x22c] sm:$0xf0] }
  0xce   : > { %2035 = vmatpush.bf16.msra.mxu2 %v512_v62  ;;  %v3830_v47 = vld [vmem:[%s4197_s27 + $0x1f4] sm:$0xf] }
  0xcf   : > { %1818 = vmatmul.bf16.gmra.mxu2 %v3363_v51  ;;  %1760 = vmatmul.bf16.gmra.mxu1 %v3359_v25  ;;  %v511_v51 = vpack.c.bf16 %v367_v49, %v366_v48  ;;  %v350_v25 = vld [vmem:[%s5961_s1 + $0x4b0] sm:$0xff]  ;;  %v3479_v35 = vor.u32 %v3830_v47, %v3476_v59 }
  0xd0   : > { %v1481_v1 = vpop.f32.mrf.mxu3 }
  0xd1   : > { %v1540_v2 = vadd.f32 %v1539_v54, %v1481_v1  ;;  %v351_v54 = vld [vmem:[%s5961_s1 + $0x4b8] sm:$0xff] }
  0xd2   : > { %v1597_v3 = vpop.f32.mrf.mxu2  ;;  %v1521_v4 = vpop.f32.mrf.mxu0  ;;  %v503_v55 = vpack.c.bf16 %v351_v54, %v350_v25  ;;  %2036 = vmatpush.bf16.msra.mxu2 %v511_v51  ;;  %v332_v51 = vld [vmem:[%s5961_s1 + $0x420] sm:$0xff] }
  0xd3   : > { %v4629_v5 = vadd.f32 %v1597_v3, %v1540_v2  ;;  %v4632_v6 = vadd.f32 %v1521_v4, %v4560_v60  ;;  %v504_v60 = vpack.c.bf16 %v353_v44, %v352_v9  ;;  %v3471_v3 = vor.u32 %v3829_v56, %v3468_v57  ;;  %v3594_v44 = vld [vmem:[%s4197_s27 + $0x2e0] sm:$0xf]  ;;  %v3882_v56 = vld [vmem:[%s4197_s27 + $0x390] sm:$0xf0] }
  0xd4   : > { %v1541_v26 = vpop.f32.mrf.mxu1  ;;  %v348_v25 = vld [vmem:[%s5961_s1 + $0x4a0] sm:$0xff] }
  0xd5   : > { %1977 = vmatpush.bf16.msra.mxu1 %v504_v60  ;;  %v3867_v60 = vld [vmem:[%s4197_s27 + $0x318] sm:$0xf0] }
  0xd6   : > { %v3595_v10 = vor.u32 %v3867_v60, %v3594_v44  ;;  %v3602_v44 = vld [vmem:[%s4197_s27 + $0x2e8] sm:$0xf]  ;;  %v3868_v60 = vld [vmem:[%s4197_s27 + $0x320] sm:$0xf0] }
  0xd8   : > { %v1483_v53 = vpop.f32.mrf.mxu3 }
  0xd9   : > { %v1542_v23 = vadd.f32 %v1541_v26, %v1483_v53  ;;  %1978 = vmatpush.bf16.msra.mxu1 %v503_v55  ;;  %v3483_v26 = vor.u32 %v3838_v52, %v3482_v58  ;;  %v3654_v55 = vld [vmem:[%s4197_s27 + $0x358] sm:$0xf] }
  0xda   : > { %v1599_v24 = vpop.f32.mrf.mxu2  ;;  %v1524_v28 = vpop.f32.mrf.mxu0  ;;  %v3655_v57 = vor.u32 %v3882_v56, %v3654_v55  ;;  %v3875_v55 = vld [vmem:[%s4197_s27 + $0x35c] sm:$0xf]  ;;  %v3656_v56 = vld [vmem:[%s4197_s27 + $0x394] sm:$0xf0] }
  0xdb   : > { %v4652_v31 = vadd.f32 %v1599_v24, %v1542_v23  ;;  %v4655_v0 = vadd.f32 %v1524_v28, %v4576_v12  ;;  %v316_v23 = vld [vmem:[%s5961_s1 + $0x3a0] sm:$0xff]  ;;  %v317_v24 = vld [vmem:[%s5961_s1 + $0x3a8] sm:$0xff] }
  0xdc   : > { %v1544_v19 = vpop.f32.mrf.mxu1  ;;  %v486_v28 = vpack.c.bf16 %v317_v24, %v316_v23  ;;  %v363_v23 = vld [vmem:[%s5961_s1 + $0x518] sm:$0xff]  ;;  %v3603_v24 = vor.u32 %v3868_v60, %v3602_v44  ;;  %v312_v60 = vld [vmem:[%s5961_s1 + $0x380] sm:$0xff] }
  0xdd   : > { %1649 = vmatmul.bf16.gmra.mxu3 %v3411_v27  ;;  %1717 = vmatmul.bf16.gmra.mxu0 %v3535_v33  ;;  %v364_v27 = vld [vmem:[%s5961_s1 + $0x520] sm:$0xff]  ;;  %v3845_v33 = vld [vmem:[%s4197_s27 + $0x26c] sm:$0xf] }
  0xde   : > { %1863 = vmatpush.bf16.msra.mxu3 %v486_v28 }
  0xdf   : > { %1823 = vmatmul.bf16.gmra.mxu2 %v3423_v29  ;;  %1765 = vmatmul.bf16.gmra.mxu1 %v3419_v30  ;;  %v365_v29 = vld [vmem:[%s5961_s1 + $0x528] sm:$0xff]  ;;  %v3844_v30 = vld [vmem:[%s4197_s27 + $0x264] sm:$0xf] }
  0xe0   : > { %v1486_v40 = vpop.f32.mrf.mxu3 }
  0xe1   : > { %v1545_v12 = vadd.f32 %v1544_v19, %v1486_v40  ;;  %v3528_v19 = vld [vmem:[%s4197_s27 + $0x29c] sm:$0xf0] }
  0xe2   : > { %v1602_v41 = vpop.f32.mrf.mxu2  ;;  %v1526_v42 = vpop.f32.mrf.mxu0 }
  0xe3   : > { %v4665_v45 = vadd.f32 %v1602_v41, %v1545_v12  ;;  %v4668_v8 = vadd.f32 %v1526_v42, %v4600_v36  ;;  %v335_v36 = vld [vmem:[%s5961_s1 + $0x438] sm:$0xff]  ;;  %v3531_v12 = vor.u32 %v3844_v30, %v3528_v19  ;;  %v3543_v42 = vor.u32 %v3853_v32, %v3542_v7  ;;  %v3714_v30 = vld [vmem:[%s4197_s27 + $0x3d0] sm:$0xf]  ;;  %v3897_v7 = vld [vmem:[%s4197_s27 + $0x408] sm:$0xf0] }
  0xe4   : > { %v1546_v46 = vpop.f32.mrf.mxu1  ;;  %v495_v17 = vpack.c.bf16 %v335_v36, %v334_v50  ;;  %v333_v36 = vld [vmem:[%s5961_s1 + $0x428] sm:$0xff]  ;;  %v3715_v32 = vor.u32 %v3897_v7, %v3714_v30  ;;  %v3722_v7 = vld [vmem:[%s4197_s27 + $0x3d8] sm:$0xf] }
  0xe5   : > { %v494_v54 = vpack.c.bf16 %v333_v36, %v332_v51  ;;  %v3708_v30 = vld [vmem:[%s4197_s27 + $0x404] sm:$0xf0] }
  0xe6   : > { %1920 = vmatpush.bf16.msra.mxu0 %v495_v17  ;;  %v349_v17 = vld [vmem:[%s5961_s1 + $0x4a8] sm:$0xff] }
  0xe8   : > { %v1488_v62 = vpop.f32.mrf.mxu3 }
  0xe9   : > { %v1547_v1 = vadd.f32 %v1546_v46, %v1488_v62  ;;  %v3539_v46 = vor.u32 %v3845_v33, %v3536_v38  ;;  %v330_v33 = vld [vmem:[%s5961_s1 + $0x410] sm:$0xff]  ;;  %v331_v38 = vld [vmem:[%s5961_s1 + $0x418] sm:$0xff] }
  0xea   : > { %v1604_v2 = vpop.f32.mrf.mxu2  ;;  %v1577_v4 = vpop.f32.mrf.mxu0  ;;  %1921 = vmatpush.bf16.msra.mxu0 %v494_v54  ;;  %v3648_v54 = vld [vmem:[%s4197_s27 + $0x38c] sm:$0xf0] }
  0xeb   : > { %v4694_v63 = vadd.f32 %v1604_v2, %v1547_v1  ;;  %v4697_v9 = vadd.f32 %v1577_v4, %v4613_v43  ;;  %v315_v4 = vld [vmem:[%s5961_s1 + $0x398] sm:$0xff] }
  0xec   : > { %v1549_v18 = vpop.f32.mrf.mxu1 }
  0xed   : > { %1654 = vmatmul.bf16.gmra.mxu3 %v3471_v3  ;;  %1722 = vmatmul.bf16.gmra.mxu0 %v3595_v10  ;;  %v314_v3 = vld [vmem:[%s5961_s1 + $0x390] sm:$0xff]  ;;  %v3860_v10 = vld [vmem:[%s4197_s27 + $0x2e4] sm:$0xf] }
  0xef   : > { %1828 = vmatmul.bf16.gmra.mxu2 %v3483_v26  ;;  %1770 = vmatmul.bf16.gmra.mxu1 %v3479_v35  ;;  %v485_v26 = vpack.c.bf16 %v315_v4, %v314_v3  ;;  %v3859_v35 = vld [vmem:[%s4197_s27 + $0x2dc] sm:$0xf]  ;;  %v3659_v3 = vor.u32 %v3875_v55, %v3656_v56  ;;  %v3250_v55 = vld [vmem:[%s4197_s27 + $0x20] sm:$0xf] }
  0xf0   : > { %v1491_v13 = vpop.f32.mrf.mxu3  ;;  %v3779_v56 = vld [vmem:[%s4197_s27 + $0x58] sm:$0xf0] }
  0xf1   : > { %v1550_v14 = vadd.f32 %v1549_v18, %v1491_v13  ;;  %v3588_v18 = vld [vmem:[%s4197_s27 + $0x314] sm:$0xf0]  ;;  %1864 = vmatpush.bf16.msra.mxu3 %v485_v26 }
  0xf2   : > { %v1607_v20 = vpop.f32.mrf.mxu2  ;;  %v1579_v21 = vpop.f32.mrf.mxu0 }
  0xf3   : > { %v4701_v43 = vadd.f32 %v1607_v20, %v1550_v14  ;;  %v4704_v22 = vadd.f32 %v1579_v21, %v4632_v6  ;;  %v510_v6 = vpack.c.bf16 %v365_v29, %v364_v27  ;;  %v3591_v21 = vor.u32 %v3859_v35, %v3588_v18 }
  0xf4   : > { %v1551_v53 = vpop.f32.mrf.mxu1 }
  0xf5   : > { %2037 = vmatpush.bf16.msra.mxu2 %v510_v6 }
  0xf8   : > { %v1493_v39 = vpop.f32.mrf.mxu3 }
  0xf9   : > { %v1552_v16 = vadd.f32 %v1551_v53, %v1493_v39  ;;  %v362_v53 = vld [vmem:[%s5961_s1 + $0x510] sm:$0xff] }
  0xfa   : > { %v1609_v40 = vpop.f32.mrf.mxu2  ;;  %v1582_v41 = vpop.f32.mrf.mxu0  ;;  %v509_v28 = vpack.c.bf16 %v363_v23, %v362_v53  ;;  %v346_v39 = vld [vmem:[%s5961_s1 + $0x490] sm:$0xff] }
  0xfb   : > { %v4724_v48 = vadd.f32 %v1609_v40, %v1552_v16  ;;  %v4727_v49 = vadd.f32 %v1582_v41, %v4655_v0  ;;  %v502_v0 = vpack.c.bf16 %v349_v17, %v348_v25  ;;  %v493_v16 = vpack.c.bf16 %v331_v38, %v330_v33  ;;  %v347_v40 = vld [vmem:[%s5961_s1 + $0x498] sm:$0xff]  ;;  %v3874_v25 = vld [vmem:[%s4197_s27 + $0x354] sm:$0xf]  ;;  %v3662_v17 = vld [vmem:[%s4197_s27 + $0x360] sm:$0xf] }
  0xfc   : > { %v1554_v50 = vpop.f32.mrf.mxu1  ;;  %2038 = vmatpush.bf16.msra.mxu2 %v509_v28  ;;  %v501_v41 = vpack.c.bf16 %v347_v40, %v346_v39  ;;  %v3890_v33 = vld [vmem:[%s4197_s27 + $0x3d4] sm:$0xf]  ;;  %v3716_v38 = vld [vmem:[%s4197_s27 + $0x40c] sm:$0xf0]  ;;  %v328_v39 = vld [vmem:[%s5961_s1 + $0x400] sm:$0xff] }
  0xfd   : > { %1659 = vmatmul.bf16.gmra.mxu3 %v3531_v12  ;;  %1979 = vmatpush.bf16.msra.mxu1 %v502_v0  ;;  %v3883_v0 = vld [vmem:[%s4197_s27 + $0x398] sm:$0xf0]  ;;  %v344_v40 = vld [vmem:[%s5961_s1 + $0x480] sm:$0xff] }
  0xfe   : > { %1727 = vmatmul.bf16.gmra.mxu0 %v3655_v57 }
  0xff   : > { %1833 = vmatmul.bf16.gmra.mxu2 %v3543_v42  ;;  %1775 = vmatmul.bf16.gmra.mxu1 %v3539_v46 }
 0x100   : > { %v1496_v58 = vpop.f32.mrf.mxu3  ;;  %1922 = vmatpush.bf16.msra.mxu0 %v493_v16  ;;  %v329_v16 = vld [vmem:[%s5961_s1 + $0x408] sm:$0xff] }
 0x101   : > { %v1555_v52 = vadd.f32 %v1554_v50, %v1496_v58  ;;  %1980 = vmatpush.bf16.msra.mxu1 %v501_v41  ;;  %v492_v41 = vpack.c.bf16 %v329_v16, %v328_v39 }
 0x102   : > { %v1612_v47 = vpop.f32.mrf.mxu2  ;;  %v1584_v59 = vpop.f32.mrf.mxu0 }
 0x103   : > { %v4743_v62 = vadd.f32 %v1612_v47, %v1555_v52  ;;  %v4746_v1 = vadd.f32 %v1584_v59, %v4668_v8  ;;  %v3596_v8 = vld [vmem:[%s4197_s27 + $0x31c] sm:$0xf0]  ;;  %v3651_v47 = vor.u32 %v3874_v25, %v3648_v54  ;;  %v4795_v59 = vld [vmem:[%s4197_s27 + $0x448] sm:$0xff] }
 0x104   : > { %v1556_v2 = vpop.f32.mrf.mxu1  ;;  %v3599_v27 = vor.u32 %v3860_v10, %v3596_v8  ;;  %v1120_v4 = vunpack.c.l.b16 %v4795_v59  ;;  %v313_v10 = vld [vmem:[%s5961_s1 + $0x388] sm:$0xff]  ;;  %v360_v8 = vld [vmem:[%s5961_s1 + $0x500] sm:$0xff]  ;;  %1923 = vmatpush.bf16.msra.mxu0 %v492_v41 }
 0x106   : > { %v1270_v44 = vpack.c.b16 %v1120_v4, %v1120_v4 }
 0x108   : > { %v1498_v13 = vpop.f32.mrf.mxu3 }
 0x109   : > { %v1557_v14 = vadd.f32 %v1556_v2, %v1498_v13  ;;  %v3663_v2 = vor.u32 %v3883_v0, %v3662_v17  ;;  %v3719_v17 = vor.u32 %v3890_v33, %v3716_v38 }
 0x10a   : > { %v1614_v20 = vpop.f32.mrf.mxu2  ;;  %v4769_v19 = vpop.f32.mrf.mxu0 }
 0x10b   : > { %v4766_v29 = vadd.f32 %v1614_v20, %v1557_v14  ;;  %v484_v14 = vpack.c.bf16 %v313_v10, %v312_v60  ;;  %v361_v20 = vld [vmem:[%s5961_s1 + $0x508] sm:$0xff]  ;;  %v4849_v10 = vld [vmem:[%s4197_s27 + $0x450] sm:$0xff] }
 0x10c   : > { %v1559_v6 = vpop.f32.mrf.mxu1  ;;  %v508_v23 = vpack.c.bf16 %v361_v20, %v360_v8  ;;  %v1119_v8 = vunpack.c.h.b16 %v4503_v11  ;;  %v1122_v20 = vunpack.c.l.b16 %v4849_v10  ;;  %v406_v11 = vld [vmem:[%s5961_s1 + $0x670] sm:$0xff] }
 0x10d   : > { %1664 = vmatmul.bf16.gmra.mxu3 %v3591_v21 }
 0x10e   : > { %1732 = vmatmul.bf16.gmra.mxu0 %v3715_v32  ;;  %1865 = vmatpush.bf16.msra.mxu3 %v484_v14  ;;  %v3898_v32 = vld [vmem:[%s4197_s27 + $0x410] sm:$0xf0]  ;;  %v1269_v33 = vpack.c.b16 %v1119_v8, %v1119_v8  ;;  %v1272_v16 = vpack.c.b16 %v1122_v20, %v1122_v20 }
 0x10f   : > { %1838 = vmatmul.bf16.gmra.mxu2 %v3603_v24  ;;  %1780 = vmatmul.bf16.gmra.mxu1 %v3599_v27  ;;  %v3723_v54 = vor.u32 %v3898_v32, %v3722_v7 }
 0x110   : > { %v1501_v12 = vpop.f32.mrf.mxu3  ;;  %2039 = vmatpush.bf16.msra.mxu2 %v508_v23 }
 0x111   : > { %v1560_v42 = vadd.f32 %v1559_v6, %v1501_v12  ;;  %v3889_v6 = vld [vmem:[%s4197_s27 + $0x3cc] sm:$0xf] }
 0x112   : > { %v1617_v46 = vpop.f32.mrf.mxu2  ;;  %v4786_v36 = vpop.f32.mrf.mxu0 }
 0x113   : > { %v4784_v50 = vadd.f32 %v1617_v46, %v1560_v42  ;;  %v345_v42 = vld [vmem:[%s5961_s1 + $0x488] sm:$0xff] }
 0x114   : > { %v1561_v51 = vpop.f32.mrf.mxu1  ;;  %v500_v25 = vpack.c.bf16 %v345_v42, %v344_v40  ;;  %v3310_v42 = vld [vmem:[%s4197_s27 + $0x98] sm:$0xf] }
 0x116   : > { %1981 = vmatpush.bf16.msra.mxu1 %v500_v25 }
 0x118   : > { %v1503_v57 = vpop.f32.mrf.mxu3 }
 0x119   : > { %v1562_v58 = vadd.f32 %v1561_v51, %v1503_v57  ;;  %v3711_v51 = vor.u32 %v3889_v6, %v3708_v30  ;;  %v422_v6 = vld [vmem:[%s5961_s1 + $0x6f0] sm:$0xff]  ;;  %v423_v30 = vld [vmem:[%s5961_s1 + $0x6f8] sm:$0xff] }
 0x11a   : > { %v1619_v52 = vpop.f32.mrf.mxu2  ;;  %v4800_v18 = vpop.f32.mrf.mxu0  ;;  %v539_v39 = vpack.c.bf16 %v423_v30, %v422_v6  ;;  %v3809_v6 = vld [vmem:[%s4197_s27 + $0x148] sm:$0xf0] }
 0x11b   : > { %v4798_v26 = vadd.f32 %v1619_v52, %v1562_v58  ;;  %v3251_v58 = vor.u32 %v3779_v56, %v3250_v55  ;;  %v390_v52 = vld [vmem:[%s5961_s1 + $0x5f0] sm:$0xff] }
 0x11c   : > { %v1564_v35 = vpop.f32.mrf.mxu1  ;;  %2206 = vmatpush.bf16.msrb.mxu1 %v539_v39 }
 0x11d   : > { %1669 = vmatmul.bf16.gmra.mxu3 %v3651_v47  ;;  %v391_v47 = vld [vmem:[%s5961_s1 + $0x5f8] sm:$0xff] }
 0x11e   : > { %1737 = vmatmul.bf16.gmra.mxu0 %v1270_v44 }
 0x11f   : > { %1843 = vmatmul.bf16.gmra.mxu2 %v3663_v2  ;;  %1785 = vmatmul.bf16.gmra.mxu1 %v3659_v3  ;;  %v523_v3 = vpack.c.bf16 %v391_v47, %v390_v52  ;;  %v3771_v52 = vld [vmem:[%s4197_s27 + $0x1c] sm:$0xf]  ;;  %v3244_v47 = vld [vmem:[%s4197_s27 + $0x54] sm:$0xf0] }
 0x120   : > { %v1506_v13 = vpop.f32.mrf.mxu3 }
 0x121   : > { %v1565_v21 = vadd.f32 %v1564_v35, %v1506_v13  ;;  %2090 = vmatpush.bf16.msrb.mxu3 %v523_v3  ;;  %v3258_v3 = vld [vmem:[%s4197_s27 + $0x28] sm:$0xf] }
 0x122   : > { %v1622_v53 = vpop.f32.mrf.mxu2  ;;  %v4816_v28 = vpop.f32.mrf.mxu0 }
 0x123   : > { %v4814_v24 = vadd.f32 %v1622_v53, %v1565_v21  ;;  %v1121_v21 = vunpack.c.h.b16 %v4795_v59  ;;  %v407_v59 = vld [vmem:[%s5961_s1 + $0x678] sm:$0xff] }
 0x124   : > { %v1566_v27 = vpop.f32.mrf.mxu1  ;;  %v531_v38 = vpack.c.bf16 %v407_v59, %v406_v11  ;;  %v3370_v59 = vld [vmem:[%s4197_s27 + $0x110] sm:$0xf] }
 0x125   : > { %v1271_v40 = vpack.c.b16 %v1121_v21, %v1121_v21 }
 0x126   : > { %2148 = vmatpush.bf16.msrb.mxu0 %v531_v38  ;;  %v420_v38 = vld [vmem:[%s5961_s1 + $0x6e0] sm:$0xff] }
 0x128   : > { %v1508_v12 = vpop.f32.mrf.mxu3 }
 0x12a   : > { %v1624_v46 = vpop.f32.mrf.mxu2  ;;  %v4838_v57 = vpop.f32.mrf.mxu0 }
 0x12b   : > { %v3794_v46 = vld [vmem:[%s4197_s27 + $0xd0] sm:$0xf0] }
 0x12c   : > { %v1751_v0 = vpop.f32.mrf.mxu1  ;;  %v3311_v25 = vor.u32 %v3794_v46, %v3310_v42 }
 0x12d   : > { %1674 = vmatmul.bf16.gmra.mxu3 %v3711_v51 }
 0x12e   : > { %1924 = vmatmul.bf16.vlgmr.msra.gmra.mxu0 %v3251_v58 }
 0x12f   : > { %1848 = vmatmul.bf16.gmra.mxu2 %v3723_v54  ;;  %1790 = vmatmul.bf16.gmra.mxu1 %v3719_v17 }
 0x130   : > { %v1635_v2 = vpop.f32.mrf.mxu3 }
 0x131   : > { %v1636_v4 = vadd.f32 %v1635_v2, %v4697_v9  ;;  %v426_v9 = vld [vmem:[%s5961_s1 + $0x710] sm:$0xff] }
 0x132   : > { %v1809_v35 = vpop.f32.mrf.mxu2  ;;  %v4852_v14 = vpop.f32.mrf.mxu0 }
 0x133   : > { %v1694_v44 = vadd.f32 %v4769_v19, %v1636_v4  ;;  %v427_v19 = vld [vmem:[%s5961_s1 + $0x718] sm:$0xff]  ;;  %v3780_v4 = vld [vmem:[%s4197_s27 + $0x60] sm:$0xf0] }
 0x134   : > { %v1753_v60 = vpop.f32.mrf.mxu1  ;;  %v541_v27 = vpack.c.bf16 %v427_v19, %v426_v9  ;;  %v3247_v9 = vor.u32 %v3771_v52, %v3244_v47  ;;  %v3259_v19 = vor.u32 %v3780_v4, %v3258_v3  ;;  %v386_v47 = vld [vmem:[%s5961_s1 + $0x5d0] sm:$0xff] }
 0x135   : > { %v1752_v13 = vadd.f32 %v1751_v0, %v1694_v44 }
 0x136   : > { %2270 = vmatpush.bf16.msrb.mxu2 %v541_v27 }
 0x137   : > { %v4856_v53 = vadd.f32 %v1809_v35, %v1752_v13  ;;  %v3772_v35 = vld [vmem:[%s4197_s27 + $0x24] sm:$0xf] }
 0x138   : > { %v1637_v23 = vpop.f32.mrf.mxu3 }
 0x139   : > { %v1638_v7 = vadd.f32 %v1637_v23, %v4704_v22 }
 0x13a   : > { %v1811_v32 = vpop.f32.mrf.mxu2  ;;  %v4880_v22 = vpop.f32.mrf.mxu0 }
 0x13b   : > { %v1696_v12 = vadd.f32 %v4786_v36, %v1638_v7 }
 0x13c   : > { %v1756_v41 = vpop.f32.mrf.mxu1 }
 0x13d   : > { %v1754_v51 = vadd.f32 %v1753_v60, %v1696_v12  ;;  %1679 = vmatmul.bf16.gmra.mxu3 %v1269_v33  ;;  %v3252_v60 = vld [vmem:[%s4197_s27 + $0x5c] sm:$0xf0] }
 0x13e   : > { %1929 = vmatmul.bf16.gmra.mxu0 %v3311_v25  ;;  %v3255_v11 = vor.u32 %v3772_v35, %v3252_v60 }
 0x13f   : > { %1853 = vmatmul.bf16.gmra.mxu2 %v1272_v16  ;;  %1795 = vmatmul.bf16.gmra.mxu1 %v1271_v40  ;;  %v4882_v54 = vadd.f32 %v1811_v32, %v1754_v51  ;;  %v3371_v32 = vor.u32 %v3809_v6, %v3370_v59  ;;  %v421_v40 = vld [vmem:[%s5961_s1 + $0x6e8] sm:$0xff]  ;;  %v418_v59 = vld [vmem:[%s5961_s1 + $0x6d0] sm:$0xff] }
 0x140   : > { %v1640_v36 = vpop.f32.mrf.mxu3  ;;  %v538_v42 = vpack.c.bf16 %v421_v40, %v420_v38 }
 0x141   : > { %v1641_v17 = vadd.f32 %v1640_v36, %v4727_v49  ;;  %v388_v49 = vld [vmem:[%s5961_s1 + $0x5e0] sm:$0xff]  ;;  %v3786_v36 = vld [vmem:[%s4197_s27 + $0x94] sm:$0xf] }
 0x142   : > { %v1814_v0 = vpop.f32.mrf.mxu2  ;;  %v4888_v2 = vpop.f32.mrf.mxu0  ;;  %2207 = vmatpush.bf16.msrb.mxu1 %v538_v42  ;;  %v3364_v42 = vld [vmem:[%s4197_s27 + $0x144] sm:$0xf0] }
 0x143   : > { %v1699_v55 = vadd.f32 %v4800_v18, %v1641_v17  ;;  %v389_v18 = vld [vmem:[%s5961_s1 + $0x5e8] sm:$0xff]  ;;  %v3304_v17 = vld [vmem:[%s4197_s27 + $0xcc] sm:$0xf0] }
 0x144   : > { %v1758_v56 = vpop.f32.mrf.mxu1  ;;  %v522_v13 = vpack.c.bf16 %v389_v18, %v388_v49  ;;  %v3307_v49 = vor.u32 %v3786_v36, %v3304_v17  ;;  %v3802_v36 = vld [vmem:[%s4197_s27 + $0x114] sm:$0xf] }
 0x145   : > { %v1757_v58 = vadd.f32 %v1756_v41, %v1699_v55  ;;  %v3318_v55 = vld [vmem:[%s4197_s27 + $0xa0] sm:$0xf] }
 0x146   : > { %2091 = vmatpush.bf16.msrb.mxu3 %v522_v13 }
 0x147   : > { %v4893_v44 = vadd.f32 %v1814_v0, %v1757_v58  ;;  %v3787_v58 = vld [vmem:[%s4197_s27 + $0x9c] sm:$0xf] }
 0x148   : > { %v1642_v8 = vpop.f32.mrf.mxu3 }
 0x149   : > { %v1643_v20 = vadd.f32 %v1642_v8, %v4746_v1  ;;  %v404_v1 = vld [vmem:[%s5961_s1 + $0x660] sm:$0xff] }
 0x14a   : > { %v1816_v21 = vpop.f32.mrf.mxu2  ;;  %v4906_v7 = vpop.f32.mrf.mxu0 }
 0x14b   : > { %v1701_v23 = vadd.f32 %v4816_v28, %v1643_v20  ;;  %v405_v28 = vld [vmem:[%s5961_s1 + $0x668] sm:$0xff] }
 0x14c   : > { %v1761_v27 = vpop.f32.mrf.mxu1  ;;  %v530_v16 = vpack.c.bf16 %v405_v28, %v404_v1 }
 0x14d   : > { %v1759_v30 = vadd.f32 %v1758_v56, %v1701_v23  ;;  %1866 = vmatmul.bf16.vlgmr.msra.gmra.mxu3 %v3247_v9  ;;  %v3795_v56 = vld [vmem:[%s4197_s27 + $0xd8] sm:$0xf0]  ;;  %v3824_v9 = vld [vmem:[%s4197_s27 + $0x1c0] sm:$0xf0] }
 0x14e   : > { %1934 = vmatmul.bf16.gmra.mxu0 %v3371_v32  ;;  %v3319_v18 = vor.u32 %v3795_v56, %v3318_v55  ;;  %v419_v32 = vld [vmem:[%s5961_s1 + $0x6d8] sm:$0xff] }
 0x14f   : > { %2040 = vmatmul.bf16.vlgmr.msra.gmra.mxu2 %v3259_v19  ;;  %1982 = vmatmul.bf16.vlgmr.msra.gmra.mxu1 %v3255_v11  ;;  %v4908_v33 = vadd.f32 %v1816_v21, %v1759_v30  ;;  %v3430_v21 = vld [vmem:[%s4197_s27 + $0x188] sm:$0xf]  ;;  %v537_v38 = vpack.c.bf16 %v419_v32, %v418_v59  ;;  %v3438_v59 = vld [vmem:[%s4197_s27 + $0x190] sm:$0xf]  ;;  %v3817_v32 = vld [vmem:[%s4197_s27 + $0x18c] sm:$0xf] }
 0x150   : > { %v1645_v39 = vpop.f32.mrf.mxu3  ;;  %2149 = vmatpush.bf16.msrb.mxu0 %v530_v16  ;;  %v3431_v23 = vor.u32 %v3824_v9, %v3430_v21 }
 0x151   : > { %v1646_v12 = vadd.f32 %v1645_v39, %v4562_v61  ;;  %v3312_v61 = vld [vmem:[%s4197_s27 + $0xd4] sm:$0xf0]  ;;  %2208 = vmatpush.bf16.msrb.mxu1 %v537_v38  ;;  %v416_v38 = vld [vmem:[%s5961_s1 + $0x6c0] sm:$0xff] }
 0x152   : > { %v1819_v41 = vpop.f32.mrf.mxu2  ;;  %v4926_v0 = vpop.f32.mrf.mxu0  ;;  %v3315_v8 = vor.u32 %v3787_v58, %v3312_v61 }
 0x153   : > { %v1704_v46 = vadd.f32 %v4838_v57, %v1646_v12  ;;  %v387_v57 = vld [vmem:[%s5961_s1 + $0x5d8] sm:$0xff] }
 0x154   : > { %v1763_v51 = vpop.f32.mrf.mxu1  ;;  %v521_v4 = vpack.c.bf16 %v387_v57, %v386_v47 }
 0x155   : > { %v1762_v25 = vadd.f32 %v1761_v27, %v1704_v46  ;;  %v3378_v46 = vld [vmem:[%s4197_s27 + $0x118] sm:$0xf] }
 0x156   : > { %2092 = vmatpush.bf16.msrb.mxu3 %v521_v4  ;;  %v3839_v4 = vld [vmem:[%s4197_s27 + $0x238] sm:$0xf0] }
 0x157   : > { %v4931_v52 = vadd.f32 %v1819_v41, %v1762_v25  ;;  %v3801_v41 = vld [vmem:[%s4197_s27 + $0x10c] sm:$0xf]  ;;  %v3810_v25 = vld [vmem:[%s4197_s27 + $0x150] sm:$0xf0] }
 0x158   : > { %v1647_v3 = vpop.f32.mrf.mxu3  ;;  %v3379_v58 = vor.u32 %v3810_v25, %v3378_v46 }
 0x159   : > { %v1648_v35 = vadd.f32 %v1647_v3, %v4578_v15  ;;  %v402_v15 = vld [vmem:[%s5961_s1 + $0x650] sm:$0xff]  ;;  %v3490_v3 = vld [vmem:[%s4197_s27 + $0x200] sm:$0xf] }
 0x15a   : > { %v1821_v60 = vpop.f32.mrf.mxu2  ;;  %v4944_v11 = vpop.f32.mrf.mxu0 }
 0x15b   : > { %v1706_v13 = vadd.f32 %v4852_v14, %v1648_v35  ;;  %v403_v14 = vld [vmem:[%s5961_s1 + $0x658] sm:$0xff] }
 0x15c   : > { %v1766_v20 = vpop.f32.mrf.mxu1  ;;  %v529_v30 = vpack.c.bf16 %v403_v14, %v402_v15  ;;  %v3816_v15 = vld [vmem:[%s4197_s27 + $0x184] sm:$0xf]  ;;  %v3424_v14 = vld [vmem:[%s4197_s27 + $0x1bc] sm:$0xf0] }
 0x15d   : > { %v1764_v19 = vadd.f32 %v1763_v51, %v1706_v13  ;;  %1871 = vmatmul.bf16.gmra.mxu3 %v3307_v49  ;;  %v3491_v49 = vor.u32 %v3839_v4, %v3490_v3  ;;  %v3427_v46 = vor.u32 %v3816_v15, %v3424_v14  ;;  %v3492_v15 = vld [vmem:[%s4197_s27 + $0x23c] sm:$0xf0] }
 0x15e   : > { %1939 = vmatmul.bf16.gmra.mxu0 %v3431_v23 }
 0x15f   : > { %2045 = vmatmul.bf16.gmra.mxu2 %v3319_v18  ;;  %1987 = vmatmul.bf16.gmra.mxu1 %v3315_v8  ;;  %v4946_v27 = vadd.f32 %v1821_v60, %v1764_v19  ;;  %v385_v18 = vld [vmem:[%s5961_s1 + $0x5c8] sm:$0xff] }
 0x160   : > { %v1650_v6 = vpop.f32.mrf.mxu3  ;;  %2150 = vmatpush.bf16.msrb.mxu0 %v529_v30  ;;  %v3825_v30 = vld [vmem:[%s4197_s27 + $0x1c8] sm:$0xf0] }
 0x161   : > { %v1651_v1 = vadd.f32 %v1650_v6, %v4602_v37  ;;  %v3372_v37 = vld [vmem:[%s4197_s27 + $0x14c] sm:$0xf0] }
 0x162   : > { %v1824_v28 = vpop.f32.mrf.mxu2  ;;  %v4962_v12 = vpop.f32.mrf.mxu0  ;;  %v3375_v61 = vor.u32 %v3802_v36, %v3372_v37  ;;  %v3439_v36 = vor.u32 %v3825_v30, %v3438_v59  ;;  %v398_v59 = vld [vmem:[%s5961_s1 + $0x630] sm:$0xff] }
 0x163   : > { %v1709_v39 = vadd.f32 %v4880_v22, %v1651_v1  ;;  %v3367_v22 = vor.u32 %v3801_v41, %v3364_v42  ;;  %v3432_v1 = vld [vmem:[%s4197_s27 + $0x1c4] sm:$0xf0] }
 0x164   : > { %v1768_v16 = vpop.f32.mrf.mxu1  ;;  %v3435_v37 = vor.u32 %v3817_v32, %v3432_v1  ;;  %v399_v1 = vld [vmem:[%s5961_s1 + $0x638] sm:$0xff] }
 0x165   : > { %v1767_v40 = vadd.f32 %v1766_v20, %v1709_v39 }
 0x167   : > { %v4967_v51 = vadd.f32 %v1824_v28, %v1767_v40  ;;  %v417_v40 = vld [vmem:[%s5961_s1 + $0x6c8] sm:$0xff] }
 0x168   : > { %v1652_v17 = vpop.f32.mrf.mxu3  ;;  %v536_v25 = vpack.c.bf16 %v417_v40, %v416_v38  ;;  %v527_v40 = vpack.c.bf16 %v399_v1, %v398_v59  ;;  %v3670_v1 = vld [vmem:[%s4197_s27 + $0x368] sm:$0xf] }
 0x169   : > { %v1653_v55 = vadd.f32 %v1652_v17, %v4610_v34 }
 0x16a   : > { %v1826_v56 = vpop.f32.mrf.mxu2  ;;  %v4976_v60 = vpop.f32.mrf.mxu0  ;;  %2209 = vmatpush.bf16.msrb.mxu1 %v536_v25 }
 0x16b   : > { %v1711_v47 = vadd.f32 %v4888_v2, %v1653_v55  ;;  %v384_v2 = vld [vmem:[%s5961_s1 + $0x5c0] sm:$0xff] }
 0x16c   : > { %v1771_v57 = vpop.f32.mrf.mxu1  ;;  %v520_v13 = vpack.c.bf16 %v385_v18, %v384_v2 }
 0x16d   : > { %v1769_v35 = vadd.f32 %v1768_v16, %v1711_v47  ;;  %1876 = vmatmul.bf16.gmra.mxu3 %v3367_v22  ;;  %v3854_v22 = vld [vmem:[%s4197_s27 + $0x2b0] sm:$0xf0] }
 0x16e   : > { %1944 = vmatmul.bf16.gmra.mxu0 %v3491_v49  ;;  %2093 = vmatpush.bf16.msrb.mxu3 %v520_v13  ;;  %v3831_v13 = vld [vmem:[%s4197_s27 + $0x1fc] sm:$0xf] }
 0x16f   : > { %2050 = vmatmul.bf16.gmra.mxu2 %v3379_v58  ;;  %1992 = vmatmul.bf16.gmra.mxu1 %v3375_v61  ;;  %v4978_v34 = vadd.f32 %v1826_v56, %v1769_v35  ;;  %v3550_v56 = vld [vmem:[%s4197_s27 + $0x278] sm:$0xf] }
 0x170   : > { %v1655_v8 = vpop.f32.mrf.mxu3  ;;  %v3551_v47 = vor.u32 %v3854_v22, %v3550_v56 }
 0x171   : > { %v1656_v20 = vadd.f32 %v1655_v8, %v4629_v5  ;;  %v400_v5 = vld [vmem:[%s5961_s1 + $0x640] sm:$0xff] }
 0x172   : > { %v1829_v21 = vpop.f32.mrf.mxu2  ;;  %v4991_v6 = vpop.f32.mrf.mxu0 }
 0x173   : > { %v1714_v9 = vadd.f32 %v4906_v7, %v1656_v20  ;;  %v401_v7 = vld [vmem:[%s5961_s1 + $0x648] sm:$0xff]  ;;  %v3484_v20 = vld [vmem:[%s4197_s27 + $0x234] sm:$0xf0] }
 0x174   : > { %v1773_v19 = vpop.f32.mrf.mxu1  ;;  %v528_v16 = vpack.c.bf16 %v401_v7, %v400_v5  ;;  %v414_v5 = vld [vmem:[%s5961_s1 + $0x6b0] sm:$0xff]  ;;  %v415_v7 = vld [vmem:[%s5961_s1 + $0x6b8] sm:$0xff] }
 0x175   : > { %v1772_v23 = vadd.f32 %v1771_v57, %v1714_v9  ;;  %v383_v57 = vld [vmem:[%s5961_s1 + $0x5b8] sm:$0xff] }
 0x176   : > { %2151 = vmatpush.bf16.msrb.mxu0 %v528_v16  ;;  %v3487_v16 = vor.u32 %v3831_v13, %v3484_v20  ;;  %v3552_v20 = vld [vmem:[%s4197_s27 + $0x2b4] sm:$0xf0] }
 0x177   : > { %v4996_v28 = vadd.f32 %v1829_v21, %v1772_v23  ;;  %v3498_v21 = vld [vmem:[%s4197_s27 + $0x208] sm:$0xf]  ;;  %v3832_v23 = vld [vmem:[%s4197_s27 + $0x204] sm:$0xf] }
 0x178   : > { %v1657_v39 = vpop.f32.mrf.mxu3 }
 0x179   : > { %v1658_v41 = vadd.f32 %v1657_v39, %v4652_v31 }
 0x17a   : > { %v1831_v42 = vpop.f32.mrf.mxu2  ;;  %2152 = vmatpush.bf16.msrb.mxu0 %v527_v40  ;;  %v412_v40 = vld [vmem:[%s5961_s1 + $0x6a0] sm:$0xff] }
 0x17b   : > { %v1716_v17 = vadd.f32 %v4926_v0, %v1658_v41  ;;  %v5014_v61 = vpop.f32.mrf.mxu0  ;;  %v382_v0 = vld [vmem:[%s5961_s1 + $0x5b0] sm:$0xff]  ;;  %v535_v41 = vpack.c.bf16 %v415_v7, %v414_v5  ;;  %v3884_v5 = vld [vmem:[%s4197_s27 + $0x3a0] sm:$0xf0] }
 0x17c   : > { %v1776_v55 = vpop.f32.mrf.mxu1  ;;  %v519_v4 = vpack.c.bf16 %v383_v57, %v382_v0 }
 0x17d   : > { %v1774_v58 = vadd.f32 %v1773_v19, %v1716_v17  ;;  %1881 = vmatmul.bf16.gmra.mxu3 %v3427_v46  ;;  %v3840_v19 = vld [vmem:[%s4197_s27 + $0x240] sm:$0xf0]  ;;  %v3495_v46 = vor.u32 %v3832_v23, %v3492_v15  ;;  %2210 = vmatpush.bf16.msrb.mxu1 %v535_v41  ;;  %v3869_v17 = vld [vmem:[%s4197_s27 + $0x328] sm:$0xf0] }
 0x17e   : > { %1949 = vmatmul.bf16.gmra.mxu0 %v3551_v47  ;;  %2094 = vmatpush.bf16.msrb.mxu3 %v519_v4  ;;  %v3846_v4 = vld [vmem:[%s4197_s27 + $0x274] sm:$0xf] }
 0x17f   : > { %2055 = vmatmul.bf16.gmra.mxu2 %v3439_v36  ;;  %1997 = vmatmul.bf16.gmra.mxu1 %v3435_v37  ;;  %v5016_v31 = vadd.f32 %v1831_v42, %v1774_v58  ;;  %v3499_v42 = vor.u32 %v3840_v19, %v3498_v21  ;;  %v3610_v37 = vld [vmem:[%s4197_s27 + $0x2f0] sm:$0xf] }
 0x180   : > { %v1660_v3 = vpop.f32.mrf.mxu3  ;;  %v3611_v56 = vor.u32 %v3869_v17, %v3610_v37 }
 0x181   : > { %v1661_v35 = vadd.f32 %v1660_v3, %v4665_v45  ;;  %v424_v45 = vld [vmem:[%s5961_s1 + $0x700] sm:$0xff] }
 0x182   : > { %v1834_v49 = vpop.f32.mrf.mxu2 }
 0x183   : > { %v1719_v2 = vadd.f32 %v4944_v11, %v1661_v35  ;;  %v5029_v9 = vpop.f32.mrf.mxu0  ;;  %v425_v11 = vld [vmem:[%s5961_s1 + $0x708] sm:$0xff]  ;;  %v3544_v35 = vld [vmem:[%s4197_s27 + $0x2ac] sm:$0xf0] }
 0x184   : > { %v1778_v18 = vpop.f32.mrf.mxu1  ;;  %v540_v32 = vpack.c.bf16 %v425_v11, %v424_v45  ;;  %v3547_v45 = vor.u32 %v3846_v4, %v3544_v35  ;;  %v3612_v35 = vld [vmem:[%s4197_s27 + $0x32c] sm:$0xf0] }
 0x185   : > { %v1777_v8 = vadd.f32 %v1776_v55, %v1719_v2  ;;  %v3558_v2 = vld [vmem:[%s4197_s27 + $0x280] sm:$0xf] }
 0x186   : > { %2271 = vmatpush.bf16.msrb.mxu2 %v540_v32 }
 0x187   : > { %v5034_v14 = vadd.f32 %v1834_v49, %v1777_v8  ;;  %v3847_v8 = vld [vmem:[%s4197_s27 + $0x27c] sm:$0xf] }
 0x188   : > { %v1662_v30 = vpop.f32.mrf.mxu3  ;;  %v3555_v59 = vor.u32 %v3847_v8, %v3552_v20 }
 0x189   : > { %v1663_v38 = vadd.f32 %v1662_v30, %v4694_v63 }
 0x18a   : > { %v1836_v39 = vpop.f32.mrf.mxu2 }
 0x18b   : > { %v1721_v25 = vadd.f32 %v4962_v12, %v1663_v38  ;;  %v5058_v63 = vpop.f32.mrf.mxu0 }
 0x18c   : > { %v1781_v36 = vpop.f32.mrf.mxu1 }
 0x18d   : > { %v1779_v55 = vadd.f32 %v1778_v18, %v1721_v25  ;;  %1886 = vmatmul.bf16.gmra.mxu3 %v3487_v16  ;;  %v3855_v18 = vld [vmem:[%s4197_s27 + $0x2b8] sm:$0xf0] }
 0x18e   : > { %1954 = vmatmul.bf16.gmra.mxu0 %v3611_v56  ;;  %v3559_v11 = vor.u32 %v3855_v18, %v3558_v2 }
 0x18f   : > { %2060 = vmatmul.bf16.gmra.mxu2 %v3499_v42  ;;  %2002 = vmatmul.bf16.gmra.mxu1 %v3495_v46  ;;  %v5060_v22 = vadd.f32 %v1836_v39, %v1779_v55  ;;  %v3671_v39 = vor.u32 %v3884_v5, %v3670_v1  ;;  %v413_v46 = vld [vmem:[%s5961_s1 + $0x6a8] sm:$0xff] }
 0x190   : > { %v1665_v12 = vpop.f32.mrf.mxu3  ;;  %v534_v37 = vpack.c.bf16 %v413_v46, %v412_v40 }
 0x191   : > { %v1666_v58 = vadd.f32 %v1665_v12, %v4701_v43  ;;  %v380_v43 = vld [vmem:[%s5961_s1 + $0x5a0] sm:$0xff]  ;;  %v3861_v12 = vld [vmem:[%s4197_s27 + $0x2ec] sm:$0xf] }
 0x192   : > { %v1839_v47 = vpop.f32.mrf.mxu2  ;;  %2211 = vmatpush.bf16.msrb.mxu1 %v534_v37  ;;  %v3664_v37 = vld [vmem:[%s4197_s27 + $0x39c] sm:$0xf0] }
 0x193   : > { %v1724_v0 = vadd.f32 %v4976_v60, %v1666_v58  ;;  %v5066_v49 = vpop.f32.mrf.mxu0  ;;  %v381_v60 = vld [vmem:[%s5961_s1 + $0x5a8] sm:$0xff] }
 0x194   : > { %v1783_v57 = vpop.f32.mrf.mxu1  ;;  %v518_v19 = vpack.c.bf16 %v381_v60, %v380_v43  ;;  %v3604_v58 = vld [vmem:[%s4197_s27 + $0x324] sm:$0xf0] }
 0x195   : > { %v1782_v3 = vadd.f32 %v1781_v36, %v1724_v0  ;;  %v3618_v0 = vld [vmem:[%s4197_s27 + $0x2f8] sm:$0xf]  ;;  %v3607_v43 = vor.u32 %v3861_v12, %v3604_v58  ;;  %v3877_v12 = vld [vmem:[%s4197_s27 + $0x36c] sm:$0xf]  ;;  %v3672_v58 = vld [vmem:[%s4197_s27 + $0x3a4] sm:$0xf0] }
 0x196   : > { %2095 = vmatpush.bf16.msrb.mxu3 %v518_v19 }
 0x197   : > { %v5071_v13 = vadd.f32 %v1839_v47, %v1782_v3  ;;  %v3862_v3 = vld [vmem:[%s4197_s27 + $0x2f4] sm:$0xf] }
 0x198   : > { %v1667_v21 = vpop.f32.mrf.mxu3 }
 0x199   : > { %v1668_v23 = vadd.f32 %v1667_v21, %v4724_v48  ;;  %v396_v48 = vld [vmem:[%s5961_s1 + $0x620] sm:$0xff]  ;;  %v3615_v21 = vor.u32 %v3862_v3, %v3612_v35  ;;  %v5150_v3 = vld [vmem:[%s4197_s27 + $0x458] sm:$0xff]  ;;  %v3675_v35 = vor.u32 %v3877_v12, %v3672_v58  ;;  %v3266_v58 = vld [vmem:[%s4197_s27 + $0x30] sm:$0xf] }
 0x19a   : > { %v1841_v15 = vpop.f32.mrf.mxu2 }
 0x19b   : > { %v1726_v30 = vadd.f32 %v4991_v6, %v1668_v23  ;;  %v5084_v38 = vpop.f32.mrf.mxu0  ;;  %v397_v6 = vld [vmem:[%s5961_s1 + $0x628] sm:$0xff] }
 0x19c   : > { %v1786_v32 = vpop.f32.mrf.mxu1  ;;  %v526_v42 = vpack.c.bf16 %v397_v6, %v396_v48 }
 0x19d   : > { %v1784_v7 = vadd.f32 %v1783_v57, %v1726_v30  ;;  %1891 = vmatmul.bf16.gmra.mxu3 %v3547_v45  ;;  %v3870_v57 = vld [vmem:[%s4197_s27 + $0x330] sm:$0xf0]  ;;  %v3899_v45 = vld [vmem:[%s4197_s27 + $0x418] sm:$0xf0] }
 0x19e   : > { %1959 = vmatmul.bf16.gmra.mxu0 %v3671_v39  ;;  %v3619_v60 = vor.u32 %v3870_v57, %v3618_v0 }
 0x19f   : > { %2065 = vmatmul.bf16.gmra.mxu2 %v3559_v11  ;;  %2007 = vmatmul.bf16.gmra.mxu1 %v3555_v59  ;;  %v5086_v16 = vadd.f32 %v1841_v15, %v1784_v7  ;;  %v3730_v15 = vld [vmem:[%s4197_s27 + $0x3e0] sm:$0xf]  ;;  %v411_v7 = vld [vmem:[%s5961_s1 + $0x698] sm:$0xff] }
 0x1a0   : > { %v1670_v41 = vpop.f32.mrf.mxu3  ;;  %2153 = vmatpush.bf16.msrb.mxu0 %v526_v42  ;;  %v3731_v30 = vor.u32 %v3899_v45, %v3730_v15 }
 0x1a1   : > { %v1671_v25 = vadd.f32 %v1670_v41, %v4743_v62  ;;  %v378_v62 = vld [vmem:[%s5961_s1 + $0x590] sm:$0xff] }
 0x1a2   : > { %v1844_v36 = vpop.f32.mrf.mxu2 }
 0x1a3   : > { %v1729_v17 = vadd.f32 %v5014_v61, %v1671_v25  ;;  %v1740_v47 = vpop.f32.mrf.mxu0  ;;  %v379_v61 = vld [vmem:[%s5961_s1 + $0x598] sm:$0xff] }
 0x1a4   : > { %v1788_v55 = vpop.f32.mrf.mxu1  ;;  %v517_v18 = vpack.c.bf16 %v379_v61, %v378_v62  ;;  %v1124_v62 = vunpack.c.l.b16 %v5150_v3 }
 0x1a5   : > { %v1787_v56 = vadd.f32 %v1786_v32, %v1729_v17  ;;  %v395_v32 = vld [vmem:[%s5961_s1 + $0x618] sm:$0xff]  ;;  %v3678_v17 = vld [vmem:[%s4197_s27 + $0x370] sm:$0xf] }
 0x1a6   : > { %2096 = vmatpush.bf16.msrb.mxu3 %v517_v18  ;;  %v1274_v18 = vpack.c.b16 %v1124_v62, %v1124_v62 }
 0x1a7   : > { %v5107_v4 = vadd.f32 %v1844_v36, %v1787_v56  ;;  %v3876_v36 = vld [vmem:[%s4197_s27 + $0x364] sm:$0xf]  ;;  %v3885_v56 = vld [vmem:[%s4197_s27 + $0x3a8] sm:$0xf0] }
 0x1a8   : > { %v1672_v2 = vpop.f32.mrf.mxu3  ;;  %v3667_v57 = vor.u32 %v3876_v36, %v3664_v37 }
 0x1a9   : > { %v1673_v8 = vadd.f32 %v1672_v2, %v4766_v29  ;;  %v394_v29 = vld [vmem:[%s5961_s1 + $0x610] sm:$0xff] }
 0x1aa   : > { %v1846_v20 = vpop.f32.mrf.mxu2  ;;  %v525_v5 = vpack.c.bf16 %v395_v32, %v394_v29  ;;  %v3724_v29 = vld [vmem:[%s4197_s27 + $0x414] sm:$0xf0]  ;;  %v3738_v32 = vld [vmem:[%s4197_s27 + $0x3e8] sm:$0xf] }
 0x1ab   : > { %v1731_v19 = vadd.f32 %v5029_v9, %v1673_v8  ;;  %v5120_v59 = vpop.f32.mrf.mxu0  ;;  %v410_v9 = vld [vmem:[%s5961_s1 + $0x690] sm:$0xff] }
 0x1ac   : > { %v1791_v23 = vpop.f32.mrf.mxu1  ;;  %v533_v48 = vpack.c.bf16 %v411_v7, %v410_v9  ;;  %2154 = vmatpush.bf16.msrb.mxu0 %v525_v5  ;;  %v3900_v5 = vld [vmem:[%s4197_s27 + $0x420] sm:$0xf0] }
 0x1ad   : > { %v1789_v11 = vadd.f32 %v1788_v55, %v1731_v19  ;;  %1896 = vmatmul.bf16.gmra.mxu3 %v3607_v43  ;;  %v376_v43 = vld [vmem:[%s5961_s1 + $0x580] sm:$0xff] }
 0x1ae   : > { %1964 = vmatmul.bf16.gmra.mxu0 %v3731_v30  ;;  %2212 = vmatpush.bf16.msrb.mxu1 %v533_v48  ;;  %v3891_v30 = vld [vmem:[%s4197_s27 + $0x3dc] sm:$0xf]  ;;  %v3892_v7 = vld [vmem:[%s4197_s27 + $0x3e4] sm:$0xf] }
 0x1af   : > { %2070 = vmatmul.bf16.gmra.mxu2 %v3619_v60  ;;  %2012 = vmatmul.bf16.gmra.mxu1 %v3615_v21  ;;  %v5131_v1 = vadd.f32 %v1846_v20, %v1789_v11  ;;  %v3727_v36 = vor.u32 %v3891_v30, %v3724_v29  ;;  %v3326_v29 = vld [vmem:[%s4197_s27 + $0xa8] sm:$0xf] }
 0x1b0   : > { %v1675_v39 = vpop.f32.mrf.mxu3 }
 0x1b1   : > { %v1676_v6 = vadd.f32 %v1675_v39, %v4784_v50  ;;  %v3732_v39 = vld [vmem:[%s4197_s27 + $0x41c] sm:$0xf0] }
 0x1b2   : > { %v1849_v40 = vpop.f32.mrf.mxu2 }
 0x1b3   : > { %v1734_v41 = vadd.f32 %v5058_v63, %v1676_v6  ;;  %v5138_v25 = vpop.f32.mrf.mxu0  ;;  %v3679_v63 = vor.u32 %v3885_v56, %v3678_v17  ;;  %v408_v6 = vld [vmem:[%s5961_s1 + $0x680] sm:$0xff]  ;;  %v3739_v17 = vor.u32 %v3900_v5, %v3738_v32  ;;  %v3735_v56 = vor.u32 %v3892_v7, %v3732_v39 }
 0x1b4   : > { %v1793_v42 = vpop.f32.mrf.mxu1 }
 0x1b5   : > { %v1792_v46 = vadd.f32 %v1791_v23, %v1734_v41 }
 0x1b7   : > { %v5143_v55 = vadd.f32 %v1849_v40, %v1792_v46 }
 0x1b8   : > { %v1677_v47 = vpop.f32.mrf.mxu3 }
 0x1b9   : > { %v1678_v50 = vadd.f32 %v1677_v47, %v4798_v26  ;;  %v3781_v47 = vld [vmem:[%s4197_s27 + $0x68] sm:$0xf0] }
 0x1ba   : > { %v1851_v0 = vpop.f32.mrf.mxu2 }
 0x1bb   : > { %v1736_v61 = vadd.f32 %v5066_v49, %v1678_v50  ;;  %v5154_v20 = vpop.f32.mrf.mxu0  ;;  %v377_v49 = vld [vmem:[%s5961_s1 + $0x588] sm:$0xff] }
 0x1bc   : > { %v1796_v2 = vpop.f32.mrf.mxu1  ;;  %v516_v21 = vpack.c.bf16 %v377_v49, %v376_v43 }
 0x1bd   : > { %v1794_v8 = vadd.f32 %v1793_v42, %v1736_v61  ;;  %1901 = vmatmul.bf16.gmra.mxu3 %v3667_v57  ;;  %v409_v42 = vld [vmem:[%s5961_s1 + $0x688] sm:$0xff] }
 0x1be   : > { %1969 = vmatmul.bf16.gmra.mxu0 %v1274_v18  ;;  %2097 = vmatpush.bf16.msrb.mxu3 %v516_v21  ;;  %v532_v37 = vpack.c.bf16 %v409_v42, %v408_v6  ;;  %v3260_v42 = vld [vmem:[%s4197_s27 + $0x64] sm:$0xf0] }
 0x1bf   : > { %2075 = vmatmul.bf16.gmra.mxu2 %v3679_v63  ;;  %2017 = vmatmul.bf16.gmra.mxu1 %v3675_v35  ;;  %v5156_v26 = vadd.f32 %v1851_v0, %v1794_v8  ;;  %v3267_v0 = vor.u32 %v3781_v47, %v3266_v58  ;;  %v1123_v8 = vunpack.c.h.b16 %v4849_v10  ;;  %v3796_v10 = vld [vmem:[%s4197_s27 + $0xe0] sm:$0xf0] }
 0x1c0   : > { %v1680_v60 = vpop.f32.mrf.mxu3  ;;  %2213 = vmatpush.bf16.msrb.mxu1 %v532_v37  ;;  %v3327_v5 = vor.u32 %v3796_v10, %v3326_v29  ;;  %v3782_v37 = vld [vmem:[%s4197_s27 + $0x70] sm:$0xf0]  ;;  %v3797_v29 = vld [vmem:[%s4197_s27 + $0xe8] sm:$0xf0] }
 0x1c1   : > { %v1681_v19 = vadd.f32 %v1680_v60, %v4814_v24  ;;  %v392_v24 = vld [vmem:[%s5961_s1 + $0x600] sm:$0xff]  ;;  %v1125_v60 = vunpack.c.h.b16 %v5150_v3  ;;  %v3789_v10 = vld [vmem:[%s4197_s27 + $0xac] sm:$0xf] }
 0x1c2   : > { %v1854_v23 = vpop.f32.mrf.mxu2 }
 0x1c3   : > { %v1739_v15 = vadd.f32 %v5084_v38, %v1681_v19  ;;  %v5169_v9 = vpop.f32.mrf.mxu0  ;;  %v393_v38 = vld [vmem:[%s5961_s1 + $0x608] sm:$0xff] }
 0x1c4   : > { %v1798_v45 = vpop.f32.mrf.mxu1  ;;  %v524_v41 = vpack.c.bf16 %v393_v38, %v392_v24 }
 0x1c5   : > { %v1797_v11 = vadd.f32 %v1796_v2, %v1739_v15  ;;  %v5195_v2 = vld [vmem:[%s4197_s27 + $0x460] sm:$0xff]  ;;  %v1275_v45 = vpack.c.b16 %v1125_v60, %v1125_v60 }
 0x1c6   : > { %2155 = vmatpush.bf16.msrb.mxu0 %v524_v41  ;;  %v1126_v49 = vunpack.c.l.b16 %v5195_v2  ;;  %v3773_v41 = vld [vmem:[%s4197_s27 + $0x2c] sm:$0xf] }
 0x1c7   : > { %v5174_v48 = vadd.f32 %v1854_v23, %v1797_v11  ;;  %v1273_v23 = vpack.c.b16 %v1123_v8, %v1123_v8  ;;  %v3263_v47 = vor.u32 %v3773_v41, %v3260_v42  ;;  %v3826_v41 = vld [vmem:[%s4197_s27 + $0x1d0] sm:$0xf0] }
 0x1c8   : > { %v1682_v40 = vpop.f32.mrf.mxu3  ;;  %v1276_v15 = vpack.c.b16 %v1126_v49, %v1126_v49 }
 0x1ca   : > { %v1856_v46 = vpop.f32.mrf.mxu2 }
 0x1cb   : > { %v5190_v50 = vpop.f32.mrf.mxu0  ;;  %v3274_v46 = vld [vmem:[%s4197_s27 + $0x38] sm:$0xf] }
 0x1cc   : > { %v1983_v12 = vpop.f32.mrf.mxu1 }
 0x1cd   : > { %1906 = vmatmul.bf16.gmra.mxu3 %v3727_v36 }
 0x1ce   : > { %2156 = vmatmul.bf16.vlgmr.msrb.gmra.mxu0 %v3267_v0 }
 0x1cf   : > { %2080 = vmatmul.bf16.gmra.mxu2 %v3739_v17  ;;  %2022 = vmatmul.bf16.gmra.mxu1 %v3735_v56  ;;  %v3774_v17 = vld [vmem:[%s4197_s27 + $0x34] sm:$0xf]  ;;  %v3268_v56 = vld [vmem:[%s4197_s27 + $0x6c] sm:$0xf0] }
 0x1d0   : > { %v1867_v57 = vpop.f32.mrf.mxu3  ;;  %v3271_v0 = vor.u32 %v3774_v17, %v3268_v56 }
 0x1d1   : > { %v1868_v63 = vadd.f32 %v1867_v57, %v4856_v53 }
 0x1d2   : > { %v2041_v35 = vpop.f32.mrf.mxu2 }
 0x1d3   : > { %v1926_v62 = vadd.f32 %v5120_v59, %v1868_v63  ;;  %v5198_v43 = vpop.f32.mrf.mxu0 }
 0x1d4   : > { %v1985_v61 = vpop.f32.mrf.mxu1 }
 0x1d5   : > { %v1984_v18 = vadd.f32 %v1983_v12, %v1926_v62  ;;  %v3811_v62 = vld [vmem:[%s4197_s27 + $0x158] sm:$0xf0] }
 0x1d7   : > { %v5202_v21 = vadd.f32 %v2041_v35, %v1984_v18  ;;  %v3386_v35 = vld [vmem:[%s4197_s27 + $0x120] sm:$0xf] }
 0x1d8   : > { %v1869_v53 = vpop.f32.mrf.mxu3  ;;  %v3387_v8 = vor.u32 %v3811_v62, %v3386_v35  ;;  %v3812_v35 = vld [vmem:[%s4197_s27 + $0x160] sm:$0xf0] }
 0x1d9   : > { %v1870_v19 = vadd.f32 %v1869_v53, %v4882_v54  ;;  %v3804_v62 = vld [vmem:[%s4197_s27 + $0x124] sm:$0xf] }
 0x1da   : > { %v2043_v59 = vpop.f32.mrf.mxu2 }
 0x1db   : > { %v1928_v11 = vadd.f32 %v5138_v25, %v1870_v19  ;;  %v5208_v3 = vpop.f32.mrf.mxu0 }
 0x1dc   : > { %v1988_v30 = vpop.f32.mrf.mxu1 }
 0x1dd   : > { %v1986_v32 = vadd.f32 %v1985_v61, %v1928_v11  ;;  %1911 = vmatmul.bf16.gmra.mxu3 %v1273_v23  ;;  %v3334_v11 = vld [vmem:[%s4197_s27 + $0xb0] sm:$0xf] }
 0x1de   : > { %2161 = vmatmul.bf16.gmra.mxu0 %v3327_v5 }
 0x1df   : > { %2085 = vmatmul.bf16.gmra.mxu2 %v1276_v15  ;;  %2027 = vmatmul.bf16.gmra.mxu1 %v1275_v45  ;;  %v5210_v54 = vadd.f32 %v2043_v59, %v1986_v32  ;;  %v3788_v15 = vld [vmem:[%s4197_s27 + $0xa4] sm:$0xf]  ;;  %v3320_v45 = vld [vmem:[%s4197_s27 + $0xdc] sm:$0xf0]  ;;  %v3328_v32 = vld [vmem:[%s4197_s27 + $0xe4] sm:$0xf0] }
 0x1e0   : > { %v1872_v7 = vpop.f32.mrf.mxu3 }
 0x1e1   : > { %v1873_v25 = vadd.f32 %v1872_v7, %v4893_v44 }
 0x1e2   : > { %v2046_v39 = vpop.f32.mrf.mxu2 }
 0x1e3   : > { %v1931_v24 = vadd.f32 %v5154_v20, %v1873_v25  ;;  %v5214_v40 = vpop.f32.mrf.mxu0  ;;  %v3275_v20 = vor.u32 %v3782_v37, %v3274_v46  ;;  %v3323_v25 = vor.u32 %v3788_v15, %v3320_v45  ;;  %v3841_v15 = vld [vmem:[%s4197_s27 + $0x248] sm:$0xf0] }
 0x1e4   : > { %v1990_v38 = vpop.f32.mrf.mxu1 }
 0x1e5   : > { %v1989_v6 = vadd.f32 %v1988_v30, %v1931_v24 }
 0x1e7   : > { %v5219_v36 = vadd.f32 %v2046_v39, %v1989_v6  ;;  %v3331_v39 = vor.u32 %v3789_v10, %v3328_v32  ;;  %v3446_v6 = vld [vmem:[%s4197_s27 + $0x198] sm:$0xf] }
 0x1e8   : > { %v1874_v12 = vpop.f32.mrf.mxu3  ;;  %v3447_v37 = vor.u32 %v3826_v41, %v3446_v6  ;;  %v3827_v6 = vld [vmem:[%s4197_s27 + $0x1d8] sm:$0xf0] }
 0x1e9   : > { %v1875_v44 = vadd.f32 %v1874_v12, %v4908_v33  ;;  %v3819_v41 = vld [vmem:[%s4197_s27 + $0x19c] sm:$0xf] }
 0x1ea   : > { %v2048_v58 = vpop.f32.mrf.mxu2 }
 0x1eb   : > { %v1933_v57 = vadd.f32 %v5169_v9, %v1875_v44  ;;  %v5228_v18 = vpop.f32.mrf.mxu0 }
 0x1ec   : > { %v1993_v63 = vpop.f32.mrf.mxu1 }
 0x1ed   : > { %v1991_v61 = vadd.f32 %v1990_v38, %v1933_v57  ;;  %2098 = vmatmul.bf16.vlgmr.msrb.gmra.mxu3 %v3263_v47  ;;  %v3394_v57 = vld [vmem:[%s4197_s27 + $0x128] sm:$0xf] }
 0x1ee   : > { %2166 = vmatmul.bf16.gmra.mxu0 %v3387_v8 }
 0x1ef   : > { %3756 = vmatmul.msk.bf16.vlgmr.msrb.gmra.mxu2 %vm1421_vm0, %v3275_v20  ;;  %2214 = vmatmul.bf16.vlgmr.msrb.gmra.mxu1 %v3271_v0  ;;  %v5231_v33 = vadd.f32 %v2048_v58, %v1991_v61  ;;  %v3803_v20 = vld [vmem:[%s4197_s27 + $0x11c] sm:$0xf]  ;;  %v3380_v0 = vld [vmem:[%s4197_s27 + $0x154] sm:$0xf0]  ;;  %v3388_v61 = vld [vmem:[%s4197_s27 + $0x15c] sm:$0xf0] }
 0x1f0   : > { %v1877_v9 = vpop.f32.mrf.mxu3 }
 0x1f1   : > { %v1878_v49 = vadd.f32 %v1877_v9, %v4931_v52 }
 0x1f2   : > { %v2051_v60 = vpop.f32.mrf.mxu2 }
 0x1f3   : > { %v1936_v53 = vadd.f32 %v5190_v50, %v1878_v49  ;;  %v5235_v23 = vpop.f32.mrf.mxu0  ;;  %v3335_v50 = vor.u32 %v3797_v29, %v3334_v11  ;;  %v3383_v49 = vor.u32 %v3803_v20, %v3380_v0  ;;  %v3856_v20 = vld [vmem:[%s4197_s27 + $0x2c0] sm:$0xf0] }
 0x1f4   : > { %v1995_v19 = vpop.f32.mrf.mxu1 }
 0x1f5   : > { %v1994_v59 = vadd.f32 %v1993_v63, %v1936_v53 }
 0x1f7   : > { %v5240_v30 = vadd.f32 %v2051_v60, %v1994_v59  ;;  %v3391_v60 = vor.u32 %v3804_v62, %v3388_v61  ;;  %v3506_v59 = vld [vmem:[%s4197_s27 + $0x210] sm:$0xf] }
 0x1f8   : > { %v1879_v5 = vpop.f32.mrf.mxu3  ;;  %v3507_v29 = vor.u32 %v3841_v15, %v3506_v59  ;;  %v3842_v59 = vld [vmem:[%s4197_s27 + $0x250] sm:$0xf0] }
 0x1f9   : > { %v1880_v52 = vadd.f32 %v1879_v5, %v4946_v27  ;;  %v3834_v15 = vld [vmem:[%s4197_s27 + $0x214] sm:$0xf] }
 0x1fa   : > { %v2053_v7 = vpop.f32.mrf.mxu2 }
 0x1fb   : > { %v1938_v24 = vadd.f32 %v5198_v43, %v1880_v52  ;;  %v5249_v46 = vpop.f32.mrf.mxu0 }
 0x1fc   : > { %v1998_v38 = vpop.f32.mrf.mxu1 }
 0x1fd   : > { %v1996_v42 = vadd.f32 %v1995_v19, %v1938_v24  ;;  %2103 = vmatmul.bf16.gmra.mxu3 %v3323_v25  ;;  %v3454_v24 = vld [vmem:[%s4197_s27 + $0x1a0] sm:$0xf] }
 0x1fe   : > { %2171 = vmatmul.bf16.gmra.mxu0 %v3447_v37 }
 0x1ff   : > { %3757 = vmatmul.msk.bf16.gmra.mxu2 %vm1421_vm0, %v3335_v50  ;;  %2219 = vmatmul.bf16.gmra.mxu1 %v3331_v39  ;;  %v5252_v27 = vadd.f32 %v2053_v7, %v1996_v42  ;;  %v3818_v50 = vld [vmem:[%s4197_s27 + $0x194] sm:$0xf]  ;;  %v3440_v39 = vld [vmem:[%s4197_s27 + $0x1cc] sm:$0xf0]  ;;  %v3448_v42 = vld [vmem:[%s4197_s27 + $0x1d4] sm:$0xf0] }
 0x200   : > { %v1882_v43 = vpop.f32.mrf.mxu3 }
 0x201   : > { %v1883_v17 = vadd.f32 %v1882_v43, %v4967_v51 }
 0x202   : > { %v2056_v56 = vpop.f32.mrf.mxu2 }
 0x203   : > { %v1941_v12 = vadd.f32 %v5208_v3, %v1883_v17  ;;  %v5256_v47 = vpop.f32.mrf.mxu0  ;;  %v3395_v3 = vor.u32 %v3812_v35, %v3394_v57  ;;  %v3443_v17 = vor.u32 %v3818_v50, %v3440_v39  ;;  %v3871_v50 = vld [vmem:[%s4197_s27 + $0x338] sm:$0xf0] }
 0x204   : > { %v2000_v44 = vpop.f32.mrf.mxu1 }
 0x205   : > { %v1999_v58 = vadd.f32 %v1998_v38, %v1941_v12 }
 0x207   : > { %v5261_v63 = vadd.f32 %v2056_v56, %v1999_v58  ;;  %v3451_v56 = vor.u32 %v3819_v41, %v3448_v42  ;;  %v3566_v58 = vld [vmem:[%s4197_s27 + $0x288] sm:$0xf] }
 0x208   : > { %v1884_v8 = vpop.f32.mrf.mxu3  ;;  %v3567_v35 = vor.u32 %v3856_v20, %v3566_v58  ;;  %v3857_v58 = vld [vmem:[%s4197_s27 + $0x2c8] sm:$0xf0] }
 0x209   : > { %v1885_v51 = vadd.f32 %v1884_v8, %v4978_v34  ;;  %v3849_v20 = vld [vmem:[%s4197_s27 + $0x28c] sm:$0xf] }
 0x20a   : > { %v2058_v9 = vpop.f32.mrf.mxu2 }
 0x20b   : > { %v1943_v53 = vadd.f32 %v5214_v40, %v1885_v51  ;;  %v5270_v11 = vpop.f32.mrf.mxu0 }
 0x20c   : > { %v2003_v19 = vpop.f32.mrf.mxu1 }
 0x20d   : > { %v2001_v45 = vadd.f32 %v2000_v44, %v1943_v53  ;;  %2108 = vmatmul.bf16.gmra.mxu3 %v3383_v49  ;;  %v3514_v53 = vld [vmem:[%s4197_s27 + $0x218] sm:$0xf] }
 0x20e   : > { %2176 = vmatmul.bf16.gmra.mxu0 %v3507_v29 }
 0x20f   : > { %3758 = vmatmul.msk.bf16.gmra.mxu2 %vm1421_vm0, %v3395_v3  ;;  %2224 = vmatmul.bf16.gmra.mxu1 %v3391_v60  ;;  %v5273_v34 = vadd.f32 %v2058_v9, %v2001_v45  ;;  %v3833_v3 = vld [vmem:[%s4197_s27 + $0x20c] sm:$0xf]  ;;  %v3500_v60 = vld [vmem:[%s4197_s27 + $0x244] sm:$0xf0]  ;;  %v3508_v45 = vld [vmem:[%s4197_s27 + $0x24c] sm:$0xf0] }
 0x210   : > { %v1887_v40 = vpop.f32.mrf.mxu3 }
 0x211   : > { %v1888_v10 = vadd.f32 %v1887_v40, %v4996_v28 }
 0x212   : > { %v2061_v32 = vpop.f32.mrf.mxu2 }
 0x213   : > { %v1946_v5 = vadd.f32 %v5228_v18, %v1888_v10  ;;  %v5277_v25 = vpop.f32.mrf.mxu0  ;;  %v3455_v18 = vor.u32 %v3827_v6, %v3454_v24  ;;  %v3503_v10 = vor.u32 %v3833_v3, %v3500_v60  ;;  %v3886_v3 = vld [vmem:[%s4197_s27 + $0x3b0] sm:$0xf0] }
 0x214   : > { %v2005_v52 = vpop.f32.mrf.mxu1 }
 0x215   : > { %v2004_v7 = vadd.f32 %v2003_v19, %v1946_v5 }
 0x217   : > { %v5282_v38 = vadd.f32 %v2061_v32, %v2004_v7  ;;  %v3511_v32 = vor.u32 %v3834_v15, %v3508_v45  ;;  %v3626_v7 = vld [vmem:[%s4197_s27 + $0x300] sm:$0xf] }
 0x218   : > { %v1889_v37 = vpop.f32.mrf.mxu3  ;;  %v3627_v6 = vor.u32 %v3871_v50, %v3626_v7  ;;  %v3872_v7 = vld [vmem:[%s4197_s27 + $0x340] sm:$0xf0] }
 0x219   : > { %v1890_v28 = vadd.f32 %v1889_v37, %v5016_v31  ;;  %v3864_v50 = vld [vmem:[%s4197_s27 + $0x304] sm:$0xf] }
 0x21a   : > { %v2063_v43 = vpop.f32.mrf.mxu2 }
 0x21b   : > { %v1948_v12 = vadd.f32 %v5235_v23, %v1890_v28  ;;  %v5291_v57 = vpop.f32.mrf.mxu0 }
 0x21c   : > { %v2008_v44 = vpop.f32.mrf.mxu1 }
 0x21d   : > { %v2006_v0 = vadd.f32 %v2005_v52, %v1948_v12  ;;  %2113 = vmatmul.bf16.gmra.mxu3 %v3443_v17  ;;  %v3574_v12 = vld [vmem:[%s4197_s27 + $0x290] sm:$0xf] }
 0x21e   : > { %2181 = vmatmul.bf16.gmra.mxu0 %v3567_v35 }
 0x21f   : > { %3759 = vmatmul.msk.bf16.gmra.mxu2 %vm1421_vm0, %v3455_v18  ;;  %2229 = vmatmul.bf16.gmra.mxu1 %v3451_v56  ;;  %v5294_v31 = vadd.f32 %v2063_v43, %v2006_v0  ;;  %v3848_v18 = vld [vmem:[%s4197_s27 + $0x284] sm:$0xf]  ;;  %v3560_v56 = vld [vmem:[%s4197_s27 + $0x2bc] sm:$0xf0]  ;;  %v3568_v0 = vld [vmem:[%s4197_s27 + $0x2c4] sm:$0xf0] }
 0x220   : > { %v1892_v23 = vpop.f32.mrf.mxu3 }
 0x221   : > { %v1893_v62 = vadd.f32 %v1892_v23, %v5034_v14 }
 0x222   : > { %v2066_v61 = vpop.f32.mrf.mxu2 }
 0x223   : > { %v1951_v8 = vadd.f32 %v5249_v46, %v1893_v62  ;;  %v5298_v49 = vpop.f32.mrf.mxu0  ;;  %v3515_v46 = vor.u32 %v3842_v59, %v3514_v53  ;;  %v3563_v62 = vor.u32 %v3848_v18, %v3560_v56  ;;  %v3901_v18 = vld [vmem:[%s4197_s27 + $0x428] sm:$0xf0] }
 0x224   : > { %v2010_v51 = vpop.f32.mrf.mxu1 }
 0x225   : > { %v2009_v9 = vadd.f32 %v2008_v44, %v1951_v8 }
 0x227   : > { %v5303_v19 = vadd.f32 %v2066_v61, %v2009_v9  ;;  %v3571_v61 = vor.u32 %v3849_v20, %v3568_v0  ;;  %v3686_v9 = vld [vmem:[%s4197_s27 + $0x378] sm:$0xf] }
 0x228   : > { %v1894_v29 = vpop.f32.mrf.mxu3  ;;  %v3687_v59 = vor.u32 %v3886_v3, %v3686_v9  ;;  %v3887_v9 = vld [vmem:[%s4197_s27 + $0x3b8] sm:$0xf0] }
 0x229   : > { %v1895_v14 = vadd.f32 %v1894_v29, %v5060_v22  ;;  %v3879_v3 = vld [vmem:[%s4197_s27 + $0x37c] sm:$0xf] }
 0x22a   : > { %v2068_v40 = vpop.f32.mrf.mxu2 }
 0x22b   : > { %v1953_v5 = vadd.f32 %v5256_v47, %v1895_v14  ;;  %v5312_v24 = vpop.f32.mrf.mxu0 }
 0x22c   : > { %v2013_v52 = vpop.f32.mrf.mxu1 }
 0x22d   : > { %v2011_v39 = vadd.f32 %v2010_v51, %v1953_v5  ;;  %2118 = vmatmul.bf16.gmra.mxu3 %v3503_v10  ;;  %v3634_v5 = vld [vmem:[%s4197_s27 + $0x308] sm:$0xf] }
 0x22e   : > { %2186 = vmatmul.bf16.gmra.mxu0 %v3627_v6 }
 0x22f   : > { %3760 = vmatmul.msk.bf16.gmra.mxu2 %vm1421_vm0, %v3515_v46  ;;  %2234 = vmatmul.bf16.gmra.mxu1 %v3511_v32  ;;  %v5315_v22 = vadd.f32 %v2068_v40, %v2011_v39  ;;  %v3863_v46 = vld [vmem:[%s4197_s27 + $0x2fc] sm:$0xf]  ;;  %v3620_v32 = vld [vmem:[%s4197_s27 + $0x334] sm:$0xf0]  ;;  %v3628_v39 = vld [vmem:[%s4197_s27 + $0x33c] sm:$0xf0] }
 0x230   : > { %v1897_v47 = vpop.f32.mrf.mxu3 }
 0x231   : > { %v1898_v41 = vadd.f32 %v1897_v47, %v5071_v13 }
 0x232   : > { %v2071_v42 = vpop.f32.mrf.mxu2 }
 0x233   : > { %v1956_v37 = vadd.f32 %v5270_v11, %v1898_v41  ;;  %v5319_v17 = vpop.f32.mrf.mxu0  ;;  %v3575_v11 = vor.u32 %v3857_v58, %v3574_v12  ;;  %v3623_v41 = vor.u32 %v3863_v46, %v3620_v32 }
 0x234   : > { %v2015_v28 = vpop.f32.mrf.mxu1 }
 0x235   : > { %v2014_v43 = vadd.f32 %v2013_v52, %v1956_v37 }
 0x237   : > { %v5324_v44 = vadd.f32 %v2071_v42, %v2014_v43  ;;  %v3635_v42 = vor.u32 %v3872_v7, %v3634_v5  ;;  %v3746_v43 = vld [vmem:[%s4197_s27 + $0x3f0] sm:$0xf] }
 0x238   : > { %v1899_v35 = vpop.f32.mrf.mxu3  ;;  %v3747_v58 = vor.u32 %v3901_v18, %v3746_v43  ;;  %v3894_v43 = vld [vmem:[%s4197_s27 + $0x3f4] sm:$0xf]  ;;  %v3748_v18 = vld [vmem:[%s4197_s27 + $0x42c] sm:$0xf0] }
 0x239   : > { %v1900_v13 = vadd.f32 %v1899_v35, %v5086_v16 }
 0x23a   : > { %v2073_v23 = vpop.f32.mrf.mxu2 }
 0x23b   : > { %v1958_v8 = vadd.f32 %v5277_v25, %v1900_v13  ;;  %v5333_v53 = vpop.f32.mrf.mxu0 }
 0x23c   : > { %v2018_v51 = vpop.f32.mrf.mxu1 }
 0x23d   : > { %v2016_v60 = vadd.f32 %v2015_v28, %v1958_v8  ;;  %2123 = vmatmul.bf16.gmra.mxu3 %v3563_v62  ;;  %v3694_v8 = vld [vmem:[%s4197_s27 + $0x380] sm:$0xf] }
 0x23e   : > { %2191 = vmatmul.bf16.gmra.mxu0 %v3687_v59 }
 0x23f   : > { %3761 = vmatmul.msk.bf16.gmra.mxu2 %vm1421_vm0, %v3575_v11  ;;  %2239 = vmatmul.bf16.gmra.mxu1 %v3571_v61  ;;  %v5336_v16 = vadd.f32 %v2073_v23, %v2016_v60  ;;  %v3878_v11 = vld [vmem:[%s4197_s27 + $0x374] sm:$0xf]  ;;  %v3680_v61 = vld [vmem:[%s4197_s27 + $0x3ac] sm:$0xf0]  ;;  %v3688_v60 = vld [vmem:[%s4197_s27 + $0x3b4] sm:$0xf0] }
 0x240   : > { %v1902_v25 = vpop.f32.mrf.mxu3 }
 0x241   : > { %v1903_v15 = vadd.f32 %v1902_v25, %v5107_v4 }
 0x242   : > { %v2076_v45 = vpop.f32.mrf.mxu2 }
 0x243   : > { %v1961_v29 = vadd.f32 %v5291_v57, %v1903_v15  ;;  %v1972_v10 = vpop.f32.mrf.mxu0  ;;  %v3631_v57 = vor.u32 %v3864_v50, %v3628_v39  ;;  %v3683_v15 = vor.u32 %v3878_v11, %v3680_v61 }
 0x244   : > { %v2020_v14 = vpop.f32.mrf.mxu1 }
 0x245   : > { %v2019_v40 = vadd.f32 %v2018_v51, %v1961_v29 }
 0x247   : > { %v5343_v52 = vadd.f32 %v2076_v45, %v2019_v40  ;;  %v3695_v45 = vor.u32 %v3887_v9, %v3694_v8  ;;  %v692_v40 = vld [vmem:[%s4197_s27 + $0x468] sm:$0xff]  ;;  %v693_v8 = vld [vmem:[%s4197_s27 + $0x470] sm:$0xf] }
 0x248   : > { %v1904_v6 = vpop.f32.mrf.mxu3  ;;  %v1128_v10 = vunpack.c.l.b16 %v692_v40 }
 0x249   : > { %v1905_v47 = vadd.f32 %v1904_v6, %v5131_v1 }
 0x24a   : > { %v2078_v4 = vpop.f32.mrf.mxu2 }
 0x24b   : > { %v1963_v37 = vadd.f32 %v5298_v49, %v1905_v47  ;;  %v5352_v12 = vpop.f32.mrf.mxu0 }
 0x24c   : > { %v2023_v28 = vpop.f32.mrf.mxu1 }
 0x24d   : > { %v2021_v56 = vadd.f32 %v2020_v14, %v1963_v37  ;;  %2128 = vmatmul.bf16.gmra.mxu3 %v3623_v41  ;;  %v3893_v41 = vld [vmem:[%s4197_s27 + $0x3ec] sm:$0xf] }
 0x24e   : > { %2196 = vmatmul.bf16.gmra.mxu0 %v3747_v58 }
 0x24f   : > { %3762 = vmatmul.msk.bf16.gmra.mxu2 %vm1421_vm0, %v3635_v42  ;;  %2244 = vmatmul.bf16.gmra.mxu1 %v3631_v57  ;;  %v5355_v1 = vadd.f32 %v2078_v4, %v2021_v56  ;;  %v3740_v42 = vld [vmem:[%s4197_s27 + $0x424] sm:$0xf0]  ;;  %v3754_v57 = vld [vmem:[%s4197_s27 + $0x3f8] sm:$0xf] }
 0x250   : > { %v1907_v49 = vpop.f32.mrf.mxu3 }
 0x251   : > { %v1908_v20 = vadd.f32 %v1907_v49, %v5143_v55  ;;  %v3743_v49 = vor.u32 %v3893_v41, %v3740_v42 }
 0x252   : > { %v2081_v0 = vpop.f32.mrf.mxu2 }
 0x253   : > { %v1966_v35 = vadd.f32 %v5312_v24, %v1908_v20  ;;  %v5359_v62 = vpop.f32.mrf.mxu0  ;;  %v3691_v24 = vor.u32 %v3879_v3, %v3688_v60  ;;  %v3751_v20 = vor.u32 %v3894_v43, %v3748_v18  ;;  %v1127_v3 = vunpack.c.h.b16 %v5195_v2 }
 0x254   : > { %v2025_v13 = vpop.f32.mrf.mxu1 }
 0x255   : > { %v2024_v23 = vadd.f32 %v2023_v28, %v1966_v35  ;;  %v3902_v28 = vld [vmem:[%s4197_s27 + $0x430] sm:$0xf0]  ;;  %s3214_s27 = sshll.u32 %s5967_s25, 3 }
 0x256   : > { %s5615_s16 = scalar_lea.vmem %s5962_s2, %s3214_s27  ;;  %s5876_s20 = scalar_lea.vmem %s5963_s3, %s3214_s27 }
 0x257   : > { %v5364_v51 = vadd.f32 %v2081_v0, %v2024_v23 }
 0x258   : > { %v1909_v59 = vpop.f32.mrf.mxu3 }
 0x259   : > { %v1910_v25 = vadd.f32 %v1909_v59, %v5156_v26  ;;  %v1278_v26 = vpack.c.b16 %v1128_v10, %v1128_v10  ;;  %v1130_v59 = vunpack.c.l.b16 %v693_v8 }
 0x25a   : > { %v2083_v55 = vpop.f32.mrf.mxu2 }
 0x25b   : > { %v1968_v29 = vadd.f32 %v5319_v17, %v1910_v25  ;;  %v5372_v32 = vpop.f32.mrf.mxu0  ;;  %v1129_v25 = vunpack.c.h.b16 %v692_v40  ;;  %v1280_v2 = vpack.c.b16 %v1130_v59, %v1130_v59 }
 0x25c   : > { %v2028_v14 = vpop.f32.mrf.mxu1 }
 0x25d   : > { %v2026_v46 = vadd.f32 %v2025_v13, %v1968_v29  ;;  %2133 = vmatmul.bf16.gmra.mxu3 %v3683_v15  ;;  %v1277_v29 = vpack.c.b16 %v1127_v3, %v1127_v3 }
 0x25e   : > { %2201 = vmatmul.bf16.gmra.mxu0 %v1278_v26 }
 0x25f   : > { %3763 = vmatmul.msk.bf16.gmra.mxu2 %vm1421_vm0, %v3695_v45  ;;  %2249 = vmatmul.bf16.gmra.mxu1 %v3691_v24  ;;  %v5375_v5 = vadd.f32 %v2083_v55, %v2026_v46 }
 0x260   : > { %v1912_v17 = vpop.f32.mrf.mxu3 }
 0x261   : > { %v1913_v7 = vadd.f32 %v1912_v17, %v5174_v48  ;;  %v3755_v48 = vor.u32 %v3902_v28, %v3754_v57 }
 0x262   : > { %v2086_v50 = vpop.f32.mrf.mxu2 }
 0x263   : > { %v1971_v39 = vadd.f32 %v5333_v53, %v1913_v7  ;;  %v5379_v4 = vpop.f32.mrf.mxu0 }
 0x264   : > { %v2030_v6 = vpop.f32.mrf.mxu1 }
 0x265   : > { %v2029_v47 = vadd.f32 %v2028_v14, %v1971_v39  ;;  %v1279_v14 = vpack.c.b16 %v1129_v25, %v1129_v25 }
 0x267   : > { %v5384_v37 = vadd.f32 %v2086_v50, %v2029_v47 }
 0x268   : > { %v1914_v56 = vpop.f32.mrf.mxu3 }
 0x26a   : > { %v2088_v58 = vpop.f32.mrf.mxu2 }
 0x26b   : > { %v5389_v53 = vpop.f32.mrf.mxu0 }
 0x26c   : > { %v2215_v0 = vpop.f32.mrf.mxu1 }
 0x26d   : > { %2138 = vmatmul.bf16.gmra.mxu3 %v3743_v49 }
 0x26f   : > { %3764 = vmatmul.msk.bf16.gmra.mxu2 %vm1421_vm0, %v3755_v48  ;;  %2254 = vmatmul.bf16.gmra.mxu1 %v3751_v20 }
 0x270   : > { %v2099_v35 = vpop.f32.mrf.mxu3 }
 0x271   : > { %v2100_v13 = vadd.f32 %v2099_v35, %v5202_v21 }
 0x272   : > { %v2273_v23 = vpop.f32.mrf.mxu2 }
 0x273   : > { %v2158_v11 = vadd.f32 %v5352_v12, %v2100_v13  ;;  %v5396_v60 = vpop.f32.mrf.mxu0 }
 0x274   : > { %v2217_v61 = vpop.f32.mrf.mxu1 }
 0x275   : > { %v2216_v9 = vadd.f32 %v2215_v0, %v2158_v11 }
 0x277   : > { %v5398_v55 = vadd.f32 %v2273_v23, %v2216_v9 }
 0x278   : > { %v2101_v15 = vpop.f32.mrf.mxu3 }
 0x279   : > { %v2102_v45 = vadd.f32 %v2101_v15, %v5210_v54  ;;  %v2323_v21 = vsel %vm2322_vm1, %v5398_v55, 0.0  ;;  %v2399_v12 = vmul.f32 %v5398_v55, %v5398_v55 }
 0x27a   : > { %v2275_v24 = vpop.f32.mrf.mxu2  ;;  %2324 = vadd.xlane.f32.xlu0 %v2323_v21 }
 0x27b   : > { %v2160_v10 = vadd.f32 %v5359_v62, %v2102_v45  ;;  %v2418_v40 = vsel %vm2322_vm1, %v2399_v12, 0.0  ;;  %v2172_v54 = vpop.f32.mrf.mxu0 }
 0x27c   : > { %v2220_v46 = vpop.f32.mrf.mxu1  ;;  %2419 = vadd.xlane.f32.xlu1 %v2418_v40 }
 0x27d   : > { %v2218_v26 = vadd.f32 %v2217_v61, %v2160_v10  ;;  %2143 = vmatmul.bf16.gmra.mxu3 %v1277_v29 }
 0x27f   : > { %3765 = vmatmul.msk.bf16.gmra.mxu2 %vm1421_vm0, %v1280_v2  ;;  %2259 = vmatmul.bf16.gmra.mxu1 %v1279_v14  ;;  %v5408_v17 = vadd.f32 %v2275_v24, %v2218_v26 }
 0x280   : > { %v2104_v7 = vpop.f32.mrf.mxu3 }
 0x281   : > { %v2105_v50 = vadd.f32 %v2104_v7, %v5219_v36  ;;  %v2326_v6 = vsel %vm2322_vm1, %v5408_v17, 0.0  ;;  %v2400_v62 = vmul.f32 %v5408_v17, %v5408_v17 }
 0x282   : > { %v2278_v39 = vpop.f32.mrf.mxu2  ;;  %2327 = vadd.xlane.f32.xlu0 %v2326_v6 }
 0x283   : > { %v2163_v47 = vadd.f32 %v5372_v32, %v2105_v50  ;;  %v2421_v42 = vsel %vm2322_vm1, %v2400_v62, 0.0  ;;  %v2174_v28 = vpop.f32.mrf.mxu0 }
 0x284   : > { %v2222_v41 = vpop.f32.mrf.mxu1  ;;  %2422 = vadd.xlane.f32.xlu2 %v2421_v42 }
 0x285   : > { %v2221_v57 = vadd.f32 %v2220_v46, %v2163_v47 }
 0x287   : > { %v5417_v43 = vadd.f32 %v2278_v39, %v2221_v57 }
 0x288   : > { %v2106_v18 = vpop.f32.mrf.mxu3 }
 0x289   : > { %v2107_v36 = vadd.f32 %v2106_v18, %v5231_v33  ;;  %v2329_v58 = vsel %vm2322_vm1, %v5417_v43, 0.0  ;;  %v2401_v49 = vmul.f32 %v5417_v43, %v5417_v43 }
 0x28a   : > { %v2280_v56 = vpop.f32.mrf.mxu2  ;;  %2330 = vadd.xlane.f32.xlu1 %v2329_v58 }
 0x28b   : > { %v2165_v32 = vadd.f32 %v5379_v4, %v2107_v36  ;;  %v2424_v20 = vsel %vm2322_vm1, %v2401_v49, 0.0  ;;  %v2177_v35 = vpop.f32.mrf.mxu0 }
 0x28c   : > { %v2225_v48 = vpop.f32.mrf.mxu1  ;;  %2425 = vadd.xlane.f32.xlu0 %v2424_v20 }
 0x28d   : > { %v2223_v0 = vadd.f32 %v2222_v41, %v2165_v32 }
 0x28f   : > { %v5426_v13 = vadd.f32 %v2280_v56, %v2223_v0 }
 0x290   : > { %v2109_v23 = vpop.f32.mrf.mxu3 }
 0x291   : > { %v2110_v33 = vadd.f32 %v2109_v23, %v5240_v30  ;;  %v2332_v61 = vsel %vm2322_vm1, %v5426_v13, 0.0  ;;  %v2402_v3 = vmul.f32 %v5426_v13, %v5426_v13 }
 0x292   : > { %v2283_v11 = vpop.f32.mrf.mxu2  ;;  %2333 = vadd.xlane.f32.xlu1 %v2332_v61 }
 0x293   : > { %v2168_v8 = vadd.f32 %v5389_v53, %v2110_v33  ;;  %v2179_v59 = vpop.f32.mrf.mxu0  ;;  %v2427_v21 = vsel %vm2322_vm1, %v2402_v3, 0.0 }
 0x294   : > { %v2227_v9 = vpop.f32.mrf.mxu1 }
 0x295   : > { %v2226_v4 = vadd.f32 %v2225_v48, %v2168_v8 }
 0x297   : > { %v5434_v25 = vadd.f32 %v2283_v11, %v2226_v4 }
 0x298   : > { %v2111_v15 = vpop.f32.mrf.mxu3 }
 0x299   : > { %v2112_v45 = vadd.f32 %v2111_v15, %v5252_v27  ;;  %v2335_v30 = vsel %vm2322_vm1, %v5434_v25, 0.0  ;;  %v2403_v2 = vmul.f32 %v5434_v25, %v5434_v25 }
 0x29a   : > { %v2285_v24 = vpop.f32.mrf.mxu2  ;;  %2336 = vadd.xlane.f32.xlu2 %v2335_v30  ;;  %2428 = vadd.xlane.f32.xlu1 %v2427_v21 }
 0x29b   : > { %v2170_v53 = vadd.f32 %v5396_v60, %v2112_v45  ;;  %v2182_v14 = vpop.f32.mrf.mxu0  ;;  %v2430_v26 = vsel %vm2322_vm1, %v2403_v2, 0.0 }
 0x29c   : > { %v2230_v12 = vpop.f32.mrf.mxu1 }
 0x29d   : > { %v2228_v29 = vadd.f32 %v2227_v9, %v2170_v53 }
 0x29f   : > { %v5443_v10 = vadd.f32 %v2285_v24, %v2228_v29 }
 0x2a0   : > { %v2114_v46 = vpop.f32.mrf.mxu3 }
 0x2a1   : > { %v2115_v27 = vadd.f32 %v2114_v46, %v5261_v63  ;;  %v2404_v7 = vmul.f32 %v5443_v10, %v5443_v10  ;;  %v2338_v57 = vsel %vm2322_vm1, %v5443_v10, 0.0 }
 0x2a2   : > { %v2288_v40 = vpop.f32.mrf.mxu2  ;;  %2431 = vadd.xlane.f32.xlu2 %v2430_v26 }
 0x2a3   : > { %v2173_v50 = vadd.f32 %v2172_v54, %v2115_v27  ;;  %v2433_v39 = vsel %vm2322_vm1, %v2404_v7, 0.0  ;;  %v2184_v62 = vpop.f32.mrf.mxu0 }
 0x2a4   : > { %v2232_v60 = vpop.f32.mrf.mxu1  ;;  %2434 = vadd.xlane.f32.xlu0 %v2433_v39 }
 0x2a5   : > { %v2231_v6 = vadd.f32 %v2230_v12, %v2173_v50 }
 0x2a7   : > { %v5450_v47 = vadd.f32 %v2288_v40, %v2231_v6 }
 0x2a8   : > { %v2116_v41 = vpop.f32.mrf.mxu3 }
 0x2a9   : > { %v2117_v42 = vadd.f32 %v2116_v41, %v5273_v34  ;;  %v2405_v18 = vmul.f32 %v5450_v47, %v5450_v47  ;;  %v2341_v58 = vsel %vm2322_vm1, %v5450_v47, 0.0 }
 0x2aa   : > { %v2290_v63 = vpop.f32.mrf.mxu2  ;;  %2339 = vadd.xlane.f32.xlu2 %v2338_v57 }
 0x2ab   : > { %v2175_v54 = vadd.f32 %v2174_v28, %v2117_v42  ;;  %v2436_v56 = vsel %vm2322_vm1, %v2405_v18, 0.0  ;;  %v2187_v32 = vpop.f32.mrf.mxu0 }
 0x2ac   : > { %v2235_v36 = vpop.f32.mrf.mxu1  ;;  %2437 = vadd.xlane.f32.xlu1 %v2436_v56  ;;  %2342 = vadd.xlane.f32.xlu0 %v2341_v58 }
 0x2ad   : > { %v2233_v49 = vadd.f32 %v2232_v60, %v2175_v54 }
 0x2af   : > { %v5460_v34 = vadd.f32 %v2290_v63, %v2233_v49 }
 0x2b0   : > { %v2119_v48 = vpop.f32.mrf.mxu3 }
 0x2b1   : > { %v2120_v20 = vadd.f32 %v2119_v48, %v5282_v38  ;;  %v2406_v23 = vmul.f32 %v5460_v34, %v5460_v34  ;;  %v2344_v61 = vsel %vm2322_vm1, %v5460_v34, 0.0 }
 0x2b2   : > { %v2293_v0 = vpop.f32.mrf.mxu2 }
 0x2b3   : > { %v2178_v28 = vadd.f32 %v2177_v35, %v2120_v20  ;;  %v2439_v11 = vsel %vm2322_vm1, %v2406_v23, 0.0  ;;  %v2189_v9 = vpop.f32.mrf.mxu0 }
 0x2b4   : > { %v2237_v33 = vpop.f32.mrf.mxu1  ;;  %2440 = vadd.xlane.f32.xlu2 %v2439_v11  ;;  %2345 = vadd.xlane.f32.xlu1 %v2344_v61 }
 0x2b5   : > { %v2236_v8 = vadd.f32 %v2235_v36, %v2178_v28 }
 0x2b7   : > { %v5468_v4 = vadd.f32 %v2293_v0, %v2236_v8 }
 0x2b8   : > { %v2121_v3 = vpop.f32.mrf.mxu3 }
 0x2b9   : > { %v2122_v38 = vadd.f32 %v2121_v3, %v5294_v31  ;;  %v2407_v45 = vmul.f32 %v5468_v4, %v5468_v4  ;;  %v2347_v30 = vsel %vm2322_vm1, %v5468_v4, 0.0 }
 0x2ba   : > { %v2295_v15 = vpop.f32.mrf.mxu2 }
 0x2bb   : > { %v2180_v35 = vadd.f32 %v2179_v59, %v2122_v38  ;;  %v2442_v21 = vsel %vm2322_vm1, %v2407_v45, 0.0  ;;  %v2192_v12 = vpop.f32.mrf.mxu0 }
 0x2bc   : > { %v2240_v24 = vpop.f32.mrf.mxu1  ;;  %2348 = vadd.xlane.f32.xlu2 %v2347_v30  ;;  %2443 = vadd.xlane.f32.xlu0 %v2442_v21 }
 0x2bd   : > { %v2238_v53 = vadd.f32 %v2237_v33, %v2180_v35 }
 0x2bf   : > { %v5476_v29 = vadd.f32 %v2295_v15, %v2238_v53 }
 0x2c0   : > { %v2124_v2 = vpop.f32.mrf.mxu3 }
 0x2c1   : > { %v2125_v31 = vadd.f32 %v2124_v2, %v5303_v19  ;;  %v2408_v27 = vmul.f32 %v5476_v29, %v5476_v29  ;;  %v2350_v7 = vsel %vm2322_vm1, %v5476_v29, 0.0 }
 0x2c2   : > { %v2298_v46 = vpop.f32.mrf.mxu2 }
 0x2c3   : > { %v2183_v59 = vadd.f32 %v2182_v14, %v2125_v31  ;;  %v2445_v26 = vsel %vm2322_vm1, %v2408_v27, 0.0  ;;  %v2194_v60 = vpop.f32.mrf.mxu0 }
 0x2c4   : > { %v2242_v40 = vpop.f32.mrf.mxu1  ;;  %2446 = vadd.xlane.f32.xlu1 %v2445_v26  ;;  %2351 = vadd.xlane.f32.xlu0 %v2350_v7 }
 0x2c5   : > { %v2241_v50 = vadd.f32 %v2240_v24, %v2183_v59 }
 0x2c7   : > { %v5484_v39 = vadd.f32 %v2298_v46, %v2241_v50 }
 0x2c8   : > { %v2126_v6 = vpop.f32.mrf.mxu3 }
 0x2c9   : > { %v2127_v19 = vadd.f32 %v2126_v6, %v5315_v22  ;;  %v2409_v42 = vmul.f32 %v5484_v39, %v5484_v39  ;;  %v2353_v18 = vsel %vm2322_vm1, %v5484_v39, 0.0 }
 0x2ca   : > { %v2300_v41 = vpop.f32.mrf.mxu2 }
 0x2cb   : > { %v2185_v14 = vadd.f32 %v2184_v62, %v2127_v19  ;;  %v2448_v57 = vsel %vm2322_vm1, %v2409_v42, 0.0  ;;  %v5492_v36 = vpop.f32.mrf.mxu0 }
 0x2cc   : > { %v2245_v63 = vpop.f32.mrf.mxu1  ;;  %2449 = vadd.xlane.f32.xlu2 %v2448_v57  ;;  %2354 = vadd.xlane.f32.xlu1 %v2353_v18 }
 0x2cd   : > { %v2243_v54 = vadd.f32 %v2242_v40, %v2185_v14 }
 0x2cf   : > { %v5494_v56 = vadd.f32 %v2300_v41, %v2243_v54 }
 0x2d0   : > { %v2129_v58 = vpop.f32.mrf.mxu3 }
 0x2d1   : > { %v2130_v22 = vadd.f32 %v2129_v58, %v5324_v44  ;;  %v2410_v62 = vmul.f32 %v5494_v56, %v5494_v56  ;;  %v2356_v0 = vsel %vm2322_vm1, %v5494_v56, 0.0 }
 0x2d2   : > { %v2303_v49 = vpop.f32.mrf.mxu2 }
 0x2d3   : > { %v2188_v48 = vadd.f32 %v2187_v32, %v2130_v22  ;;  %v2451_v23 = vsel %vm2322_vm1, %v2410_v62, 0.0  ;;  %v5502_v33 = vpop.f32.mrf.mxu0 }
 0x2d4   : > { %v2247_v20 = vpop.f32.mrf.mxu1  ;;  %2357 = vadd.xlane.f32.xlu2 %v2356_v0  ;;  %2452 = vadd.xlane.f32.xlu0 %v2451_v23 }
 0x2d5   : > { %v2246_v28 = vadd.f32 %v2245_v63, %v2188_v48 }
 0x2d7   : > { %v5504_v11 = vadd.f32 %v2303_v49, %v2246_v28 }
 0x2d8   : > { %v2131_v61 = vpop.f32.mrf.mxu3 }
 0x2d9   : > { %v2132_v44 = vadd.f32 %v2131_v61, %v5336_v16  ;;  %v2411_v32 = vmul.f32 %v5504_v11, %v5504_v11  ;;  %v2359_v45 = vsel %vm2322_vm1, %v5504_v11, 0.0 }
 0x2da   : > { %v2305_v8 = vpop.f32.mrf.mxu2 }
 0x2db   : > { %v2190_v3 = vadd.f32 %v2189_v9, %v2132_v44  ;;  %v2454_v15 = vsel %vm2322_vm1, %v2411_v32, 0.0  ;;  %v5512_v24 = vpop.f32.mrf.mxu0 }
 0x2dc   : > { %v2250_v38 = vpop.f32.mrf.mxu1  ;;  %2455 = vadd.xlane.f32.xlu1 %v2454_v15  ;;  %2360 = vadd.xlane.f32.xlu0 %v2359_v45 }
 0x2dd   : > { %v2248_v35 = vadd.f32 %v2247_v20, %v2190_v3 }
 0x2df   : > { %v5514_v30 = vadd.f32 %v2305_v8, %v2248_v35 }
 0x2e0   : > { %v2134_v21 = vpop.f32.mrf.mxu3 }
 0x2e1   : > { %v2135_v16 = vadd.f32 %v2134_v21, %v5343_v52  ;;  %v2412_v9 = vmul.f32 %v5514_v30, %v5514_v30  ;;  %v2362_v27 = vsel %vm2322_vm1, %v5514_v30, 0.0 }
 0x2e2   : > { %v2308_v53 = vpop.f32.mrf.mxu2 }
 0x2e3   : > { %v2193_v2 = vadd.f32 %v2192_v12, %v2135_v16  ;;  %v2457_v46 = vsel %vm2322_vm1, %v2412_v9, 0.0  ;;  %v2204_v40 = vpop.f32.mrf.mxu0 }
 0x2e4   : > { %v2252_v31 = vpop.f32.mrf.mxu1  ;;  %2458 = vadd.xlane.f32.xlu2 %v2457_v46  ;;  %2363 = vadd.xlane.f32.xlu1 %v2362_v27 }
 0x2e5   : > { %v2251_v59 = vadd.f32 %v2250_v38, %v2193_v2 }
 0x2e7   : > { %v5522_v26 = vadd.f32 %v2308_v53, %v2251_v59 }
 0x2e8   : > { %v2136_v7 = vpop.f32.mrf.mxu3 }
 0x2e9   : > { %v2137_v52 = vadd.f32 %v2136_v7, %v5355_v1  ;;  %v2413_v6 = vmul.f32 %v5522_v26, %v5522_v26  ;;  %v2365_v41 = vsel %vm2322_vm1, %v5522_v26, 0.0 }
 0x2ea   : > { %v2310_v50 = vpop.f32.mrf.mxu2 }
 0x2eb   : > { %v2195_v12 = vadd.f32 %v2194_v60, %v2137_v52  ;;  %v2460_v42 = vsel %vm2322_vm1, %v2413_v6, 0.0 }
 0x2ec   : > { %v2255_v19 = vpop.f32.mrf.mxu1  ;;  %2366 = vadd.xlane.f32.xlu2 %v2365_v41  ;;  %2461 = vadd.xlane.f32.xlu0 %v2460_v42 }
 0x2ed   : > { %v2253_v14 = vadd.f32 %v2252_v31, %v2195_v12  ;;  %v2325_v63 = vpop.xlane.xlu0 %2324 }
 0x2ee   : > { %v5530_v57 = vmul.f32 0.020408163, %v2325_v63 }
 0x2ef   : > { %v5532_v18 = vadd.f32 %v2310_v50, %v2253_v14  ;;  %v2420_v1 = vpop.xlane.xlu1 %2419 }
 0x2f0   : > { %v2494_v54 = vmul.f32 %v5530_v57, %v5530_v57  ;;  %v2475_v58 = vmul.f32 0.020408163, %v2420_v1  ;;  %v2139_v60 = vpop.f32.mrf.mxu3 }
 0x2f1   : > { %v2140_v22 = vadd.f32 %v2139_v60, %v5364_v51  ;;  %v2414_v62 = vmul.f32 %v5532_v18, %v5532_v18  ;;  %v2368_v28 = vsel %vm2322_vm1, %v5532_v18, 0.0 }
 0x2f2   : > { %v2313_v49 = vpop.f32.mrf.mxu2  ;;  %v2513_v48 = vsub.f32 %v2475_v58, %v2494_v54 }
 0x2f3   : > { %v2198_v20 = vadd.f32 %v5492_v36, %v2140_v22  ;;  %v2463_v23 = vsel %vm2322_vm1, %v2414_v62, 0.0 }
 0x2f4   : > { %v2257_v0 = vpop.f32.mrf.mxu1  ;;  %v5543_v61 = vadd.f32 1e-05, %v2513_v48  ;;  %2464 = vadd.xlane.f32.xlu1 %v2463_v23  ;;  %2369 = vadd.xlane.f32.xlu0 %v2368_v28 }
 0x2f5   : > { %v2256_v44 = vadd.f32 %v2255_v19, %v2198_v20  ;;  %v2328_v8 = vpop.xlane.xlu0 %2327  ;;  %v3997_v19 = vmov 0  }
 0x2f6   : > { %3951 = vrsqrt.f32 %v5543_v61  ;;  %v5546_v51 = vmul.f32 0.020408163, %v2328_v8  ;;  %3939 = vset.pattern.permute.xlu0 %v3997_v19  ;;  %3940 = vset.pattern.permute.xlu2 %v3997_v19  ;;  %vm2576_vm3 = vweird.f32 %v5543_v61 }
 0x2f7   : > { %v5548_v32 = vadd.f32 %v2313_v49, %v2256_v44  ;;  %v2423_v3 = vpop.xlane.xlu2 %2422  ;;  %3941 = vset.pattern.permute.xlu1 %v3997_v19 }
 0x2f8   : > { %v2495_v36 = vmul.f32 %v5546_v51, %v5546_v51  ;;  %v2476_v38 = vmul.f32 0.020408163, %v2423_v3  ;;  %v2141_v15 = vpop.f32.mrf.mxu3 }
 0x2f9   : > { %v2142_v45 = vadd.f32 %v2141_v15, %v5375_v5  ;;  %v2415_v21 = vmul.f32 %v5548_v32, %v5548_v32  ;;  %v2371_v2 = vsel %vm2322_vm1, %v5548_v32, 0.0 }
 0x2fa   : > { %v2315_v35 = vpop.f32.mrf.mxu2  ;;  %v2514_v16 = vsub.f32 %v2476_v38, %v2495_v36 }
 0x2fb   : > { %v2200_v53 = vadd.f32 %v5502_v33, %v2142_v45  ;;  %v2466_v9 = vsel %vm2322_vm1, %v2415_v21, 0.0 }
 0x2fc   : > { %v2260_v31 = vpop.f32.mrf.mxu1  ;;  %v5559_v46 = vpop.eup %3951  ;;  %2467 = vadd.xlane.f32.xlu2 %v2466_v9  ;;  %2372 = vadd.xlane.f32.xlu1 %v2371_v2  ;;  %v5561_v5 = vadd.f32 1e-05, %v2514_v16 }
 0x2fd   : > { %v2258_v27 = vadd.f32 %v2257_v0, %v2200_v53  ;;  %v2331_v59 = vpop.xlane.xlu1 %2330  ;;  %v2571_v7 = vmul.f32 %v5559_v46, %v5543_v61  ;;  %vm2577_vm2 = vweird.f32 %v5559_v46 }
 0x2fe   : > { %v5563_v40 = vmul.f32 0.020408163, %v2331_v59  ;;  %3953 = vrsqrt.f32 %v5561_v5  ;;  %vm2578_vm4 = vmor %vm2576_vm3, %vm2577_vm2  ;;  %vm2586_vm7 = vweird.f32 %v5561_v5 }
 0x2ff   : > { %v5567_v33 = vadd.f32 %v2315_v35, %v2258_v27  ;;  %v2426_v52 = vpop.xlane.xlu0 %2425  ;;  %v2572_v1 = vmul.f32 %v5559_v46, %v2571_v7 }
 0x300   : > { %v2496_v50 = vmul.f32 %v5563_v40, %v5563_v40  ;;  %v2477_v6 = vmul.f32 0.020408163, %v2426_v52  ;;  %v2144_v12 = vpop.f32.mrf.mxu3 }
 0x301   : > { %v2145_v41 = vadd.f32 %v2144_v12, %v5384_v37  ;;  %v2416_v14 = vmul.f32 %v5567_v33, %v5567_v33  ;;  %v2374_v58 = vsel %vm2322_vm1, %v5567_v33, 0.0  ;;  %v2573_v48 = vmul.f32 0.5, %v2572_v1 }
 0x302   : > { %v2318_v42 = vpop.f32.mrf.mxu2  ;;  %v2515_v63 = vsub.f32 %v2477_v6, %v2496_v50  ;;  %v5621_v50 = vld [vmem:[%s5615_s16] sm:$0xff] }
 0x303   : > { %v2203_v54 = vadd.f32 %v5512_v24, %v2145_v41  ;;  %v2469_v60 = vsel %vm2322_vm1, %v2416_v14, 0.0  ;;  %v2574_v8 = vsub.f32 1.5, %v2573_v48 }
 0x304   : > { %v2262_v22 = vpop.f32.mrf.mxu1  ;;  %v5583_v37 = vadd.f32 1e-05, %v2515_v63  ;;  %2375 = vadd.xlane.f32.xlu2 %v2374_v58  ;;  %2470 = vadd.xlane.f32.xlu0 %v2469_v60  ;;  %v5588_v0 = vpop.eup %3953 }
 0x305   : > { %v2261_v49 = vadd.f32 %v2260_v31, %v2203_v54  ;;  %v2334_v62 = vpop.xlane.xlu1 %2333  ;;  %v2581_v3 = vmul.f32 %v5588_v0, %v5561_v5  ;;  %v2575_v2 = vmul.f32 %v5559_v46, %v2574_v8  ;;  %vm2587_vm5 = vweird.f32 %v5588_v0 }
 0x306   : > { %3955 = vrsqrt.f32 %v5583_v37  ;;  %v5592_v44 = vmul.f32 0.020408163, %v2334_v62  ;;  %vm2596_vm8 = vweird.f32 %v5583_v37  ;;  %vm5640_vm9 = vmor %vm2586_vm7, %vm2587_vm5 }
 0x307   : > { %v5586_v20 = vadd.f32 %v2318_v42, %v2261_v49  ;;  %v2582_v9 = vmul.f32 %v5588_v0, %v2581_v3  ;;  %v2579_v6 = vsel %vm2578_vm4, %v5559_v46, %v2575_v2 }
 0x308   : > { %v2146_v24 = vpop.f32.mrf.mxu3  ;;  %v2497_v16 = vmul.f32 %v5592_v44, %v5592_v44  ;;  %v2760_v63 = vmul.f32 %v2579_v6, %v5621_v50 }
 0x309   : > { %v2417_v28 = vmul.f32 %v5586_v20, %v5586_v20  ;;  %v2377_v38 = vsel %vm2322_vm1, %v5586_v20, 0.0  ;;  %v2583_v52 = vmul.f32 0.5, %v2582_v9 }
 0x30a   : > { %v2320_v23 = vpop.f32.mrf.mxu2  ;;  %v2779_v49 = vmul.f32 %v2760_v63, %v5530_v57 }
 0x30b   : > { %v2472_v36 = vsel %vm2322_vm1, %v2417_v28, 0.0  ;;  %v2584_v1 = vsub.f32 1.5, %v2583_v52 }
 0x30c   : > { %v5599_v15 = vpop.eup %3955  ;;  %2473 = vadd.xlane.f32.xlu1 %v2472_v36  ;;  %2378 = vadd.xlane.f32.xlu0 %v2377_v38  ;;  %v5645_v38 = vld [vmem:[%s5615_s16 + $0x8] sm:$0xff] }
 0x30d   : > { %v2591_v45 = vmul.f32 %v5599_v15, %v5583_v37  ;;  %v2337_v35 = vpop.xlane.xlu2 %2336  ;;  %v2429_v21 = vpop.xlane.xlu1 %2428  ;;  %v2585_v46 = vmul.f32 %v5588_v0, %v2584_v1  ;;  %vm2597_vm6 = vweird.f32 %v5599_v15 }
 0x30e   : > { %v2478_v53 = vmul.f32 0.020408163, %v2429_v21  ;;  %v5618_v59 = vmul.f32 0.020408163, %v2337_v35  ;;  %vm2598_vm10 = vmor %vm2596_vm8, %vm2597_vm6  ;;  %v5655_v21 = vld [vmem:[%s5615_s16 + $0x10] sm:$0xff] }
 0x30f   : > { %v2592_v31 = vmul.f32 %v5599_v15, %v2591_v45  ;;  %v2589_v5 = vsel %vm5640_vm9, %v5588_v0, %v2585_v46 }
 0x310   : > { %v2516_v27 = vsub.f32 %v2478_v53, %v2497_v16  ;;  %v2498_v42 = vmul.f32 %v5618_v59, %v5618_v59  ;;  %v2761_v0 = vmul.f32 %v2589_v5, %v5645_v38 }
 0x311   : > { %v2593_v12 = vmul.f32 0.5, %v2592_v31 }
 0x312   : > { %v2554_v7 = vadd.f32 1e-05, %v2516_v27 }
 0x313   : > { %v2594_v54 = vsub.f32 1.5, %v2593_v12 }
 0x314   : > { %3957 = vrsqrt.f32 %v2554_v7  ;;  %vm2606_vm12 = vweird.f32 %v2554_v7 }
 0x315   : > { %v2432_v41 = vpop.xlane.xlu2 %2431  ;;  %v2595_v48 = vmul.f32 %v5599_v15, %v2594_v54 }
 0x316   : > { %v2479_v14 = vmul.f32 0.020408163, %v2432_v41 }
 0x317   : > { %v2435_v61 = vpop.xlane.xlu0 %2434  ;;  %v2599_v16 = vsel %vm2598_vm10, %v5599_v15, %v2595_v48 }
 0x318   : > { %v2517_v58 = vsub.f32 %v2479_v14, %v2498_v42  ;;  %v2480_v45 = vmul.f32 0.020408163, %v2435_v61  ;;  %v2762_v6 = vmul.f32 %v2599_v16, %v5655_v21 }
 0x31a   : > { %v3958_v60 = vpop.eup %3957  ;;  %v5627_v22 = vadd.f32 1e-05, %v2517_v58  ;;  %v5667_v58 = vld [vmem:[%s5615_s16 + $0x18] sm:$0xff] }
 0x31b   : > { %v2601_v62 = vmul.f32 %v3958_v60, %v2554_v7  ;;  %vm2607_vm11 = vweird.f32 %v3958_v60 }
 0x31c   : > { %3959 = vrsqrt.f32 %v5627_v22  ;;  %2817 = vrot.lane.b32.xlu2 %v2779_v49, %s3998_s17  ;;  %vm2608_vm13 = vmor %vm2606_vm12, %vm2607_vm11  ;;  %vm2616_vm15 = vweird.f32 %v5627_v22 }
 0x31d   : > { %v2602_v24 = vmul.f32 %v3958_v60, %v2601_v62  ;;  %v2340_v57 = vpop.xlane.xlu2 %2339 }
 0x31e   : > { %v5638_v23 = vmul.f32 0.020408163, %v2340_v57  ;;  %v5679_v57 = vld [vmem:[%s5615_s16 + $0x20] sm:$0xff] }
 0x31f   : > { %v2603_v8 = vmul.f32 0.5, %v2602_v24  ;;  %v2438_v3 = vpop.xlane.xlu1 %2437  ;;  %v2343_v36 = vpop.xlane.xlu0 %2342  ;;  %v2781_v24 = vmul.f32 %v2762_v6, %v5563_v40 }
 0x320   : > { %v2499_v37 = vmul.f32 %v5638_v23, %v5638_v23  ;;  %v5652_v35 = vmul.f32 0.020408163, %v2343_v36  ;;  %2895 = vperm.xlu0 %3939, %v2760_v63   ;;  %v2481_v31 = vmul.f32 0.020408163, %v2438_v3  ;;  %v2780_v63 = vmul.f32 %v2761_v0, %v5546_v51 }
 0x321   : > { %v2604_v53 = vsub.f32 1.5, %v2603_v8 }
 0x322   : > { %v3960_v9 = vpop.eup %3959  ;;  %v2518_v2 = vsub.f32 %v2480_v45, %v2499_v37  ;;  %v2500_v27 = vmul.f32 %v5652_v35, %v5652_v35 }
 0x323   : > { %v2611_v52 = vmul.f32 %v3960_v9, %v5627_v22  ;;  %v2605_v12 = vmul.f32 %v3958_v60, %v2604_v53  ;;  %vm2617_vm14 = vweird.f32 %v3960_v9 }
 0x324   : > { %v2556_v41 = vadd.f32 1e-05, %v2518_v2  ;;  %v2519_v42 = vsub.f32 %v2481_v31, %v2500_v27  ;;  %2900 = vperm.xlu2 %3940, %v2761_v0   ;;  %vm2618_vm0 = vmor %vm2616_vm15, %vm2617_vm14 }
 0x325   : > { %v2612_v15 = vmul.f32 %v3960_v9, %v2611_v52  ;;  %2905 = vperm.xlu1 %3941, %v2762_v6   ;;  %v2609_v49 = vsel %vm2608_vm13, %v3958_v60, %v2605_v12 }
 0x326   : > { %3961 = vrsqrt.f32 %v2556_v41  ;;  %v5663_v14 = vadd.f32 1e-05, %v2519_v42  ;;  %v2763_v48 = vmul.f32 %v2609_v49, %v5667_v58  ;;  %vm2626_vm3 = vweird.f32 %v2556_v41  ;;  %v5696_v49 = vld [vmem:[%s5615_s16 + $0x30] sm:$0xff] }
 0x327   : > { %v2613_v1 = vmul.f32 0.5, %v2612_v15  ;;  %v2441_v61 = vpop.xlane.xlu2 %2440  ;;  %v2346_v54 = vpop.xlane.xlu1 %2345 }
 0x328   : > { %3963 = vrsqrt.f32 %v5663_v14  ;;  %v5670_v62 = vmul.f32 0.020408163, %v2346_v54  ;;  %2819 = vrot.lane.b32.xlu0 %v2780_v63, %s3998_s17  ;;  %v2482_v46 = vmul.f32 0.020408163, %v2441_v61  ;;  %v2782_v6 = vmul.f32 %v2763_v48, %v5592_v44  ;;  %v5693_v63 = vld [vmem:[%s5615_s16 + $0x28] sm:$0xff] }
 0x329   : > { %v2614_v7 = vsub.f32 1.5, %v2613_v1  ;;  %vm2636_vm6 = vweird.f32 %v5663_v14 }
 0x32a   : > { %v2501_v51 = vmul.f32 %v5670_v62, %v5670_v62 }
 0x32b   : > { %v2615_v60 = vmul.f32 %v3960_v9, %v2614_v7 }
 0x32c   : > { %v3962_v28 = vpop.eup %3961  ;;  %v2520_v8 = vsub.f32 %v2482_v46, %v2501_v51  ;;  %2910 = vperm.xlu2 %3940, %v2763_v48  }
 0x32d   : > { %v2621_v3 = vmul.f32 %v3962_v28, %v2556_v41  ;;  %2821 = vrot.lane.b32.xlu1 %v2781_v24, %s3998_s17  ;;  %v2619_v36 = vsel %vm2618_vm0, %v3960_v9, %v2615_v60  ;;  %vm2627_vm2 = vweird.f32 %v3962_v28 }
 0x32e   : > { %v3964_v5 = vpop.eup %3963  ;;  %v2558_v45 = vadd.f32 1e-05, %v2520_v8  ;;  %v2764_v37 = vmul.f32 %v2619_v36, %v5679_v57  ;;  %vm2628_vm5 = vmor %vm2626_vm3, %vm2627_vm2 }
 0x32f   : > { %v2622_v16 = vmul.f32 %v3962_v28, %v2621_v3  ;;  %v2631_v22 = vmul.f32 %v3964_v5, %v5663_v14  ;;  %v2349_v53 = vpop.xlane.xlu2 %2348  ;;  %v2444_v40 = vpop.xlane.xlu0 %2443  ;;  %vm2637_vm4 = vweird.f32 %v3964_v5 }
 0x330   : > { %3965 = vrsqrt.f32 %v2558_v45  ;;  %v5684_v2 = vmul.f32 0.020408163, %v2349_v53  ;;  %v2783_v0 = vmul.f32 %v2764_v37, %v5618_v59  ;;  %v2483_v52 = vmul.f32 0.020408163, %v2444_v40  ;;  %vm2638_vm7 = vmor %vm2636_vm6, %vm2637_vm4  ;;  %v5710_v40 = vld [vmem:[%s5615_s16 + $0x38] sm:$0xff] }
 0x331   : > { %v2623_v31 = vmul.f32 0.5, %v2622_v16  ;;  %v2632_v27 = vmul.f32 %v3964_v5, %v2631_v22  ;;  %vm2646_vm9 = vweird.f32 %v2558_v45 }
 0x332   : > { %v2502_v9 = vmul.f32 %v5684_v2, %v5684_v2  ;;  %2825 = vrot.lane.b32.xlu0 %v2783_v0, %s3998_s17 }
 0x333   : > { %v2624_v12 = vsub.f32 1.5, %v2623_v31  ;;  %v2633_v42 = vmul.f32 0.5, %v2632_v27 }
 0x334   : > { %v2521_v15 = vsub.f32 %v2483_v52, %v2502_v9  ;;  %2823 = vrot.lane.b32.xlu2 %v2782_v6, %s3998_s17 }
 0x335   : > { %v2625_v1 = vmul.f32 %v3962_v28, %v2624_v12  ;;  %v2634_v59 = vsub.f32 1.5, %v2633_v42  ;;  %2915 = vperm.xlu1 %3941, %v2764_v37  }
 0x336   : > { %v3966_v61 = vpop.eup %3965  ;;  %v2559_v54 = vadd.f32 1e-05, %v2521_v15 }
 0x337   : > { %v2629_v44 = vsel %vm2628_vm5, %v3962_v28, %v2625_v1  ;;  %v2635_v7 = vmul.f32 %v3964_v5, %v2634_v59  ;;  %v2641_v46 = vmul.f32 %v3966_v61, %v2558_v45  ;;  %v2447_v51 = vpop.xlane.xlu1 %2446  ;;  %v2352_v48 = vpop.xlane.xlu0 %2351  ;;  %vm2647_vm8 = vweird.f32 %v3966_v61 }
 0x338   : > { %v2765_v24 = vmul.f32 %v2629_v44, %v5693_v63  ;;  %3967 = vrsqrt.f32 %v2559_v54  ;;  %v5700_v8 = vmul.f32 0.020408163, %v2352_v48  ;;  %v2484_v37 = vmul.f32 0.020408163, %v2447_v51  ;;  %vm2648_vm10 = vmor %vm2646_vm9, %vm2647_vm8  ;;  %v5720_v48 = vld [vmem:[%s5615_s16 + $0x40] sm:$0xff] }
 0x339   : > { %v2639_v41 = vsel %vm2638_vm7, %v3964_v5, %v2635_v7  ;;  %v2642_v60 = vmul.f32 %v3966_v61, %v2641_v46  ;;  %vm2656_vm12 = vweird.f32 %v2559_v54 }
 0x33a   : > { %v2784_v3 = vmul.f32 %v2765_v24, %v5638_v23  ;;  %v2766_v28 = vmul.f32 %v2639_v41, %v5696_v49  ;;  %v2503_v14 = vmul.f32 %v5700_v8, %v5700_v8  ;;  %2920 = vperm.xlu0 %3939, %v2765_v24  }
 0x33b   : > { %v2643_v36 = vmul.f32 0.5, %v2642_v60 }
 0x33c   : > { %v2785_v16 = vmul.f32 %v2766_v28, %v5652_v35  ;;  %2827 = vrot.lane.b32.xlu2 %v2784_v3, %s3998_s17  ;;  %v2522_v5 = vsub.f32 %v2484_v37, %v2503_v14 }
 0x33d   : > { %v2644_v22 = vsub.f32 1.5, %v2643_v36 }
 0x33e   : > { %v3968_v53 = vpop.eup %3967  ;;  %2829 = vrot.lane.b32.xlu1 %v2785_v16, %s3998_s17  ;;  %v2560_v27 = vadd.f32 1e-05, %v2522_v5 }
 0x33f   : > { %v2645_v23 = vmul.f32 %v3966_v61, %v2644_v22  ;;  %v2651_v31 = vmul.f32 %v3968_v53, %v2559_v54  ;;  %v2450_v0 = vpop.xlane.xlu2 %2449  ;;  %v2355_v9 = vpop.xlane.xlu1 %2354  ;;  %vm2657_vm11 = vweird.f32 %v3968_v53 }
 0x340   : > { %v5712_v52 = vmul.f32 0.020408163, %v2355_v9  ;;  %3969 = vrsqrt.f32 %v2560_v27  ;;  %v2485_v42 = vmul.f32 0.020408163, %v2450_v0  ;;  %vm2658_vm13 = vmor %vm2656_vm12, %vm2657_vm11  ;;  %v5730_v9 = vld [vmem:[%s5615_s16 + $0x48] sm:$0xff]  ;;  %vm2666_vm15 = vweird.f32 %v2560_v27 }
 0x341   : > { %v2649_v35 = vsel %vm2648_vm10, %v3966_v61, %v2645_v23  ;;  %v2652_v6 = vmul.f32 %v3968_v53, %v2651_v31 }
 0x342   : > { %v2767_v12 = vmul.f32 %v2649_v35, %v5710_v40  ;;  %v2504_v15 = vmul.f32 %v5712_v52, %v5712_v52 }
 0x343   : > { %v2653_v1 = vmul.f32 0.5, %v2652_v6 }
 0x344   : > { %v2786_v45 = vmul.f32 %v2767_v12, %v5670_v62  ;;  %v2523_v59 = vsub.f32 %v2485_v42, %v2504_v15  ;;  %2925 = vperm.xlu2 %3940, %v2766_v28  }
 0x345   : > { %v2654_v44 = vsub.f32 1.5, %v2653_v1 }
 0x346   : > { %v2561_v7 = vadd.f32 1e-05, %v2523_v59  ;;  %2831 = vrot.lane.b32.xlu0 %v2786_v45, %s3998_s17  ;;  %2930 = vperm.xlu1 %3941, %v2767_v12   ;;  %v3970_v61 = vpop.eup %3969 }
 0x347   : > { %v2358_v46 = vpop.xlane.xlu2 %2357  ;;  %v2453_v51 = vpop.xlane.xlu0 %2452  ;;  %v2655_v24 = vmul.f32 %v3968_v53, %v2654_v44  ;;  %v2661_v41 = vmul.f32 %v3970_v61, %v2560_v27  ;;  %vm2667_vm14 = vweird.f32 %v3970_v61 }
 0x348   : > { %3971 = vrsqrt.f32 %v2561_v7  ;;  %v5722_v60 = vmul.f32 0.020408163, %v2358_v46  ;;  %v2486_v37 = vmul.f32 0.020408163, %v2453_v51  ;;  %vm2668_vm0 = vmor %vm2666_vm15, %vm2667_vm14  ;;  %vm2676_vm3 = vweird.f32 %v2561_v7 }
 0x349   : > { %v2659_v62 = vsel %vm2658_vm13, %v3968_v53, %v2655_v24  ;;  %v2662_v3 = vmul.f32 %v3970_v61, %v2661_v41  ;;  %v5739_v24 = vld [vmem:[%s5615_s16 + $0x50] sm:$0xff] }
 0x34a   : > { %v2768_v28 = vmul.f32 %v2659_v62, %v5720_v48  ;;  %v2505_v36 = vmul.f32 %v5722_v60, %v5722_v60 }
 0x34b   : > { %v2663_v54 = vmul.f32 0.5, %v2662_v3 }
 0x34c   : > { %v2787_v14 = vmul.f32 %v2768_v28, %v5684_v2  ;;  %v2524_v16 = vsub.f32 %v2486_v37, %v2505_v36 }
 0x34d   : > { %v2664_v5 = vsub.f32 1.5, %v2663_v54 }
 0x34e   : > { %v3972_v22 = vpop.eup %3971  ;;  %2935 = vperm.xlu0 %3939, %v2768_v28   ;;  %2833 = vrot.lane.b32.xlu2 %v2787_v14, %s3998_s17  ;;  %v2562_v53 = vadd.f32 1e-05, %v2524_v16 }
 0x34f   : > { %v2671_v23 = vmul.f32 %v3972_v22, %v2561_v7  ;;  %v2456_v31 = vpop.xlane.xlu1 %2455  ;;  %v2361_v0 = vpop.xlane.xlu0 %2360  ;;  %v2665_v35 = vmul.f32 %v3970_v61, %v2664_v5  ;;  %vm2677_vm2 = vweird.f32 %v3972_v22 }
 0x350   : > { %v5732_v6 = vmul.f32 0.020408163, %v2361_v0  ;;  %3973 = vrsqrt.f32 %v2562_v53  ;;  %v2487_v42 = vmul.f32 0.020408163, %v2456_v31  ;;  %vm2678_vm4 = vmor %vm2676_vm3, %vm2677_vm2  ;;  %vm2686_vm6 = vweird.f32 %v2562_v53 }
 0x351   : > { %v2672_v2 = vmul.f32 %v3972_v22, %v2671_v23  ;;  %v2669_v12 = vsel %vm2668_vm0, %v3970_v61, %v2665_v35 }
 0x352   : > { %v2506_v15 = vmul.f32 %v5732_v6, %v5732_v6  ;;  %v2769_v1 = vmul.f32 %v2669_v12, %v5730_v9 }
 0x353   : > { %v2673_v45 = vmul.f32 0.5, %v2672_v2 }
 0x354   : > { %v2525_v59 = vsub.f32 %v2487_v42, %v2506_v15  ;;  %v2788_v44 = vmul.f32 %v2769_v1, %v5700_v8  ;;  %v5752_v42 = vld [vmem:[%s5615_s16 + $0x58] sm:$0xff] }
 0x355   : > { %v2674_v46 = vsub.f32 1.5, %v2673_v45 }
 0x356   : > { %v2563_v27 = vadd.f32 1e-05, %v2525_v59  ;;  %2940 = vperm.xlu2 %3940, %v2769_v1   ;;  %v3974_v51 = vpop.eup %3973  ;;  %2835 = vrot.lane.b32.xlu1 %v2788_v44, %s3998_s17 }
 0x357   : > { %v2675_v41 = vmul.f32 %v3972_v22, %v2674_v46  ;;  %v2459_v61 = vpop.xlane.xlu2 %2458  ;;  %v2364_v62 = vpop.xlane.xlu1 %2363  ;;  %v2681_v3 = vmul.f32 %v3974_v51, %v2562_v53  ;;  %vm2687_vm5 = vweird.f32 %v3974_v51 }
 0x358   : > { %3975 = vrsqrt.f32 %v2563_v27  ;;  %v5742_v36 = vmul.f32 0.020408163, %v2364_v62  ;;  %v2488_v54 = vmul.f32 0.020408163, %v2459_v61  ;;  %vm2688_vm7 = vmor %vm2686_vm6, %vm2687_vm5  ;;  %vm2696_vm9 = vweird.f32 %v2563_v27 }
 0x359   : > { %v2679_v28 = vsel %vm2678_vm4, %v3972_v22, %v2675_v41  ;;  %v2682_v37 = vmul.f32 %v3974_v51, %v2681_v3 }
 0x35a   : > { %v2770_v8 = vmul.f32 %v2679_v28, %v5739_v24  ;;  %v2507_v14 = vmul.f32 %v5742_v36, %v5742_v36  ;;  %v5759_v28 = vld [vmem:[%s5615_s16 + $0x60] sm:$0xff] }
 0x35b   : > { %v2683_v16 = vmul.f32 0.5, %v2682_v37 }
 0x35c   : > { %v2789_v7 = vmul.f32 %v2770_v8, %v5712_v52  ;;  %v2526_v5 = vsub.f32 %v2488_v54, %v2507_v14 }
 0x35d   : > { %v2684_v31 = vsub.f32 1.5, %v2683_v16 }
 0x35e   : > { %v3976_v23 = vpop.eup %3975  ;;  %2837 = vrot.lane.b32.xlu0 %v2789_v7, %s3998_s17  ;;  %v2564_v0 = vadd.f32 1e-05, %v2526_v5  ;;  %2945 = vperm.xlu1 %3941, %v2770_v8  }
 0x35f   : > { %v2691_v22 = vmul.f32 %v3976_v23, %v2563_v27  ;;  %v2367_v35 = vpop.xlane.xlu2 %2366  ;;  %v2462_v2 = vpop.xlane.xlu0 %2461  ;;  %v2685_v15 = vmul.f32 %v3974_v51, %v2684_v31  ;;  %vm2697_vm8 = vweird.f32 %v3976_v23 }
 0x360   : > { %v5749_v12 = vmul.f32 0.020408163, %v2367_v35  ;;  %3977 = vrsqrt.f32 %v2564_v0  ;;  %v2489_v45 = vmul.f32 0.020408163, %v2462_v2  ;;  %vm2698_vm10 = vmor %vm2696_vm9, %vm2697_vm8  ;;  %vm2706_vm12 = vweird.f32 %v2564_v0 }
 0x361   : > { %v2692_v52 = vmul.f32 %v3976_v23, %v2691_v22  ;;  %v2689_v59 = vsel %vm2688_vm7, %v3974_v51, %v2685_v15 }
 0x362   : > { %v2508_v1 = vmul.f32 %v5749_v12, %v5749_v12  ;;  %v2771_v46 = vmul.f32 %v2689_v59, %v5752_v42  ;;  %v5770_v59 = vld [vmem:[%s5615_s16 + $0x68] sm:$0xff] }
 0x363   : > { %v2693_v44 = vmul.f32 0.5, %v2692_v52 }
 0x364   : > { %v2527_v41 = vsub.f32 %v2489_v45, %v2508_v1  ;;  %v2790_v53 = vmul.f32 %v2771_v46, %v5722_v60 }
 0x365   : > { %v2694_v61 = vsub.f32 1.5, %v2693_v44 }
 0x366   : > { %v2565_v62 = vadd.f32 1e-05, %v2527_v41  ;;  %2950 = vperm.xlu0 %3939, %v2771_v46   ;;  %v3978_v3 = vpop.eup %3977  ;;  %2839 = vrot.lane.b32.xlu2 %v2790_v53, %s3998_s17 }
 0x367   : > { %v2695_v8 = vmul.f32 %v3976_v23, %v2694_v61  ;;  %v2465_v37 = vpop.xlane.xlu1 %2464  ;;  %v2370_v54 = vpop.xlane.xlu0 %2369  ;;  %v2701_v51 = vmul.f32 %v3978_v3, %v2564_v0  ;;  %vm2707_vm11 = vweird.f32 %v3978_v3 }
 0x368   : > { %3979 = vrsqrt.f32 %v2565_v62  ;;  %v5762_v7 = vmul.f32 0.020408163, %v2370_v54  ;;  %v2490_v5 = vmul.f32 0.020408163, %v2465_v37  ;;  %vm2708_vm13 = vmor %vm2706_vm12, %vm2707_vm11  ;;  %vm2716_vm15 = vweird.f32 %v2565_v62 }
 0x369   : > { %v2699_v14 = vsel %vm2698_vm10, %v3976_v23, %v2695_v8  ;;  %v2702_v60 = vmul.f32 %v3978_v3, %v2701_v51 }
 0x36a   : > { %v2772_v16 = vmul.f32 %v2699_v14, %v5759_v28  ;;  %v2509_v31 = vmul.f32 %v5762_v7, %v5762_v7 }
 0x36b   : > { %v2703_v22 = vmul.f32 0.5, %v2702_v60 }
 0x36c   : > { %v2791_v27 = vmul.f32 %v2772_v16, %v5732_v6  ;;  %v2528_v35 = vsub.f32 %v2490_v5, %v2509_v31  ;;  %v5780_v5 = vld [vmem:[%s5615_s16 + $0x70] sm:$0xff] }
 0x36d   : > { %v2704_v15 = vsub.f32 1.5, %v2703_v22 }
 0x36e   : > { %v3980_v2 = vpop.eup %3979  ;;  %2841 = vrot.lane.b32.xlu1 %v2791_v27, %s3998_s17  ;;  %v2566_v52 = vadd.f32 1e-05, %v2528_v35  ;;  %2955 = vperm.xlu2 %3940, %v2772_v16  }
 0x36f   : > { %v2711_v23 = vmul.f32 %v3980_v2, %v2565_v62  ;;  %v2468_v1 = vpop.xlane.xlu2 %2467  ;;  %v2373_v45 = vpop.xlane.xlu1 %2372  ;;  %v2705_v44 = vmul.f32 %v3978_v3, %v2704_v15  ;;  %vm2717_vm14 = vweird.f32 %v3980_v2 }
 0x370   : > { %v5772_v46 = vmul.f32 0.020408163, %v2373_v45  ;;  %3981 = vrsqrt.f32 %v2566_v52  ;;  %v2491_v61 = vmul.f32 0.020408163, %v2468_v1  ;;  %vm2718_vm0 = vmor %vm2716_vm15, %vm2717_vm14  ;;  %vm2726_vm3 = vweird.f32 %v2566_v52 }
 0x371   : > { %v2712_v6 = vmul.f32 %v3980_v2, %v2711_v23  ;;  %v2709_v41 = vsel %vm2708_vm13, %v3978_v3, %v2705_v44 }
 0x372   : > { %v2510_v53 = vmul.f32 %v5772_v46, %v5772_v46  ;;  %v2773_v8 = vmul.f32 %v2709_v41, %v5770_v59 }
 0x373   : > { %v2713_v37 = vmul.f32 0.5, %v2712_v6 }
 0x374   : > { %v2529_v54 = vsub.f32 %v2491_v61, %v2510_v53  ;;  %v2792_v51 = vmul.f32 %v2773_v8, %v5742_v36  ;;  %v3999_v61 = vmov 1  }
 0x375   : > { %v2714_v14 = vsub.f32 1.5, %v2713_v37 }
 0x376   : > { %v2567_v0 = vadd.f32 1e-05, %v2529_v54  ;;  %2960 = vperm.xlu1 %3941, %v2773_v8   ;;  %v3982_v16 = vpop.eup %3981  ;;  %2843 = vrot.lane.b32.xlu0 %v2792_v51, %s3998_s17 }
 0x377   : > { %v2376_v3 = vpop.xlane.xlu2 %2375  ;;  %v2471_v60 = vpop.xlane.xlu0 %2470  ;;  %v2715_v31 = vmul.f32 %v3980_v2, %v2714_v14  ;;  %v2721_v27 = vmul.f32 %v3982_v16, %v2566_v52  ;;  %vm2727_vm2 = vweird.f32 %v3982_v16  ;;  %v5794_v14 = vld [vmem:[%s5615_s16 + $0x78] sm:$0xff] }
 0x378   : > { %3983 = vrsqrt.f32 %v2567_v0  ;;  %v5782_v22 = vmul.f32 0.020408163, %v2376_v3  ;;  %v2492_v62 = vmul.f32 0.020408163, %v2471_v60  ;;  %vm2728_vm4 = vmor %vm2726_vm3, %vm2727_vm2  ;;  %vm2736_vm6 = vweird.f32 %v2567_v0 }
 0x379   : > { %v2719_v35 = vsel %vm2718_vm0, %v3980_v2, %v2715_v31  ;;  %v2722_v36 = vmul.f32 %v3982_v16, %v2721_v27 }
 0x37a   : > { %v2774_v15 = vmul.f32 %v2719_v35, %v5780_v5  ;;  %v2511_v23 = vmul.f32 %v5782_v22, %v5782_v22 }
 0x37b   : > { %v2723_v1 = vmul.f32 0.5, %v2722_v36 }
 0x37c   : > { %v2793_v45 = vmul.f32 %v2774_v15, %v5749_v12  ;;  %v2530_v44 = vsub.f32 %v2492_v62, %v2511_v23 }
 0x37d   : > { %v2724_v41 = vsub.f32 1.5, %v2723_v1 }
 0x37e   : > { %v3984_v6 = vpop.eup %3983  ;;  %2845 = vrot.lane.b32.xlu2 %v2793_v45, %s3998_s17  ;;  %3942 = vset.pattern.permute.xlu1 %v3999_v61  ;;  %v5790_v37 = vadd.f32 1e-05, %v2530_v44  ;;  %v5805_v44 = vld [vmem:[%s5615_s16 + $0x80] sm:$0xff] }
 0x37f   : > { %v2731_v2 = vmul.f32 %v3984_v6, %v2567_v0  ;;  %2965 = vperm.xlu0 %3939, %v2774_v15   ;;  %v2818_v53 = vpop.permute.xlu2 %2817  ;;  %v2725_v8 = vmul.f32 %v3982_v16, %v2724_v41  ;;  %v2474_v54 = vpop.xlane.xlu1 %2473  ;;  %vm2737_vm5 = vweird.f32 %v3984_v6 }
 0x380   : > { %v2874_v12 = vsub.f32 %v5621_v50, %v2818_v53  ;;  %v2379_v51 = vpop.xlane.xlu0 %2378  ;;  %v2493_v35 = vmul.f32 0.020408163, %v2474_v54  ;;  %3985 = vrsqrt.f32 %v5790_v37  ;;  %vm2738_vm7 = vmor %vm2736_vm6, %vm2737_vm5  ;;  %vm2746_vm12 = vweird.f32 %v5790_v37 }
 0x381   : > { %v2732_v3 = vmul.f32 %v3984_v6, %v2731_v2  ;;  %v2398_v60 = vmul.f32 0.020408163, %v2379_v51  ;;  %v2729_v31 = vsel %vm2728_vm4, %v3982_v16, %v2725_v8 }
 0x382   : > { %3009 = vperm.xlu1 %3942, %v2874_v12   ;;  %v2775_v15 = vmul.f32 %v2729_v31, %v5794_v14 }
 0x383   : > { %v2733_v27 = vmul.f32 0.5, %v2732_v3  ;;  %v2512_v36 = vmul.f32 %v2398_v60, %v2398_v60 }
 0x384   : > { %v2794_v1 = vmul.f32 %v2775_v15, %v5762_v7 }
 0x385   : > { %v2734_v52 = vsub.f32 1.5, %v2733_v27  ;;  %v2531_v23 = vsub.f32 %v2493_v35, %v2512_v36  ;;  %v5817_v36 = vld [vmem:[%s5615_s16 + $0x90] sm:$0xff] }
 0x386   : > { %2970 = vperm.xlu2 %3940, %v2775_v15   ;;  %v3986_v45 = vpop.eup %3985 }
 0x387   : > { %v2569_v50 = vadd.f32 1e-05, %v2531_v23  ;;  %v5798_v62 = vpop.permute.xlu2 %2900  ;;  %3943 = vset.pattern.permute.xlu0 %v3999_v61  ;;  %v2735_v16 = vmul.f32 %v3984_v6, %v2734_v52  ;;  %v2741_v2 = vmul.f32 %v3986_v45, %v5790_v37  ;;  %vm2747_vm11 = vweird.f32 %v3986_v45 }
 0x388   : > { %vm2748_vm13 = vmor %vm2746_vm12, %vm2747_vm11 }
 0x389   : > { %3987 = vrsqrt.f32 %v2569_v50  ;;  %v2739_v41 = vsel %vm2738_vm7, %v3984_v6, %v2735_v16  ;;  %v2742_v12 = vmul.f32 %v3986_v45, %v2741_v2  ;;  %vm2756_vm9 = vweird.f32 %v2569_v50 }
 0x38a   : > { %2847 = vrot.lane.b32.xlu1 %v2794_v1, %s3998_s17  ;;  %v2776_v8 = vmul.f32 %v2739_v41, %v5805_v44 }
 0x38b   : > { %3944 = vset.pattern.permute.xlu1 %v3997_v19  ;;  %v2743_v31 = vmul.f32 0.5, %v2742_v12 }
 0x38d   : > { %v2744_v52 = vsub.f32 1.5, %v2743_v31  ;;  %v2795_v31 = vmul.f32 %v2776_v8, %v5772_v46 }
 0x38e   : > { %3945 = vset.pattern.permute.xlu2 %v3999_v61 }
 0x38f   : > { %v3988_v53 = vpop.eup %3987  ;;  %v5809_v7 = vpop.permute.xlu2 %2910 }
 0x390   : > { %v2751_v54 = vmul.f32 %v3988_v53, %v2569_v50  ;;  %vm2757_vm8 = vweird.f32 %v3988_v53 }
 0x391   : > { %vm2758_vm10 = vmor %vm2756_vm9, %vm2757_vm8 }
 0x392   : > { %v2752_v51 = vmul.f32 %v3988_v53, %v2751_v54  ;;  %2975 = vperm.xlu1 %3944, %v2776_v8   ;;  %v5812_v0 = vpop.permute.xlu0 %2895  ;;  %v2745_v54 = vmul.f32 %v3986_v45, %v2744_v52 }
 0x394   : > { %v2753_v3 = vmul.f32 0.5, %v2752_v51  ;;  %v5826_v51 = vld [vmem:[%s5615_s16 + $0x88] sm:$0xff] }
 0x396   : > { %v2754_v27 = vsub.f32 1.5, %v2753_v3  ;;  %v2749_v3 = vsel %vm2748_vm13, %v3986_v45, %v2745_v54 }
 0x397   : > { %v2824_v6 = vpop.permute.xlu2 %2823  ;;  %v5814_v35 = vpop.permute.xlu1 %2905 }
 0x398   : > { %v2755_v15 = vmul.f32 %v3988_v53, %v2754_v27 }
 0x39a   : > { %v2759_v23 = vsel %vm2758_vm10, %v3988_v53, %v2755_v15  ;;  %v2820_v1 = vpop.permute.xlu0 %2819  ;;  %3948 = vset.pattern.permute.xlu1 %v3999_v61 }
 0x39b   : > { %v2778_v16 = vmul.f32 %v2759_v23, %v5817_v36  ;;  %v2875_v41 = vsub.f32 %v5645_v38, %v2820_v1  ;;  %v2777_v38 = vmul.f32 %v2749_v3, %v5826_v51 }
 0x39d   : > { %v2797_v2 = vmul.f32 %v2778_v16, %v2398_v60  ;;  %3014 = vperm.xlu0 %3943, %v2875_v41   ;;  %v2877_v60 = vsub.f32 %v5667_v58, %v2824_v6 }
 0x39f   : > { %2853 = vrot.lane.b32.xlu1 %v2797_v2, %s3998_s17  ;;  %v2822_v50 = vpop.permute.xlu1 %2821  ;;  %v2828_v12 = vpop.permute.xlu2 %2827 }
 0x3a0   : > { %v2876_v53 = vsub.f32 %v5655_v21, %v2822_v50  ;;  %v2796_v21 = vmul.f32 %v2777_v38, %v5782_v22  ;;  %v2879_v45 = vsub.f32 %v5693_v63, %v2828_v12 }
 0x3a2   : > { %3019 = vperm.xlu2 %3945, %v2876_v53  }
 0x3a4   : > { %v2826_v46 = vpop.permute.xlu0 %2825 }
 0x3a5   : > { %2849 = vrot.lane.b32.xlu0 %v2795_v31, %s3998_s17 }
 0x3a6   : > { %3946 = vset.pattern.permute.xlu0 %v3997_v19 }
 0x3a7   : > { %3024 = vperm.xlu1 %3948, %v2877_v60   ;;  %v5833_v37 = vpop.permute.xlu1 %2915  ;;  %v5835_v27 = vpop.permute.xlu2 %2925 }
 0x3aa   : > { %2851 = vrot.lane.b32.xlu2 %v2796_v21, %s3998_s17 }
 0x3ab   : > { %3947 = vset.pattern.permute.xlu2 %v3997_v19  ;;  %v2878_v19 = vsub.f32 %v5679_v57, %v2826_v46 }
 0x3ac   : > { %v5844_v52 = vpop.permute.xlu0 %2920 }
 0x3ad   : > { %2980 = vperm.xlu0 %3946, %v2777_v38  }
 0x3af   : > { %3034 = vperm.xlu1 %3948, %v2879_v45   ;;  %v2834_v58 = vpop.permute.xlu2 %2833 }
 0x3b0   : > { %v2830_v8 = vpop.permute.xlu1 %2829  ;;  %v2882_v15 = vsub.f32 %v5720_v48, %v2834_v58 }
 0x3b1   : > { %v2880_v6 = vsub.f32 %v5696_v49, %v2830_v8 }
 0x3b2   : > { %2985 = vperm.xlu2 %3947, %v2778_v16  }
 0x3b5   : > { %3950 = vset.pattern.permute.xlu0 %v3999_v61 }
 0x3b6   : > { %3039 = vperm.xlu0 %3950, %v2880_v6  }
 0x3b7   : > { %3049 = vperm.xlu1 %3948, %v2882_v15   ;;  %v5846_v22 = vpop.permute.xlu2 %2940 }
 0x3b8   : > { %v2832_v63 = vpop.permute.xlu0 %2831  ;;  %v2931_v23 = vpop.permute.xlu1 %2930 }
 0x3b9   : > { %v2881_v1 = vsub.f32 %v5710_v40, %v2832_v63 }
 0x3ba   : > { %3949 = vset.pattern.permute.xlu2 %v3999_v61 }
 0x3bb   : > { %3029 = vperm.xlu2 %3949, %v2878_v19  }
 0x3c0   : > { %v2840_v49 = vpop.permute.xlu2 %2839  ;;  %v5852_v16 = vpop.permute.xlu0 %2935 }
 0x3c1   : > { %v2885_v48 = vsub.f32 %v5752_v42, %v2840_v49 }
 0x3c3   : > { %3044 = vperm.xlu2 %3949, %v2881_v1   ;;  %3064 = vperm.xlu1 %3948, %v2885_v48  }
 0x3c8   : > { %v2836_v41 = vpop.permute.xlu1 %2835  ;;  %v5855_v54 = vpop.permute.xlu2 %2955 }
 0x3c9   : > { %v2883_v2 = vsub.f32 %v5730_v9, %v2836_v41 }
 0x3cb   : > { %3054 = vperm.xlu0 %3950, %v2883_v2  }
 0x3d0   : > { %v2838_v57 = vpop.permute.xlu0 %2837  ;;  %v5858_v50 = vpop.permute.xlu1 %2945 }
 0x3d1   : > { %v2884_v61 = vsub.f32 %v5739_v24, %v2838_v57  ;;  %v2988_v24 = vmul.f32 %v5812_v0, %v5398_v55 }
 0x3d3   : > { %3059 = vperm.xlu2 %3949, %v2884_v61   ;;  %v2993_v61 = vmul.f32 %v5844_v52, %v5443_v10  ;;  %v2998_v10 = vmul.f32 %v5858_v50, %v5484_v39 }
 0x3d8   : > { %v2846_v40 = vpop.permute.xlu2 %2845  ;;  %v5861_v53 = vpop.permute.xlu0 %2950 }
 0x3d9   : > { %v2888_v42 = vsub.f32 %v5780_v5, %v2846_v40 }
 0x3db   : > { %3079 = vperm.xlu1 %3948, %v2888_v42  }
 0x3e0   : > { %v2842_v12 = vpop.permute.xlu1 %2841  ;;  %v5869_v60 = vpop.permute.xlu2 %2970 }
 0x3e1   : > { %v2886_v3 = vsub.f32 %v5759_v28, %v2842_v12 }
 0x3e3   : > { %3069 = vperm.xlu0 %3950, %v2886_v3  }
 0x3e8   : > { %v2844_v9 = vpop.permute.xlu0 %2843  ;;  %v5865_v38 = vpop.permute.xlu1 %2960 }
 0x3e9   : > { %v2887_v31 = vsub.f32 %v5770_v59, %v2844_v9  ;;  %v2990_v59 = vmul.f32 %v5814_v35, %v5417_v43  ;;  %v2989_v43 = vmul.f32 %v5798_v62, %v5408_v17  ;;  %v2991_v17 = vmul.f32 %v5809_v7, %v5426_v13 }
 0x3ea   : > { %v2996_v7 = vmul.f32 %v5852_v16, %v5468_v4  ;;  %v2997_v16 = vmul.f32 %v5846_v22, %v5476_v29  ;;  %v3001_v9 = vmul.f32 %v5865_v38, %v5514_v30  ;;  %v3000_v29 = vmul.f32 %v5855_v54, %v5504_v11 }
 0x3eb   : > { %3074 = vperm.xlu2 %3949, %v2887_v31   ;;  %v3003_v30 = vmul.f32 %v5869_v60, %v5532_v18 }
 0x3f1   : > { %v2966_v8 = vpop.permute.xlu0 %2965 }
 0x3f4   : > { %v3010_v28 = vpop.permute.xlu1 %3009 }
 0x3f5   : > { %v3102_v5 = vadd.f32 %v3010_v28, %v2988_v24 }
 0x3f7   : > { %3121 = vst.msk [vmem:[%s5876_s20] sm:$0xff] %vm2322_vm1, %v3102_v5 }
 0x3fc   : > { %v3020_v21 = vpop.permute.xlu2 %3019  ;;  %v2848_v55 = vpop.permute.xlu1 %2847 }
 0x3fd   : > { %v3104_v0 = vadd.f32 %v3020_v21, %v2990_v59  ;;  %v2889_v46 = vsub.f32 %v5794_v14, %v2848_v55 }
 0x3ff   : > { %3123 = vst.msk [vmem:[%s5876_s20 + $0x10] sm:$0xff] %vm2322_vm1, %v3104_v0  ;;  %3084 = vperm.xlu0 %3950, %v2889_v46  }
 0x404   : > { %v2852_v45 = vpop.permute.xlu2 %2851  ;;  %v5886_v6 = vpop.permute.xlu1 %2975 }
 0x405   : > { %v2891_v58 = vsub.f32 %v5826_v51, %v2852_v45  ;;  %v2992_v51 = vmul.f32 %v5833_v37, %v5434_v25 }
 0x407   : > { %3094 = vperm.xlu1 %3948, %v2891_v58  }
 0x40c   : > { %v5888_v15 = vpop.permute.xlu2 %2985 }
 0x40d   : > { %v3006_v18 = vmul.f32 %v5888_v15, %v5586_v20 }
 0x40f   : > { %v3015_v35 = vpop.permute.xlu0 %3014 }
 0x410   : > { %v3103_v19 = vadd.f32 %v3015_v35, %v2989_v43 }
 0x411   : > { %v2854_v14 = vpop.permute.xlu1 %2853 }
 0x412   : > { %3122 = vst.msk [vmem:[%s5876_s20 + $0x8] sm:$0xff] %vm2322_vm1, %v3103_v19  ;;  %v2892_v63 = vsub.f32 %v5817_v36, %v2854_v14  ;;  %v2995_v36 = vmul.f32 %v2931_v23, %v5460_v34  ;;  %v2994_v34 = vmul.f32 %v5835_v27, %v5450_v47  ;;  %v2999_v47 = vmul.f32 %v5861_v53, %v5494_v56 }
 0x413   : > { %v3002_v56 = vmul.f32 %v2966_v8, %v5522_v26  ;;  %v3004_v26 = vmul.f32 %v5886_v6, %v5548_v32 }
 0x414   : > { %3099 = vperm.xlu0 %3950, %v2892_v63  }
 0x415   : > { %v3030_v1 = vpop.permute.xlu2 %3029 }
 0x416   : > { %v3106_v49 = vadd.f32 %v3030_v1, %v2992_v51 }
 0x417   : > { %v2850_v48 = vpop.permute.xlu0 %2849 }
 0x418   : > { %3125 = vst.msk [vmem:[%s5876_s20 + $0x20] sm:$0xff] %vm2322_vm1, %v3106_v49  ;;  %v2890_v62 = vsub.f32 %v5805_v44, %v2850_v48 }
 0x419   : > { %v3025_v41 = vpop.permute.xlu1 %3024 }
 0x41a   : > { %v3105_v2 = vadd.f32 %v3025_v41, %v2991_v17  ;;  %3089 = vperm.xlu2 %3949, %v2890_v62  }
 0x41c   : > { %3124 = vst.msk [vmem:[%s5876_s20 + $0x18] sm:$0xff] %vm2322_vm1, %v3105_v2 }
 0x41d   : > { %v3045_v25 = vpop.permute.xlu2 %3044 }
 0x41e   : > { %v3109_v37 = vadd.f32 %v3045_v25, %v2995_v36 }
 0x41f   : > { %v2981_v57 = vpop.permute.xlu0 %2980 }
 0x420   : > { %3128 = vst.msk [vmem:[%s5876_s20 + $0x38] sm:$0xff] %vm2322_vm1, %v3109_v37  ;;  %v3005_v11 = vmul.f32 %v2981_v57, %v5567_v33 }
 0x421   : > { %v3035_v13 = vpop.permute.xlu1 %3034 }
 0x422   : > { %v3107_v44 = vadd.f32 %v3035_v13, %v2993_v61 }
 0x424   : > { %3126 = vst.msk [vmem:[%s5876_s20 + $0x28] sm:$0xff] %vm2322_vm1, %v3107_v44 }
 0x428   : > { %v3040_v23 = vpop.permute.xlu0 %3039 }
 0x429   : > { %v3050_v40 = vpop.permute.xlu1 %3049  ;;  %v3108_v42 = vadd.f32 %v3040_v23, %v2994_v34 }
 0x42a   : > { %v3110_v12 = vadd.f32 %v3050_v40, %v2996_v7 }
 0x42b   : > { %3127 = vst.msk [vmem:[%s5876_s20 + $0x30] sm:$0xff] %vm2322_vm1, %v3108_v42 }
 0x42c   : > { %3129 = vst.msk [vmem:[%s5876_s20 + $0x40] sm:$0xff] %vm2322_vm1, %v3110_v12 }
 0x42d   : > { %v3060_v52 = vpop.permute.xlu2 %3059 }
 0x42e   : > { %v3112_v3 = vadd.f32 %v3060_v52, %v2998_v10 }
 0x430   : > { %3131 = vst.msk [vmem:[%s5876_s20 + $0x50] sm:$0xff] %vm2322_vm1, %v3112_v3 }
 0x435   : > { %v3065_v4 = vpop.permute.xlu1 %3064 }
 0x436   : > { %v3113_v27 = vadd.f32 %v3065_v4, %v2999_v47 }
 0x438   : > { %3132 = vst.msk [vmem:[%s5876_s20 + $0x58] sm:$0xff] %vm2322_vm1, %v3113_v27 }
 0x43d   : > { %v3055_v39 = vpop.permute.xlu0 %3054 }
 0x43e   : > { %v3111_v50 = vadd.f32 %v3055_v39, %v2997_v16 }
 0x440   : > { %3130 = vst.msk [vmem:[%s5876_s20 + $0x48] sm:$0xff] %vm2322_vm1, %v3111_v50 }
 0x445   : > { %v3075_v31 = vpop.permute.xlu2 %3074 }
 0x446   : > { %v3115_v24 = vadd.f32 %v3075_v31, %v3001_v9 }
 0x448   : > { %3134 = vst.msk [vmem:[%s5876_s20 + $0x68] sm:$0xff] %vm2322_vm1, %v3115_v24 }
 0x44d   : > { %v3080_v53 = vpop.permute.xlu1 %3079 }
 0x44e   : > { %v3116_v28 = vadd.f32 %v3080_v53, %v3002_v56 }
 0x450   : > { %3135 = vst.msk [vmem:[%s5876_s20 + $0x70] sm:$0xff] %vm2322_vm1, %v3116_v28 }
 0x455   : > { %v3070_v22 = vpop.permute.xlu0 %3069 }
 0x456   : > { %v3114_v5 = vadd.f32 %v3070_v22, %v3000_v29 }
 0x458   : > { %3133 = vst.msk [vmem:[%s5876_s20 + $0x60] sm:$0xff] %vm2322_vm1, %v3114_v5 }
 0x471   : > { %v3085_v38 = vpop.permute.xlu0 %3084 }
 0x472   : > { %v3117_v59 = vadd.f32 %v3085_v38, %v3003_v30 }
 0x474   : > { %3136 = vst.msk [vmem:[%s5876_s20 + $0x78] sm:$0xff] %vm2322_vm1, %v3117_v59  ;;  %v3090_v21 = vpop.permute.xlu2 %3089 }
 0x475   : > { %v3118_v55 = vadd.f32 %v3090_v21, %v3004_v26 }
 0x477   : > { %3137 = vst.msk [vmem:[%s5876_s20 + $0x80] sm:$0xff] %vm2322_vm1, %v3118_v55 }
 0x479   : > { %v3095_v54 = vpop.permute.xlu1 %3094 }
 0x47a   : > { %v3119_v0 = vadd.f32 %v3095_v54, %v3005_v11 }
 0x47c   : > { %3138 = vst.msk [vmem:[%s5876_s20 + $0x88] sm:$0xff] %vm2322_vm1, %v3119_v0 }
 0x486   : > { %v3100_v60 = vpop.permute.xlu0 %3099 }
 0x487   : > { %v3120_v46 = vadd.f32 %v3100_v60, %v3006_v18 }
 0x489   : > { %3139 = vst.msk [vmem:[%s5876_s20 + $0x90] sm:$0xff] %vm2322_vm1, %v3120_v46 }
 0x48a PF: > { %s13_s12 = sadd.s32 1, %s3995_s12  }
 0x48b   : > { %p10_p4 = scmp.ge.s32.totalorder %s13_s12, 4  }
 0x48d   :  { %12 = sbr.rel (!%p10_p4) target bundleno = 1 (0x1), region = 65 }

</bundles_post_ra>
